<compile_context>
chip_gen: v5e
topology: v5e:2x2
jax: 0.10.0
libtpu: 0.0.40
codegen_flags: <defaults>
</compile_context>

<pallas_src>
import jax
import jax.numpy as jnp
import numpy as np
from jax import lax
from jax.experimental import pallas as pl
from jax.experimental.pallas import tpu as pltpu

# ---- model hyper-parameters (fixed by the PyTorch module) -------------------
C_IN = 16          # conv1 in/out channels (depthwise)
C_OUT = 32         # conv2 out channels
K = 8              # conv1 kernel size
PAD1 = 16          # conv1 padding
PAD2 = 1           # conv2 padding
H = W = 24         # input spatial size (as in the reference script)

H1 = W1 = H + 2 * PAD1 - K + 1     # conv1 output size -> 49
H2 = W2 = H1 + 2 * PAD2            # conv2 output size -> 51
HP = H + 2 * (K - 1)               # working pad for the interior -> 38
INT = H + K - 1                    # data-dependent interior size -> 31
OFF = PAD1 - (K - 1) + PAD2        # interior offset inside 51x51 output -> 10


# ---------------------------------------------------------------------------
# Fused kernel
#   xp_ref : (HP, C_IN, HP)    padded input, rows leading / channels sublane
#   w1_ref : (K*K, C_IN, INT)  depthwise weights, pre-broadcast over lanes
#   b1_ref : (1, C_IN)         depthwise bias
#   w2_ref : (C_OUT, C_IN)     1x1 conv weights (VMEM -> MXU operand)
#   b2_ref : (C_OUT, 1)        1x1 conv bias
#   o_ref  : (H2, C_OUT, W2)   sigmoid(conv2) output, rows leading
# ---------------------------------------------------------------------------
def fused_kernel(xp_ref, w1_ref, b1_ref, w2_ref, b2_ref, o_ref):
    w2v = w2_ref[...]                                        # (32, 16)
    b1v = b1_ref[...]                                        # (1, 16)
    b2v = b2_ref[...]                                        # (32, 1)

    # per-channel constants of the data-independent regions
    ann_pre = jnp.sum(w2v * b1v, axis=1, keepdims=True) + b2v   # w2 @ b1 + b2
    border_s = jax.nn.sigmoid(b2v)                               # conv2 pad ring
    ann_s = jax.nn.sigmoid(ann_pre)                              # bias-only annulus

    brow = jnp.broadcast_to(border_s, (C_OUT, W2))               # (32, 51)
    arow = jnp.broadcast_to(ann_s, (C_OUT, W2))
    col = lax.broadcasted_iota(jnp.int32, (C_OUT, W2), 1)
    prow = jnp.where((col == 0) | (col == W2 - 1), brow, arow)   # annulus row
    prow_l = prow[:, :OFF]                                       # cols 0..9
    prow_r = prow[:, OFF + INT:]                                 # cols 41..50
    ann_pre_b = jnp.broadcast_to(ann_pre, (C_OUT, INT))          # hoisted bcast

    # ---- constant fills: everything outside the 31x31 interior ------------
    o_ref[0] = brow
    o_ref[H2 - 1] = brow
    for i in range(1, H2 - 1):                  # static Python loop
        if OFF <= i < OFF + INT:                # interior rows: only the sides
            o_ref[i, :, :OFF] = prow_l
            o_ref[i, :, OFF + INT:] = prow_r
        else:                                   # pure-annulus rows
            o_ref[i] = prow

    # ---- per-row: depthwise 8x8 taps (VPU) -> 1x1 conv (MXU) -> sigmoid ---
    def row_body(r, carry):
        acc = None                               # (16, 31) ~= 2 vregs live
        for ki in range(K):                      # 64 taps fully unrolled,
            part = None                          # per-ki partial sums keep the
            for kj in range(K):                  # add chain short
                xsl = xp_ref[r + ki, :, kj:kj + INT]   # (16, 31) static offsets
                wsl = w1_ref[ki * K + kj]              # (16, 31) pre-broadcast
                term = xsl * wsl
                part = term if part is None else part + term
            acc = part if acc is None else acc + part
        # 1x1 conv over channels on the MXU (b1 folded into ann_pre_b)
        pre = jnp.dot(w2v, acc, preferred_element_type=jnp.float32)  # (32, 31)
        o_ref[OFF + r, :, OFF:OFF + INT] = jax.nn.sigmoid(pre + ann_pre_b)
        return carry

    lax.fori_loop(0, INT, row_body, 0)


@jax.jit
def model_forward(x, w1, b1, w2, b2):
    # x: (1, C_IN, H, W) NCHW f32
    # w1: (C_IN, K, K) depthwise weights   b1: (C_IN,)
    # w2: (C_OUT, C_IN) 1x1 weights        b2: (C_OUT,)

    # layout plumbing (wrapper side): rows-leading transpose + (K-1) zero pad
    x_t = jnp.pad(jnp.transpose(x[0], (1, 0, 2)),
                  ((K - 1, K - 1), (0, 0), (K - 1, K - 1)))        # (38,16,38)
    # depthwise weights as (tap, channel, lane-broadcast)
    w1b = jnp.broadcast_to(
        jnp.transpose(w1.reshape(C_IN, K * K), (1, 0))[:, :, None],
        (K * K, C_IN, INT))                                        # (64,16,31)
    b1r = b1.reshape(1, C_IN)
    b2r = b2.reshape(C_OUT, 1)

    out_t = pl.pallas_call(
        fused_kernel,
        out_shape=jax.ShapeDtypeStruct((H2, C_OUT, W2), jnp.float32),
        grid_spec=pltpu.PrefetchScalarGridSpec(
            num_scalar_prefetch=0,
            grid=(1,),
            in_specs=[
                pl.BlockSpec((HP, C_IN, HP), lambda i: (0, 0, 0)),
                pl.BlockSpec((K * K, C_IN, INT), lambda i: (0, 0, 0)),
                pl.BlockSpec((1, C_IN), lambda i: (0, 0)),
                pl.BlockSpec((C_OUT, C_IN), lambda i: (0, 0)),
                pl.BlockSpec((C_OUT, 1), lambda i: (0, 0)),
            ],
            out_specs=pl.BlockSpec((H2, C_OUT, W2), lambda i: (0, 0, 0)),
        ),
        compiler_params=pltpu.CompilerParams(
            dimension_semantics=("arbitrary",)),
    )(x_t, w1b, b1r, w2, b2r)

    # rows-leading -> NCHW
    return jnp.transpose(out_t, (1, 0, 2)).reshape(1, C_OUT, H2, W2)


# ---------------------------------------------------------------------------
# Pure-JAX reference for verification
# ---------------------------------------------------------------------------
def reference_forward(x, w1, b1, w2, b2):
    dn = ("NCHW", "OIHW", "NCHW")
    v1 = lax.conv_general_dilated(
        x, w1.reshape(C_IN, 1, K, K), (1, 1),
        ((PAD1, PAD1), (PAD1, PAD1)), feature_group_count=C_IN,
        dimension_numbers=dn,
        precision=lax.Precision.HIGHEST) + b1.reshape(1, C_IN, 1, 1)
    v2 = lax.conv_general_dilated(
        v1, w2.reshape(C_OUT, C_IN, 1, 1), (1, 1),
        ((PAD2, PAD2), (PAD2, PAD2)), dimension_numbers=dn,
        precision=lax.Precision.HIGHEST) + b2.reshape(1, C_OUT, 1, 1)
    return jax.nn.sigmoid(v2)


if __name__ == "__main__":
    key = jax.random.PRNGKey(0)
    kx, k1, k2, k3, k4 = jax.random.split(key, 5)

    # input (same shape as the reference script: 1x16x24x24)
    x = jax.random.normal(kx, (1, C_IN, H, W), dtype=jnp.float32)

    # deterministic parameter init (PyTorch-like uniform bounds)
    bound1 = 1.0 / np.sqrt(1 * K * K)            # conv1: fan_in = 1*8*8
    w1 = jax.random.uniform(k1, (C_IN, K, K), jnp.float32, -bound1, bound1)
    b1 = jax.random.uniform(k2, (C_IN,), jnp.float32, -bound1, bound1)
    bound2 = 1.0 / np.sqrt(C_IN * 1 * 1)         # conv2: fan_in = 16*1*1
    w2 = jax.random.uniform(k3, (C_OUT, C_IN), jnp.float32, -bound2, bound2)
    b2 = jax.random.uniform(k4, (C_OUT,), jnp.float32, -bound2, bound2)

    out = model_forward(x, w1, b1, w2, b2)
    out = jax.block_until_ready(out)

    ref = jax.block_until_ready(reference_forward(x, w1, b1, w2, b2))
    assert out.shape == (1, C_OUT, H2, W2), out.shape
    # small headroom over 1e-5: the in-kernel MXU f32 matmul is multi-pass,
    # not bit-identical to the XLA conv reference
    assert np.allclose(np.asarray(out), np.asarray(ref), atol=1e-4, rtol=1e-4)

    print("KERNEL_OK")
</pallas_src>

<mosaic_0001>
module attributes {stable_mosaic.version = 11 : i64} {
  func.func @fused_kernel(%arg0: i32, %arg1: memref<38x16x38xf32, #tpu.memory_space<vmem>>, %arg2: memref<64x16x31xf32, #tpu.memory_space<vmem>>, %arg3: memref<1x16xf32, #tpu.memory_space<vmem>>, %arg4: memref<32x16xf32, #tpu.memory_space<vmem>>, %arg5: memref<32x1xf32, #tpu.memory_space<vmem>>, %arg6: memref<51x32x51xf32, #tpu.memory_space<vmem>>) attributes {dimension_semantics = [#tpu.dimension_semantics<arbitrary>], iteration_bounds = array<i64: 1>, scalar_prefetch = 0 : i64, scratch_operands = 0 : i64, tpu.core_type = #tpu.core_type<tc>, window_params = [{pipeline_mode = #tpu.pipeline_mode<synchronous>, transform_indices = @transform_0, window_bounds = array<i64: 38, 16, 38>}, {pipeline_mode = #tpu.pipeline_mode<synchronous>, transform_indices = @transform_1, window_bounds = array<i64: 64, 16, 31>}, {pipeline_mode = #tpu.pipeline_mode<synchronous>, transform_indices = @transform_2, window_bounds = array<i64: 1, 16>}, {pipeline_mode = #tpu.pipeline_mode<synchronous>, transform_indices = @transform_3, window_bounds = array<i64: 32, 16>}, {pipeline_mode = #tpu.pipeline_mode<synchronous>, transform_indices = @transform_4, window_bounds = array<i64: 32, 1>}, {pipeline_mode = #tpu.pipeline_mode<synchronous>, transform_indices = @transform_5, window_bounds = array<i64: 51, 32, 51>}]} {
    %c0 = arith.constant 0 : index
    %c0_0 = arith.constant 0 : index
    %0 = vector.load %arg4[%c0, %c0_0] : memref<32x16xf32, #tpu.memory_space<vmem>>, vector<32x16xf32>
    %c0_1 = arith.constant 0 : index
    %c0_2 = arith.constant 0 : index
    %1 = vector.load %arg3[%c0_1, %c0_2] : memref<1x16xf32, #tpu.memory_space<vmem>>, vector<1x16xf32>
    %c0_3 = arith.constant 0 : index
    %c0_4 = arith.constant 0 : index
    %2 = vector.load %arg5[%c0_3, %c0_4] : memref<32x1xf32, #tpu.memory_space<vmem>>, vector<32x1xf32>
    %3 = vector.broadcast %1 : vector<1x16xf32> to vector<32x16xf32>
    %4 = arith.mulf %0, %3 : vector<32x16xf32>
    %cst = arith.constant dense<0.000000e+00> : vector<32xf32>
    %5 = vector.multi_reduction <add>, %4, %cst [1] : vector<32x16xf32> to vector<32xf32>
    %6 = vector.shape_cast %5 : vector<32xf32> to vector<32x1xf32>
    %7 = arith.addf %6, %2 : vector<32x1xf32>
    %8 = arith.negf %2 : vector<32x1xf32>
    %9 = math.exp %8 : vector<32x1xf32>
    %cst_5 = arith.constant 1.000000e+00 : f32
    %10 = vector.broadcast %cst_5 : f32 to vector<32x1xf32>
    %11 = arith.addf %10, %9 : vector<32x1xf32>
    %12 = arith.divf %10, %11 : vector<32x1xf32>
    %13 = arith.negf %7 : vector<32x1xf32>
    %14 = math.exp %13 : vector<32x1xf32>
    %cst_6 = arith.constant 1.000000e+00 : f32
    %15 = vector.broadcast %cst_6 : f32 to vector<32x1xf32>
    %16 = arith.addf %15, %14 : vector<32x1xf32>
    %17 = arith.divf %15, %16 : vector<32x1xf32>
    %18 = vector.shape_cast %12 : vector<32x1xf32> to vector<32x1xf32>
    %19 = vector.broadcast %18 : vector<32x1xf32> to vector<32x51xf32>
    %20 = vector.shape_cast %17 : vector<32x1xf32> to vector<32x1xf32>
    %21 = vector.broadcast %20 : vector<32x1xf32> to vector<32x51xf32>
    %22 = tpu.iota {dimensions = array<i32: 1>} : vector<32x51xi32>
    %c0_i32 = arith.constant 0 : i32
    %23 = vector.broadcast %c0_i32 : i32 to vector<32x51xi32>
    %24 = arith.cmpi eq, %22, %23 : vector<32x51xi32>
    %c50_i32 = arith.constant 50 : i32
    %25 = vector.broadcast %c50_i32 : i32 to vector<32x51xi32>
    %26 = arith.cmpi eq, %22, %25 : vector<32x51xi32>
    %27 = arith.ori %24, %26 : vector<32x51xi1>
    %28 = arith.select %27, %19, %21 : vector<32x51xi1>, vector<32x51xf32>
    %29 = vector.extract_strided_slice %28 {offsets = [0, 0], sizes = [32, 10], strides = [1, 1]} : vector<32x51xf32> to vector<32x10xf32>
    %30 = vector.extract_strided_slice %28 {offsets = [0, 41], sizes = [32, 10], strides = [1, 1]} : vector<32x51xf32> to vector<32x10xf32>
    %31 = vector.shape_cast %7 : vector<32x1xf32> to vector<32x1xf32>
    %32 = vector.broadcast %31 : vector<32x1xf32> to vector<32x31xf32>
    %c0_7 = arith.constant 0 : index
    %c0_8 = arith.constant 0 : index
    %c0_9 = arith.constant 0 : index
    %33 = vector.load %arg6[%c0_7, %c0_8, %c0_9] : memref<51x32x51xf32, #tpu.memory_space<vmem>>, vector<1x32x51xf32>
    %34 = vector.shape_cast %33 : vector<1x32x51xf32> to vector<32x51xf32>
    %35 = vector.shape_cast %19 : vector<32x51xf32> to vector<1x32x51xf32>
    tpu.vector_store %arg6[%c0_7, %c0_8, %c0_9], %35 {strides = array<i32>} : memref<51x32x51xf32, #tpu.memory_space<vmem>>, vector<1x32x51xf32>,
    %c50 = arith.constant 50 : index
    %c0_10 = arith.constant 0 : index
    %c0_11 = arith.constant 0 : index
    %36 = vector.load %arg6[%c50, %c0_10, %c0_11] : memref<51x32x51xf32, #tpu.memory_space<vmem>>, vector<1x32x51xf32>
    %37 = vector.shape_cast %36 : vector<1x32x51xf32> to vector<32x51xf32>
    %38 = vector.shape_cast %19 : vector<32x51xf32> to vector<1x32x51xf32>
    tpu.vector_store %arg6[%c50, %c0_10, %c0_11], %38 {strides = array<i32>} : memref<51x32x51xf32, #tpu.memory_space<vmem>>, vector<1x32x51xf32>,
    %c1 = arith.constant 1 : index
    %c0_12 = arith.constant 0 : index
    %c0_13 = arith.constant 0 : index
    %39 = vector.load %arg6[%c1, %c0_12, %c0_13] : memref<51x32x51xf32, #tpu.memory_space<vmem>>, vector<1x32x51xf32>
    %40 = vector.shape_cast %39 : vector<1x32x51xf32> to vector<32x51xf32>
    %41 = vector.shape_cast %28 : vector<32x51xf32> to vector<1x32x51xf32>
    tpu.vector_store %arg6[%c1, %c0_12, %c0_13], %41 {strides = array<i32>} : memref<51x32x51xf32, #tpu.memory_space<vmem>>, vector<1x32x51xf32>,
    %c2 = arith.constant 2 : index
    %c0_14 = arith.constant 0 : index
    %c0_15 = arith.constant 0 : index
    %42 = vector.load %arg6[%c2, %c0_14, %c0_15] : memref<51x32x51xf32, #tpu.memory_space<vmem>>, vector<1x32x51xf32>
    %43 = vector.shape_cast %42 : vector<1x32x51xf32> to vector<32x51xf32>
    %44 = vector.shape_cast %28 : vector<32x51xf32> to vector<1x32x51xf32>
    tpu.vector_store %arg6[%c2, %c0_14, %c0_15], %44 {strides = array<i32>} : memref<51x32x51xf32, #tpu.memory_space<vmem>>, vector<1x32x51xf32>,
    %c3 = arith.constant 3 : index
    %c0_16 = arith.constant 0 : index
    %c0_17 = arith.constant 0 : index
    %45 = vector.load %arg6[%c3, %c0_16, %c0_17] : memref<51x32x51xf32, #tpu.memory_space<vmem>>, vector<1x32x51xf32>
    %46 = vector.shape_cast %45 : vector<1x32x51xf32> to vector<32x51xf32>
    %47 = vector.shape_cast %28 : vector<32x51xf32> to vector<1x32x51xf32>
    tpu.vector_store %arg6[%c3, %c0_16, %c0_17], %47 {strides = array<i32>} : memref<51x32x51xf32, #tpu.memory_space<vmem>>, vector<1x32x51xf32>,
    %c4 = arith.constant 4 : index
    %c0_18 = arith.constant 0 : index
    %c0_19 = arith.constant 0 : index
    %48 = vector.load %arg6[%c4, %c0_18, %c0_19] : memref<51x32x51xf32, #tpu.memory_space<vmem>>, vector<1x32x51xf32>
    %49 = vector.shape_cast %48 : vector<1x32x51xf32> to vector<32x51xf32>
    %50 = vector.shape_cast %28 : vector<32x51xf32> to vector<1x32x51xf32>
    tpu.vector_store %arg6[%c4, %c0_18, %c0_19], %50 {strides = array<i32>} : memref<51x32x51xf32, #tpu.memory_space<vmem>>, vector<1x32x51xf32>,
    %c5 = arith.constant 5 : index
    %c0_20 = arith.constant 0 : index
    %c0_21 = arith.constant 0 : index
    %51 = vector.load %arg6[%c5, %c0_20, %c0_21] : memref<51x32x51xf32, #tpu.memory_space<vmem>>, vector<1x32x51xf32>
    %52 = vector.shape_cast %51 : vector<1x32x51xf32> to vector<32x51xf32>
    %53 = vector.shape_cast %28 : vector<32x51xf32> to vector<1x32x51xf32>
    tpu.vector_store %arg6[%c5, %c0_20, %c0_21], %53 {strides = array<i32>} : memref<51x32x51xf32, #tpu.memory_space<vmem>>, vector<1x32x51xf32>,
    %c6 = arith.constant 6 : index
    %c0_22 = arith.constant 0 : index
    %c0_23 = arith.constant 0 : index
    %54 = vector.load %arg6[%c6, %c0_22, %c0_23] : memref<51x32x51xf32, #tpu.memory_space<vmem>>, vector<1x32x51xf32>
    %55 = vector.shape_cast %54 : vector<1x32x51xf32> to vector<32x51xf32>
    %56 = vector.shape_cast %28 : vector<32x51xf32> to vector<1x32x51xf32>
    tpu.vector_store %arg6[%c6, %c0_22, %c0_23], %56 {strides = array<i32>} : memref<51x32x51xf32, #tpu.memory_space<vmem>>, vector<1x32x51xf32>,
    %c7 = arith.constant 7 : index
    %c0_24 = arith.constant 0 : index
    %c0_25 = arith.constant 0 : index
    %57 = vector.load %arg6[%c7, %c0_24, %c0_25] : memref<51x32x51xf32, #tpu.memory_space<vmem>>, vector<1x32x51xf32>
    %58 = vector.shape_cast %57 : vector<1x32x51xf32> to vector<32x51xf32>
    %59 = vector.shape_cast %28 : vector<32x51xf32> to vector<1x32x51xf32>
    tpu.vector_store %arg6[%c7, %c0_24, %c0_25], %59 {strides = array<i32>} : memref<51x32x51xf32, #tpu.memory_space<vmem>>, vector<1x32x51xf32>,
    %c8 = arith.constant 8 : index
    %c0_26 = arith.constant 0 : index
    %c0_27 = arith.constant 0 : index
    %60 = vector.load %arg6[%c8, %c0_26, %c0_27] : memref<51x32x51xf32, #tpu.memory_space<vmem>>, vector<1x32x51xf32>
    %61 = vector.shape_cast %60 : vector<1x32x51xf32> to vector<32x51xf32>
    %62 = vector.shape_cast %28 : vector<32x51xf32> to vector<1x32x51xf32>
    tpu.vector_store %arg6[%c8, %c0_26, %c0_27], %62 {strides = array<i32>} : memref<51x32x51xf32, #tpu.memory_space<vmem>>, vector<1x32x51xf32>,
    %c9 = arith.constant 9 : index
    %c0_28 = arith.constant 0 : index
    %c0_29 = arith.constant 0 : index
    %63 = vector.load %arg6[%c9, %c0_28, %c0_29] : memref<51x32x51xf32, #tpu.memory_space<vmem>>, vector<1x32x51xf32>
    %64 = vector.shape_cast %63 : vector<1x32x51xf32> to vector<32x51xf32>
    %65 = vector.shape_cast %28 : vector<32x51xf32> to vector<1x32x51xf32>
    tpu.vector_store %arg6[%c9, %c0_28, %c0_29], %65 {strides = array<i32>} : memref<51x32x51xf32, #tpu.memory_space<vmem>>, vector<1x32x51xf32>,
    %c10 = arith.constant 10 : index
    %c0_30 = arith.constant 0 : index
    %c0_31 = arith.constant 0 : index
    %66 = vector.load %arg6[%c10, %c0_30, %c0_31] : memref<51x32x51xf32, #tpu.memory_space<vmem>>, vector<1x32x10xf32>
    %67 = vector.shape_cast %66 : vector<1x32x10xf32> to vector<32x10xf32>
    %68 = vector.shape_cast %29 : vector<32x10xf32> to vector<1x32x10xf32>
    tpu.vector_store %arg6[%c10, %c0_30, %c0_31], %68 {strides = array<i32>} : memref<51x32x51xf32, #tpu.memory_space<vmem>>, vector<1x32x10xf32>,
    %c10_32 = arith.constant 10 : index
    %c0_33 = arith.constant 0 : index
    %c41 = arith.constant 41 : index
    %69 = vector.load %arg6[%c10_32, %c0_33, %c41] : memref<51x32x51xf32, #tpu.memory_space<vmem>>, vector<1x32x10xf32>
    %70 = vector.shape_cast %69 : vector<1x32x10xf32> to vector<32x10xf32>
    %71 = vector.shape_cast %30 : vector<32x10xf32> to vector<1x32x10xf32>
    tpu.vector_store %arg6[%c10_32, %c0_33, %c41], %71 {strides = array<i32>} : memref<51x32x51xf32, #tpu.memory_space<vmem>>, vector<1x32x10xf32>,
    %c11 = arith.constant 11 : index
    %c0_34 = arith.constant 0 : index
    %c0_35 = arith.constant 0 : index
    %72 = vector.load %arg6[%c11, %c0_34, %c0_35] : memref<51x32x51xf32, #tpu.memory_space<vmem>>, vector<1x32x10xf32>
    %73 = vector.shape_cast %72 : vector<1x32x10xf32> to vector<32x10xf32>
    %74 = vector.shape_cast %29 : vector<32x10xf32> to vector<1x32x10xf32>
    tpu.vector_store %arg6[%c11, %c0_34, %c0_35], %74 {strides = array<i32>} : memref<51x32x51xf32, #tpu.memory_space<vmem>>, vector<1x32x10xf32>,
    %c11_36 = arith.constant 11 : index
    %c0_37 = arith.constant 0 : index
    %c41_38 = arith.constant 41 : index
    %75 = vector.load %arg6[%c11_36, %c0_37, %c41_38] : memref<51x32x51xf32, #tpu.memory_space<vmem>>, vector<1x32x10xf32>
    %76 = vector.shape_cast %75 : vector<1x32x10xf32> to vector<32x10xf32>
    %77 = vector.shape_cast %30 : vector<32x10xf32> to vector<1x32x10xf32>
    tpu.vector_store %arg6[%c11_36, %c0_37, %c41_38], %77 {strides = array<i32>} : memref<51x32x51xf32, #tpu.memory_space<vmem>>, vector<1x32x10xf32>,
    %c12 = arith.constant 12 : index
    %c0_39 = arith.constant 0 : index
    %c0_40 = arith.constant 0 : index
    %78 = vector.load %arg6[%c12, %c0_39, %c0_40] : memref<51x32x51xf32, #tpu.memory_space<vmem>>, vector<1x32x10xf32>
    %79 = vector.shape_cast %78 : vector<1x32x10xf32> to vector<32x10xf32>
    %80 = vector.shape_cast %29 : vector<32x10xf32> to vector<1x32x10xf32>
    tpu.vector_store %arg6[%c12, %c0_39, %c0_40], %80 {strides = array<i32>} : memref<51x32x51xf32, #tpu.memory_space<vmem>>, vector<1x32x10xf32>,
    %c12_41 = arith.constant 12 : index
    %c0_42 = arith.constant 0 : index
    %c41_43 = arith.constant 41 : index
    %81 = vector.load %arg6[%c12_41, %c0_42, %c41_43] : memref<51x32x51xf32, #tpu.memory_space<vmem>>, vector<1x32x10xf32>
    %82 = vector.shape_cast %81 : vector<1x32x10xf32> to vector<32x10xf32>
    %83 = vector.shape_cast %30 : vector<32x10xf32> to vector<1x32x10xf32>
    tpu.vector_store %arg6[%c12_41, %c0_42, %c41_43], %83 {strides = array<i32>} : memref<51x32x51xf32, #tpu.memory_space<vmem>>, vector<1x32x10xf32>,
    %c13 = arith.constant 13 : index
    %c0_44 = arith.constant 0 : index
    %c0_45 = arith.constant 0 : index
    %84 = vector.load %arg6[%c13, %c0_44, %c0_45] : memref<51x32x51xf32, #tpu.memory_space<vmem>>, vector<1x32x10xf32>
    %85 = vector.shape_cast %84 : vector<1x32x10xf32> to vector<32x10xf32>
    %86 = vector.shape_cast %29 : vector<32x10xf32> to vector<1x32x10xf32>
    tpu.vector_store %arg6[%c13, %c0_44, %c0_45], %86 {strides = array<i32>} : memref<51x32x51xf32, #tpu.memory_space<vmem>>, vector<1x32x10xf32>,
    %c13_46 = arith.constant 13 : index
    %c0_47 = arith.constant 0 : index
    %c41_48 = arith.constant 41 : index
    %87 = vector.load %arg6[%c13_46, %c0_47, %c41_48] : memref<51x32x51xf32, #tpu.memory_space<vmem>>, vector<1x32x10xf32>
    %88 = vector.shape_cast %87 : vector<1x32x10xf32> to vector<32x10xf32>
    %89 = vector.shape_cast %30 : vector<32x10xf32> to vector<1x32x10xf32>
    tpu.vector_store %arg6[%c13_46, %c0_47, %c41_48], %89 {strides = array<i32>} : memref<51x32x51xf32, #tpu.memory_space<vmem>>, vector<1x32x10xf32>,
    %c14 = arith.constant 14 : index
    %c0_49 = arith.constant 0 : index
    %c0_50 = arith.constant 0 : index
    %90 = vector.load %arg6[%c14, %c0_49, %c0_50] : memref<51x32x51xf32, #tpu.memory_space<vmem>>, vector<1x32x10xf32>
    %91 = vector.shape_cast %90 : vector<1x32x10xf32> to vector<32x10xf32>
    %92 = vector.shape_cast %29 : vector<32x10xf32> to vector<1x32x10xf32>
    tpu.vector_store %arg6[%c14, %c0_49, %c0_50], %92 {strides = array<i32>} : memref<51x32x51xf32, #tpu.memory_space<vmem>>, vector<1x32x10xf32>,
    %c14_51 = arith.constant 14 : index
    %c0_52 = arith.constant 0 : index
    %c41_53 = arith.constant 41 : index
    %93 = vector.load %arg6[%c14_51, %c0_52, %c41_53] : memref<51x32x51xf32, #tpu.memory_space<vmem>>, vector<1x32x10xf32>
    %94 = vector.shape_cast %93 : vector<1x32x10xf32> to vector<32x10xf32>
    %95 = vector.shape_cast %30 : vector<32x10xf32> to vector<1x32x10xf32>
    tpu.vector_store %arg6[%c14_51, %c0_52, %c41_53], %95 {strides = array<i32>} : memref<51x32x51xf32, #tpu.memory_space<vmem>>, vector<1x32x10xf32>,
    %c15 = arith.constant 15 : index
    %c0_54 = arith.constant 0 : index
    %c0_55 = arith.constant 0 : index
    %96 = vector.load %arg6[%c15, %c0_54, %c0_55] : memref<51x32x51xf32, #tpu.memory_space<vmem>>, vector<1x32x10xf32>
    %97 = vector.shape_cast %96 : vector<1x32x10xf32> to vector<32x10xf32>
    %98 = vector.shape_cast %29 : vector<32x10xf32> to vector<1x32x10xf32>
    tpu.vector_store %arg6[%c15, %c0_54, %c0_55], %98 {strides = array<i32>} : memref<51x32x51xf32, #tpu.memory_space<vmem>>, vector<1x32x10xf32>,
    %c15_56 = arith.constant 15 : index
    %c0_57 = arith.constant 0 : index
    %c41_58 = arith.constant 41 : index
    %99 = vector.load %arg6[%c15_56, %c0_57, %c41_58] : memref<51x32x51xf32, #tpu.memory_space<vmem>>, vector<1x32x10xf32>
    %100 = vector.shape_cast %99 : vector<1x32x10xf32> to vector<32x10xf32>
    %101 = vector.shape_cast %30 : vector<32x10xf32> to vector<1x32x10xf32>
    tpu.vector_store %arg6[%c15_56, %c0_57, %c41_58], %101 {strides = array<i32>} : memref<51x32x51xf32, #tpu.memory_space<vmem>>, vector<1x32x10xf32>,
    %c16 = arith.constant 16 : index
    %c0_59 = arith.constant 0 : index
    %c0_60 = arith.constant 0 : index
    %102 = vector.load %arg6[%c16, %c0_59, %c0_60] : memref<51x32x51xf32, #tpu.memory_space<vmem>>, vector<1x32x10xf32>
    %103 = vector.shape_cast %102 : vector<1x32x10xf32> to vector<32x10xf32>
    %104 = vector.shape_cast %29 : vector<32x10xf32> to vector<1x32x10xf32>
    tpu.vector_store %arg6[%c16, %c0_59, %c0_60], %104 {strides = array<i32>} : memref<51x32x51xf32, #tpu.memory_space<vmem>>, vector<1x32x10xf32>,
    %c16_61 = arith.constant 16 : index
    %c0_62 = arith.constant 0 : index
    %c41_63 = arith.constant 41 : index
    %105 = vector.load %arg6[%c16_61, %c0_62, %c41_63] : memref<51x32x51xf32, #tpu.memory_space<vmem>>, vector<1x32x10xf32>
    %106 = vector.shape_cast %105 : vector<1x32x10xf32> to vector<32x10xf32>
    %107 = vector.shape_cast %30 : vector<32x10xf32> to vector<1x32x10xf32>
    tpu.vector_store %arg6[%c16_61, %c0_62, %c41_63], %107 {strides = array<i32>} : memref<51x32x51xf32, #tpu.memory_space<vmem>>, vector<1x32x10xf32>,
    %c17 = arith.constant 17 : index
    %c0_64 = arith.constant 0 : index
    %c0_65 = arith.constant 0 : index
    %108 = vector.load %arg6[%c17, %c0_64, %c0_65] : memref<51x32x51xf32, #tpu.memory_space<vmem>>, vector<1x32x10xf32>
    %109 = vector.shape_cast %108 : vector<1x32x10xf32> to vector<32x10xf32>
    %110 = vector.shape_cast %29 : vector<32x10xf32> to vector<1x32x10xf32>
    tpu.vector_store %arg6[%c17, %c0_64, %c0_65], %110 {strides = array<i32>} : memref<51x32x51xf32, #tpu.memory_space<vmem>>, vector<1x32x10xf32>,
    %c17_66 = arith.constant 17 : index
    %c0_67 = arith.constant 0 : index
    %c41_68 = arith.constant 41 : index
    %111 = vector.load %arg6[%c17_66, %c0_67, %c41_68] : memref<51x32x51xf32, #tpu.memory_space<vmem>>, vector<1x32x10xf32>
    %112 = vector.shape_cast %111 : vector<1x32x10xf32> to vector<32x10xf32>
    %113 = vector.shape_cast %30 : vector<32x10xf32> to vector<1x32x10xf32>
    tpu.vector_store %arg6[%c17_66, %c0_67, %c41_68], %113 {strides = array<i32>} : memref<51x32x51xf32, #tpu.memory_space<vmem>>, vector<1x32x10xf32>,
    %c18 = arith.constant 18 : index
    %c0_69 = arith.constant 0 : index
    %c0_70 = arith.constant 0 : index
    %114 = vector.load %arg6[%c18, %c0_69, %c0_70] : memref<51x32x51xf32, #tpu.memory_space<vmem>>, vector<1x32x10xf32>
    %115 = vector.shape_cast %114 : vector<1x32x10xf32> to vector<32x10xf32>
    %116 = vector.shape_cast %29 : vector<32x10xf32> to vector<1x32x10xf32>
    tpu.vector_store %arg6[%c18, %c0_69, %c0_70], %116 {strides = array<i32>} : memref<51x32x51xf32, #tpu.memory_space<vmem>>, vector<1x32x10xf32>,
    %c18_71 = arith.constant 18 : index
    %c0_72 = arith.constant 0 : index
    %c41_73 = arith.constant 41 : index
    %117 = vector.load %arg6[%c18_71, %c0_72, %c41_73] : memref<51x32x51xf32, #tpu.memory_space<vmem>>, vector<1x32x10xf32>
    %118 = vector.shape_cast %117 : vector<1x32x10xf32> to vector<32x10xf32>
    %119 = vector.shape_cast %30 : vector<32x10xf32> to vector<1x32x10xf32>
    tpu.vector_store %arg6[%c18_71, %c0_72, %c41_73], %119 {strides = array<i32>} : memref<51x32x51xf32, #tpu.memory_space<vmem>>, vector<1x32x10xf32>,
    %c19 = arith.constant 19 : index
    %c0_74 = arith.constant 0 : index
    %c0_75 = arith.constant 0 : index
    %120 = vector.load %arg6[%c19, %c0_74, %c0_75] : memref<51x32x51xf32, #tpu.memory_space<vmem>>, vector<1x32x10xf32>
    %121 = vector.shape_cast %120 : vector<1x32x10xf32> to vector<32x10xf32>
    %122 = vector.shape_cast %29 : vector<32x10xf32> to vector<1x32x10xf32>
    tpu.vector_store %arg6[%c19, %c0_74, %c0_75], %122 {strides = array<i32>} : memref<51x32x51xf32, #tpu.memory_space<vmem>>, vector<1x32x10xf32>,
    %c19_76 = arith.constant 19 : index
    %c0_77 = arith.constant 0 : index
    %c41_78 = arith.constant 41 : index
    %123 = vector.load %arg6[%c19_76, %c0_77, %c41_78] : memref<51x32x51xf32, #tpu.memory_space<vmem>>, vector<1x32x10xf32>
    %124 = vector.shape_cast %123 : vector<1x32x10xf32> to vector<32x10xf32>
    %125 = vector.shape_cast %30 : vector<32x10xf32> to vector<1x32x10xf32>
    tpu.vector_store %arg6[%c19_76, %c0_77, %c41_78], %125 {strides = array<i32>} : memref<51x32x51xf32, #tpu.memory_space<vmem>>, vector<1x32x10xf32>,
    %c20 = arith.constant 20 : index
    %c0_79 = arith.constant 0 : index
    %c0_80 = arith.constant 0 : index
    %126 = vector.load %arg6[%c20, %c0_79, %c0_80] : memref<51x32x51xf32, #tpu.memory_space<vmem>>, vector<1x32x10xf32>
    %127 = vector.shape_cast %126 : vector<1x32x10xf32> to vector<32x10xf32>
    %128 = vector.shape_cast %29 : vector<32x10xf32> to vector<1x32x10xf32>
    tpu.vector_store %arg6[%c20, %c0_79, %c0_80], %128 {strides = array<i32>} : memref<51x32x51xf32, #tpu.memory_space<vmem>>, vector<1x32x10xf32>,
    %c20_81 = arith.constant 20 : index
    %c0_82 = arith.constant 0 : index
    %c41_83 = arith.constant 41 : index
    %129 = vector.load %arg6[%c20_81, %c0_82, %c41_83] : memref<51x32x51xf32, #tpu.memory_space<vmem>>, vector<1x32x10xf32>
    %130 = vector.shape_cast %129 : vector<1x32x10xf32> to vector<32x10xf32>
    %131 = vector.shape_cast %30 : vector<32x10xf32> to vector<1x32x10xf32>
    tpu.vector_store %arg6[%c20_81, %c0_82, %c41_83], %131 {strides = array<i32>} : memref<51x32x51xf32, #tpu.memory_space<vmem>>, vector<1x32x10xf32>,
    %c21 = arith.constant 21 : index
    %c0_84 = arith.constant 0 : index
    %c0_85 = arith.constant 0 : index
    %132 = vector.load %arg6[%c21, %c0_84, %c0_85] : memref<51x32x51xf32, #tpu.memory_space<vmem>>, vector<1x32x10xf32>
    %133 = vector.shape_cast %132 : vector<1x32x10xf32> to vector<32x10xf32>
    %134 = vector.shape_cast %29 : vector<32x10xf32> to vector<1x32x10xf32>
    tpu.vector_store %arg6[%c21, %c0_84, %c0_85], %134 {strides = array<i32>} : memref<51x32x51xf32, #tpu.memory_space<vmem>>, vector<1x32x10xf32>,
    %c21_86 = arith.constant 21 : index
    %c0_87 = arith.constant 0 : index
    %c41_88 = arith.constant 41 : index
    %135 = vector.load %arg6[%c21_86, %c0_87, %c41_88] : memref<51x32x51xf32, #tpu.memory_space<vmem>>, vector<1x32x10xf32>
    %136 = vector.shape_cast %135 : vector<1x32x10xf32> to vector<32x10xf32>
    %137 = vector.shape_cast %30 : vector<32x10xf32> to vector<1x32x10xf32>
    tpu.vector_store %arg6[%c21_86, %c0_87, %c41_88], %137 {strides = array<i32>} : memref<51x32x51xf32, #tpu.memory_space<vmem>>, vector<1x32x10xf32>,
    %c22 = arith.constant 22 : index
    %c0_89 = arith.constant 0 : index
    %c0_90 = arith.constant 0 : index
    %138 = vector.load %arg6[%c22, %c0_89, %c0_90] : memref<51x32x51xf32, #tpu.memory_space<vmem>>, vector<1x32x10xf32>
    %139 = vector.shape_cast %138 : vector<1x32x10xf32> to vector<32x10xf32>
    %140 = vector.shape_cast %29 : vector<32x10xf32> to vector<1x32x10xf32>
    tpu.vector_store %arg6[%c22, %c0_89, %c0_90], %140 {strides = array<i32>} : memref<51x32x51xf32, #tpu.memory_space<vmem>>, vector<1x32x10xf32>,
    %c22_91 = arith.constant 22 : index
    %c0_92 = arith.constant 0 : index
    %c41_93 = arith.constant 41 : index
    %141 = vector.load %arg6[%c22_91, %c0_92, %c41_93] : memref<51x32x51xf32, #tpu.memory_space<vmem>>, vector<1x32x10xf32>
    %142 = vector.shape_cast %141 : vector<1x32x10xf32> to vector<32x10xf32>
    %143 = vector.shape_cast %30 : vector<32x10xf32> to vector<1x32x10xf32>
    tpu.vector_store %arg6[%c22_91, %c0_92, %c41_93], %143 {strides = array<i32>} : memref<51x32x51xf32, #tpu.memory_space<vmem>>, vector<1x32x10xf32>,
    %c23 = arith.constant 23 : index
    %c0_94 = arith.constant 0 : index
    %c0_95 = arith.constant 0 : index
    %144 = vector.load %arg6[%c23, %c0_94, %c0_95] : memref<51x32x51xf32, #tpu.memory_space<vmem>>, vector<1x32x10xf32>
    %145 = vector.shape_cast %144 : vector<1x32x10xf32> to vector<32x10xf32>
    %146 = vector.shape_cast %29 : vector<32x10xf32> to vector<1x32x10xf32>
    tpu.vector_store %arg6[%c23, %c0_94, %c0_95], %146 {strides = array<i32>} : memref<51x32x51xf32, #tpu.memory_space<vmem>>, vector<1x32x10xf32>,
    %c23_96 = arith.constant 23 : index
    %c0_97 = arith.constant 0 : index
    %c41_98 = arith.constant 41 : index
    %147 = vector.load %arg6[%c23_96, %c0_97, %c41_98] : memref<51x32x51xf32, #tpu.memory_space<vmem>>, vector<1x32x10xf32>
    %148 = vector.shape_cast %147 : vector<1x32x10xf32> to vector<32x10xf32>
    %149 = vector.shape_cast %30 : vector<32x10xf32> to vector<1x32x10xf32>
    tpu.vector_store %arg6[%c23_96, %c0_97, %c41_98], %149 {strides = array<i32>} : memref<51x32x51xf32, #tpu.memory_space<vmem>>, vector<1x32x10xf32>,
    %c24 = arith.constant 24 : index
    %c0_99 = arith.constant 0 : index
    %c0_100 = arith.constant 0 : index
    %150 = vector.load %arg6[%c24, %c0_99, %c0_100] : memref<51x32x51xf32, #tpu.memory_space<vmem>>, vector<1x32x10xf32>
    %151 = vector.shape_cast %150 : vector<1x32x10xf32> to vector<32x10xf32>
    %152 = vector.shape_cast %29 : vector<32x10xf32> to vector<1x32x10xf32>
    tpu.vector_store %arg6[%c24, %c0_99, %c0_100], %152 {strides = array<i32>} : memref<51x32x51xf32, #tpu.memory_space<vmem>>, vector<1x32x10xf32>,
    %c24_101 = arith.constant 24 : index
    %c0_102 = arith.constant 0 : index
    %c41_103 = arith.constant 41 : index
    %153 = vector.load %arg6[%c24_101, %c0_102, %c41_103] : memref<51x32x51xf32, #tpu.memory_space<vmem>>, vector<1x32x10xf32>
    %154 = vector.shape_cast %153 : vector<1x32x10xf32> to vector<32x10xf32>
    %155 = vector.shape_cast %30 : vector<32x10xf32> to vector<1x32x10xf32>
    tpu.vector_store %arg6[%c24_101, %c0_102, %c41_103], %155 {strides = array<i32>} : memref<51x32x51xf32, #tpu.memory_space<vmem>>, vector<1x32x10xf32>,
    %c25 = arith.constant 25 : index
    %c0_104 = arith.constant 0 : index
    %c0_105 = arith.constant 0 : index
    %156 = vector.load %arg6[%c25, %c0_104, %c0_105] : memref<51x32x51xf32, #tpu.memory_space<vmem>>, vector<1x32x10xf32>
    %157 = vector.shape_cast %156 : vector<1x32x10xf32> to vector<32x10xf32>
    %158 = vector.shape_cast %29 : vector<32x10xf32> to vector<1x32x10xf32>
    tpu.vector_store %arg6[%c25, %c0_104, %c0_105], %158 {strides = array<i32>} : memref<51x32x51xf32, #tpu.memory_space<vmem>>, vector<1x32x10xf32>,
    %c25_106 = arith.constant 25 : index
    %c0_107 = arith.constant 0 : index
    %c41_108 = arith.constant 41 : index
    %159 = vector.load %arg6[%c25_106, %c0_107, %c41_108] : memref<51x32x51xf32, #tpu.memory_space<vmem>>, vector<1x32x10xf32>
    %160 = vector.shape_cast %159 : vector<1x32x10xf32> to vector<32x10xf32>
    %161 = vector.shape_cast %30 : vector<32x10xf32> to vector<1x32x10xf32>
    tpu.vector_store %arg6[%c25_106, %c0_107, %c41_108], %161 {strides = array<i32>} : memref<51x32x51xf32, #tpu.memory_space<vmem>>, vector<1x32x10xf32>,
    %c26 = arith.constant 26 : index
    %c0_109 = arith.constant 0 : index
    %c0_110 = arith.constant 0 : index
    %162 = vector.load %arg6[%c26, %c0_109, %c0_110] : memref<51x32x51xf32, #tpu.memory_space<vmem>>, vector<1x32x10xf32>
    %163 = vector.shape_cast %162 : vector<1x32x10xf32> to vector<32x10xf32>
    %164 = vector.shape_cast %29 : vector<32x10xf32> to vector<1x32x10xf32>
    tpu.vector_store %arg6[%c26, %c0_109, %c0_110], %164 {strides = array<i32>} : memref<51x32x51xf32, #tpu.memory_space<vmem>>, vector<1x32x10xf32>,
    %c26_111 = arith.constant 26 : index
    %c0_112 = arith.constant 0 : index
    %c41_113 = arith.constant 41 : index
    %165 = vector.load %arg6[%c26_111, %c0_112, %c41_113] : memref<51x32x51xf32, #tpu.memory_space<vmem>>, vector<1x32x10xf32>
    %166 = vector.shape_cast %165 : vector<1x32x10xf32> to vector<32x10xf32>
    %167 = vector.shape_cast %30 : vector<32x10xf32> to vector<1x32x10xf32>
    tpu.vector_store %arg6[%c26_111, %c0_112, %c41_113], %167 {strides = array<i32>} : memref<51x32x51xf32, #tpu.memory_space<vmem>>, vector<1x32x10xf32>,
    %c27 = arith.constant 27 : index
    %c0_114 = arith.constant 0 : index
    %c0_115 = arith.constant 0 : index
    %168 = vector.load %arg6[%c27, %c0_114, %c0_115] : memref<51x32x51xf32, #tpu.memory_space<vmem>>, vector<1x32x10xf32>
    %169 = vector.shape_cast %168 : vector<1x32x10xf32> to vector<32x10xf32>
    %170 = vector.shape_cast %29 : vector<32x10xf32> to vector<1x32x10xf32>
    tpu.vector_store %arg6[%c27, %c0_114, %c0_115], %170 {strides = array<i32>} : memref<51x32x51xf32, #tpu.memory_space<vmem>>, vector<1x32x10xf32>,
    %c27_116 = arith.constant 27 : index
    %c0_117 = arith.constant 0 : index
    %c41_118 = arith.constant 41 : index
    %171 = vector.load %arg6[%c27_116, %c0_117, %c41_118] : memref<51x32x51xf32, #tpu.memory_space<vmem>>, vector<1x32x10xf32>
    %172 = vector.shape_cast %171 : vector<1x32x10xf32> to vector<32x10xf32>
    %173 = vector.shape_cast %30 : vector<32x10xf32> to vector<1x32x10xf32>
    tpu.vector_store %arg6[%c27_116, %c0_117, %c41_118], %173 {strides = array<i32>} : memref<51x32x51xf32, #tpu.memory_space<vmem>>, vector<1x32x10xf32>,
    %c28 = arith.constant 28 : index
    %c0_119 = arith.constant 0 : index
    %c0_120 = arith.constant 0 : index
    %174 = vector.load %arg6[%c28, %c0_119, %c0_120] : memref<51x32x51xf32, #tpu.memory_space<vmem>>, vector<1x32x10xf32>
    %175 = vector.shape_cast %174 : vector<1x32x10xf32> to vector<32x10xf32>
    %176 = vector.shape_cast %29 : vector<32x10xf32> to vector<1x32x10xf32>
    tpu.vector_store %arg6[%c28, %c0_119, %c0_120], %176 {strides = array<i32>} : memref<51x32x51xf32, #tpu.memory_space<vmem>>, vector<1x32x10xf32>,
    %c28_121 = arith.constant 28 : index
    %c0_122 = arith.constant 0 : index
    %c41_123 = arith.constant 41 : index
    %177 = vector.load %arg6[%c28_121, %c0_122, %c41_123] : memref<51x32x51xf32, #tpu.memory_space<vmem>>, vector<1x32x10xf32>
    %178 = vector.shape_cast %177 : vector<1x32x10xf32> to vector<32x10xf32>
    %179 = vector.shape_cast %30 : vector<32x10xf32> to vector<1x32x10xf32>
    tpu.vector_store %arg6[%c28_121, %c0_122, %c41_123], %179 {strides = array<i32>} : memref<51x32x51xf32, #tpu.memory_space<vmem>>, vector<1x32x10xf32>,
    %c29 = arith.constant 29 : index
    %c0_124 = arith.constant 0 : index
    %c0_125 = arith.constant 0 : index
    %180 = vector.load %arg6[%c29, %c0_124, %c0_125] : memref<51x32x51xf32, #tpu.memory_space<vmem>>, vector<1x32x10xf32>
    %181 = vector.shape_cast %180 : vector<1x32x10xf32> to vector<32x10xf32>
    %182 = vector.shape_cast %29 : vector<32x10xf32> to vector<1x32x10xf32>
    tpu.vector_store %arg6[%c29, %c0_124, %c0_125], %182 {strides = array<i32>} : memref<51x32x51xf32, #tpu.memory_space<vmem>>, vector<1x32x10xf32>,
    %c29_126 = arith.constant 29 : index
    %c0_127 = arith.constant 0 : index
    %c41_128 = arith.constant 41 : index
    %183 = vector.load %arg6[%c29_126, %c0_127, %c41_128] : memref<51x32x51xf32, #tpu.memory_space<vmem>>, vector<1x32x10xf32>
    %184 = vector.shape_cast %183 : vector<1x32x10xf32> to vector<32x10xf32>
    %185 = vector.shape_cast %30 : vector<32x10xf32> to vector<1x32x10xf32>
    tpu.vector_store %arg6[%c29_126, %c0_127, %c41_128], %185 {strides = array<i32>} : memref<51x32x51xf32, #tpu.memory_space<vmem>>, vector<1x32x10xf32>,
    %c30 = arith.constant 30 : index
    %c0_129 = arith.constant 0 : index
    %c0_130 = arith.constant 0 : index
    %186 = vector.load %arg6[%c30, %c0_129, %c0_130] : memref<51x32x51xf32, #tpu.memory_space<vmem>>, vector<1x32x10xf32>
    %187 = vector.shape_cast %186 : vector<1x32x10xf32> to vector<32x10xf32>
    %188 = vector.shape_cast %29 : vector<32x10xf32> to vector<1x32x10xf32>
    tpu.vector_store %arg6[%c30, %c0_129, %c0_130], %188 {strides = array<i32>} : memref<51x32x51xf32, #tpu.memory_space<vmem>>, vector<1x32x10xf32>,
    %c30_131 = arith.constant 30 : index
    %c0_132 = arith.constant 0 : index
    %c41_133 = arith.constant 41 : index
    %189 = vector.load %arg6[%c30_131, %c0_132, %c41_133] : memref<51x32x51xf32, #tpu.memory_space<vmem>>, vector<1x32x10xf32>
    %190 = vector.shape_cast %189 : vector<1x32x10xf32> to vector<32x10xf32>
    %191 = vector.shape_cast %30 : vector<32x10xf32> to vector<1x32x10xf32>
    tpu.vector_store %arg6[%c30_131, %c0_132, %c41_133], %191 {strides = array<i32>} : memref<51x32x51xf32, #tpu.memory_space<vmem>>, vector<1x32x10xf32>,
    %c31 = arith.constant 31 : index
    %c0_134 = arith.constant 0 : index
    %c0_135 = arith.constant 0 : index
    %192 = vector.load %arg6[%c31, %c0_134, %c0_135] : memref<51x32x51xf32, #tpu.memory_space<vmem>>, vector<1x32x10xf32>
    %193 = vector.shape_cast %192 : vector<1x32x10xf32> to vector<32x10xf32>
    %194 = vector.shape_cast %29 : vector<32x10xf32> to vector<1x32x10xf32>
    tpu.vector_store %arg6[%c31, %c0_134, %c0_135], %194 {strides = array<i32>} : memref<51x32x51xf32, #tpu.memory_space<vmem>>, vector<1x32x10xf32>,
    %c31_136 = arith.constant 31 : index
    %c0_137 = arith.constant 0 : index
    %c41_138 = arith.constant 41 : index
    %195 = vector.load %arg6[%c31_136, %c0_137, %c41_138] : memref<51x32x51xf32, #tpu.memory_space<vmem>>, vector<1x32x10xf32>
    %196 = vector.shape_cast %195 : vector<1x32x10xf32> to vector<32x10xf32>
    %197 = vector.shape_cast %30 : vector<32x10xf32> to vector<1x32x10xf32>
    tpu.vector_store %arg6[%c31_136, %c0_137, %c41_138], %197 {strides = array<i32>} : memref<51x32x51xf32, #tpu.memory_space<vmem>>, vector<1x32x10xf32>,
    %c32 = arith.constant 32 : index
    %c0_139 = arith.constant 0 : index
    %c0_140 = arith.constant 0 : index
    %198 = vector.load %arg6[%c32, %c0_139, %c0_140] : memref<51x32x51xf32, #tpu.memory_space<vmem>>, vector<1x32x10xf32>
    %199 = vector.shape_cast %198 : vector<1x32x10xf32> to vector<32x10xf32>
    %200 = vector.shape_cast %29 : vector<32x10xf32> to vector<1x32x10xf32>
    tpu.vector_store %arg6[%c32, %c0_139, %c0_140], %200 {strides = array<i32>} : memref<51x32x51xf32, #tpu.memory_space<vmem>>, vector<1x32x10xf32>,
    %c32_141 = arith.constant 32 : index
    %c0_142 = arith.constant 0 : index
    %c41_143 = arith.constant 41 : index
    %201 = vector.load %arg6[%c32_141, %c0_142, %c41_143] : memref<51x32x51xf32, #tpu.memory_space<vmem>>, vector<1x32x10xf32>
    %202 = vector.shape_cast %201 : vector<1x32x10xf32> to vector<32x10xf32>
    %203 = vector.shape_cast %30 : vector<32x10xf32> to vector<1x32x10xf32>
    tpu.vector_store %arg6[%c32_141, %c0_142, %c41_143], %203 {strides = array<i32>} : memref<51x32x51xf32, #tpu.memory_space<vmem>>, vector<1x32x10xf32>,
    %c33 = arith.constant 33 : index
    %c0_144 = arith.constant 0 : index
    %c0_145 = arith.constant 0 : index
    %204 = vector.load %arg6[%c33, %c0_144, %c0_145] : memref<51x32x51xf32, #tpu.memory_space<vmem>>, vector<1x32x10xf32>
    %205 = vector.shape_cast %204 : vector<1x32x10xf32> to vector<32x10xf32>
    %206 = vector.shape_cast %29 : vector<32x10xf32> to vector<1x32x10xf32>
    tpu.vector_store %arg6[%c33, %c0_144, %c0_145], %206 {strides = array<i32>} : memref<51x32x51xf32, #tpu.memory_space<vmem>>, vector<1x32x10xf32>,
    %c33_146 = arith.constant 33 : index
    %c0_147 = arith.constant 0 : index
    %c41_148 = arith.constant 41 : index
    %207 = vector.load %arg6[%c33_146, %c0_147, %c41_148] : memref<51x32x51xf32, #tpu.memory_space<vmem>>, vector<1x32x10xf32>
    %208 = vector.shape_cast %207 : vector<1x32x10xf32> to vector<32x10xf32>
    %209 = vector.shape_cast %30 : vector<32x10xf32> to vector<1x32x10xf32>
    tpu.vector_store %arg6[%c33_146, %c0_147, %c41_148], %209 {strides = array<i32>} : memref<51x32x51xf32, #tpu.memory_space<vmem>>, vector<1x32x10xf32>,
    %c34 = arith.constant 34 : index
    %c0_149 = arith.constant 0 : index
    %c0_150 = arith.constant 0 : index
    %210 = vector.load %arg6[%c34, %c0_149, %c0_150] : memref<51x32x51xf32, #tpu.memory_space<vmem>>, vector<1x32x10xf32>
    %211 = vector.shape_cast %210 : vector<1x32x10xf32> to vector<32x10xf32>
    %212 = vector.shape_cast %29 : vector<32x10xf32> to vector<1x32x10xf32>
    tpu.vector_store %arg6[%c34, %c0_149, %c0_150], %212 {strides = array<i32>} : memref<51x32x51xf32, #tpu.memory_space<vmem>>, vector<1x32x10xf32>,
    %c34_151 = arith.constant 34 : index
    %c0_152 = arith.constant 0 : index
    %c41_153 = arith.constant 41 : index
    %213 = vector.load %arg6[%c34_151, %c0_152, %c41_153] : memref<51x32x51xf32, #tpu.memory_space<vmem>>, vector<1x32x10xf32>
    %214 = vector.shape_cast %213 : vector<1x32x10xf32> to vector<32x10xf32>
    %215 = vector.shape_cast %30 : vector<32x10xf32> to vector<1x32x10xf32>
    tpu.vector_store %arg6[%c34_151, %c0_152, %c41_153], %215 {strides = array<i32>} : memref<51x32x51xf32, #tpu.memory_space<vmem>>, vector<1x32x10xf32>,
    %c35 = arith.constant 35 : index
    %c0_154 = arith.constant 0 : index
    %c0_155 = arith.constant 0 : index
    %216 = vector.load %arg6[%c35, %c0_154, %c0_155] : memref<51x32x51xf32, #tpu.memory_space<vmem>>, vector<1x32x10xf32>
    %217 = vector.shape_cast %216 : vector<1x32x10xf32> to vector<32x10xf32>
    %218 = vector.shape_cast %29 : vector<32x10xf32> to vector<1x32x10xf32>
    tpu.vector_store %arg6[%c35, %c0_154, %c0_155], %218 {strides = array<i32>} : memref<51x32x51xf32, #tpu.memory_space<vmem>>, vector<1x32x10xf32>,
    %c35_156 = arith.constant 35 : index
    %c0_157 = arith.constant 0 : index
    %c41_158 = arith.constant 41 : index
    %219 = vector.load %arg6[%c35_156, %c0_157, %c41_158] : memref<51x32x51xf32, #tpu.memory_space<vmem>>, vector<1x32x10xf32>
    %220 = vector.shape_cast %219 : vector<1x32x10xf32> to vector<32x10xf32>
    %221 = vector.shape_cast %30 : vector<32x10xf32> to vector<1x32x10xf32>
    tpu.vector_store %arg6[%c35_156, %c0_157, %c41_158], %221 {strides = array<i32>} : memref<51x32x51xf32, #tpu.memory_space<vmem>>, vector<1x32x10xf32>,
    %c36 = arith.constant 36 : index
    %c0_159 = arith.constant 0 : index
    %c0_160 = arith.constant 0 : index
    %222 = vector.load %arg6[%c36, %c0_159, %c0_160] : memref<51x32x51xf32, #tpu.memory_space<vmem>>, vector<1x32x10xf32>
    %223 = vector.shape_cast %222 : vector<1x32x10xf32> to vector<32x10xf32>
    %224 = vector.shape_cast %29 : vector<32x10xf32> to vector<1x32x10xf32>
    tpu.vector_store %arg6[%c36, %c0_159, %c0_160], %224 {strides = array<i32>} : memref<51x32x51xf32, #tpu.memory_space<vmem>>, vector<1x32x10xf32>,
    %c36_161 = arith.constant 36 : index
    %c0_162 = arith.constant 0 : index
    %c41_163 = arith.constant 41 : index
    %225 = vector.load %arg6[%c36_161, %c0_162, %c41_163] : memref<51x32x51xf32, #tpu.memory_space<vmem>>, vector<1x32x10xf32>
    %226 = vector.shape_cast %225 : vector<1x32x10xf32> to vector<32x10xf32>
    %227 = vector.shape_cast %30 : vector<32x10xf32> to vector<1x32x10xf32>
    tpu.vector_store %arg6[%c36_161, %c0_162, %c41_163], %227 {strides = array<i32>} : memref<51x32x51xf32, #tpu.memory_space<vmem>>, vector<1x32x10xf32>,
    %c37 = arith.constant 37 : index
    %c0_164 = arith.constant 0 : index
    %c0_165 = arith.constant 0 : index
    %228 = vector.load %arg6[%c37, %c0_164, %c0_165] : memref<51x32x51xf32, #tpu.memory_space<vmem>>, vector<1x32x10xf32>
    %229 = vector.shape_cast %228 : vector<1x32x10xf32> to vector<32x10xf32>
    %230 = vector.shape_cast %29 : vector<32x10xf32> to vector<1x32x10xf32>
    tpu.vector_store %arg6[%c37, %c0_164, %c0_165], %230 {strides = array<i32>} : memref<51x32x51xf32, #tpu.memory_space<vmem>>, vector<1x32x10xf32>,
    %c37_166 = arith.constant 37 : index
    %c0_167 = arith.constant 0 : index
    %c41_168 = arith.constant 41 : index
    %231 = vector.load %arg6[%c37_166, %c0_167, %c41_168] : memref<51x32x51xf32, #tpu.memory_space<vmem>>, vector<1x32x10xf32>
    %232 = vector.shape_cast %231 : vector<1x32x10xf32> to vector<32x10xf32>
    %233 = vector.shape_cast %30 : vector<32x10xf32> to vector<1x32x10xf32>
    tpu.vector_store %arg6[%c37_166, %c0_167, %c41_168], %233 {strides = array<i32>} : memref<51x32x51xf32, #tpu.memory_space<vmem>>, vector<1x32x10xf32>,
    %c38 = arith.constant 38 : index
    %c0_169 = arith.constant 0 : index
    %c0_170 = arith.constant 0 : index
    %234 = vector.load %arg6[%c38, %c0_169, %c0_170] : memref<51x32x51xf32, #tpu.memory_space<vmem>>, vector<1x32x10xf32>
    %235 = vector.shape_cast %234 : vector<1x32x10xf32> to vector<32x10xf32>
    %236 = vector.shape_cast %29 : vector<32x10xf32> to vector<1x32x10xf32>
    tpu.vector_store %arg6[%c38, %c0_169, %c0_170], %236 {strides = array<i32>} : memref<51x32x51xf32, #tpu.memory_space<vmem>>, vector<1x32x10xf32>,
    %c38_171 = arith.constant 38 : index
    %c0_172 = arith.constant 0 : index
    %c41_173 = arith.constant 41 : index
    %237 = vector.load %arg6[%c38_171, %c0_172, %c41_173] : memref<51x32x51xf32, #tpu.memory_space<vmem>>, vector<1x32x10xf32>
    %238 = vector.shape_cast %237 : vector<1x32x10xf32> to vector<32x10xf32>
    %239 = vector.shape_cast %30 : vector<32x10xf32> to vector<1x32x10xf32>
    tpu.vector_store %arg6[%c38_171, %c0_172, %c41_173], %239 {strides = array<i32>} : memref<51x32x51xf32, #tpu.memory_space<vmem>>, vector<1x32x10xf32>,
    %c39 = arith.constant 39 : index
    %c0_174 = arith.constant 0 : index
    %c0_175 = arith.constant 0 : index
    %240 = vector.load %arg6[%c39, %c0_174, %c0_175] : memref<51x32x51xf32, #tpu.memory_space<vmem>>, vector<1x32x10xf32>
    %241 = vector.shape_cast %240 : vector<1x32x10xf32> to vector<32x10xf32>
    %242 = vector.shape_cast %29 : vector<32x10xf32> to vector<1x32x10xf32>
    tpu.vector_store %arg6[%c39, %c0_174, %c0_175], %242 {strides = array<i32>} : memref<51x32x51xf32, #tpu.memory_space<vmem>>, vector<1x32x10xf32>,
    %c39_176 = arith.constant 39 : index
    %c0_177 = arith.constant 0 : index
    %c41_178 = arith.constant 41 : index
    %243 = vector.load %arg6[%c39_176, %c0_177, %c41_178] : memref<51x32x51xf32, #tpu.memory_space<vmem>>, vector<1x32x10xf32>
    %244 = vector.shape_cast %243 : vector<1x32x10xf32> to vector<32x10xf32>
    %245 = vector.shape_cast %30 : vector<32x10xf32> to vector<1x32x10xf32>
    tpu.vector_store %arg6[%c39_176, %c0_177, %c41_178], %245 {strides = array<i32>} : memref<51x32x51xf32, #tpu.memory_space<vmem>>, vector<1x32x10xf32>,
    %c40 = arith.constant 40 : index
    %c0_179 = arith.constant 0 : index
    %c0_180 = arith.constant 0 : index
    %246 = vector.load %arg6[%c40, %c0_179, %c0_180] : memref<51x32x51xf32, #tpu.memory_space<vmem>>, vector<1x32x10xf32>
    %247 = vector.shape_cast %246 : vector<1x32x10xf32> to vector<32x10xf32>
    %248 = vector.shape_cast %29 : vector<32x10xf32> to vector<1x32x10xf32>
    tpu.vector_store %arg6[%c40, %c0_179, %c0_180], %248 {strides = array<i32>} : memref<51x32x51xf32, #tpu.memory_space<vmem>>, vector<1x32x10xf32>,
    %c40_181 = arith.constant 40 : index
    %c0_182 = arith.constant 0 : index
    %c41_183 = arith.constant 41 : index
    %249 = vector.load %arg6[%c40_181, %c0_182, %c41_183] : memref<51x32x51xf32, #tpu.memory_space<vmem>>, vector<1x32x10xf32>
    %250 = vector.shape_cast %249 : vector<1x32x10xf32> to vector<32x10xf32>
    %251 = vector.shape_cast %30 : vector<32x10xf32> to vector<1x32x10xf32>
    tpu.vector_store %arg6[%c40_181, %c0_182, %c41_183], %251 {strides = array<i32>} : memref<51x32x51xf32, #tpu.memory_space<vmem>>, vector<1x32x10xf32>,
    %c41_184 = arith.constant 41 : index
    %c0_185 = arith.constant 0 : index
    %c0_186 = arith.constant 0 : index
    %252 = vector.load %arg6[%c41_184, %c0_185, %c0_186] : memref<51x32x51xf32, #tpu.memory_space<vmem>>, vector<1x32x51xf32>
    %253 = vector.shape_cast %252 : vector<1x32x51xf32> to vector<32x51xf32>
    %254 = vector.shape_cast %28 : vector<32x51xf32> to vector<1x32x51xf32>
    tpu.vector_store %arg6[%c41_184, %c0_185, %c0_186], %254 {strides = array<i32>} : memref<51x32x51xf32, #tpu.memory_space<vmem>>, vector<1x32x51xf32>,
    %c42 = arith.constant 42 : index
    %c0_187 = arith.constant 0 : index
    %c0_188 = arith.constant 0 : index
    %255 = vector.load %arg6[%c42, %c0_187, %c0_188] : memref<51x32x51xf32, #tpu.memory_space<vmem>>, vector<1x32x51xf32>
    %256 = vector.shape_cast %255 : vector<1x32x51xf32> to vector<32x51xf32>
    %257 = vector.shape_cast %28 : vector<32x51xf32> to vector<1x32x51xf32>
    tpu.vector_store %arg6[%c42, %c0_187, %c0_188], %257 {strides = array<i32>} : memref<51x32x51xf32, #tpu.memory_space<vmem>>, vector<1x32x51xf32>,
    %c43 = arith.constant 43 : index
    %c0_189 = arith.constant 0 : index
    %c0_190 = arith.constant 0 : index
    %258 = vector.load %arg6[%c43, %c0_189, %c0_190] : memref<51x32x51xf32, #tpu.memory_space<vmem>>, vector<1x32x51xf32>
    %259 = vector.shape_cast %258 : vector<1x32x51xf32> to vector<32x51xf32>
    %260 = vector.shape_cast %28 : vector<32x51xf32> to vector<1x32x51xf32>
    tpu.vector_store %arg6[%c43, %c0_189, %c0_190], %260 {strides = array<i32>} : memref<51x32x51xf32, #tpu.memory_space<vmem>>, vector<1x32x51xf32>,
    %c44 = arith.constant 44 : index
    %c0_191 = arith.constant 0 : index
    %c0_192 = arith.constant 0 : index
    %261 = vector.load %arg6[%c44, %c0_191, %c0_192] : memref<51x32x51xf32, #tpu.memory_space<vmem>>, vector<1x32x51xf32>
    %262 = vector.shape_cast %261 : vector<1x32x51xf32> to vector<32x51xf32>
    %263 = vector.shape_cast %28 : vector<32x51xf32> to vector<1x32x51xf32>
    tpu.vector_store %arg6[%c44, %c0_191, %c0_192], %263 {strides = array<i32>} : memref<51x32x51xf32, #tpu.memory_space<vmem>>, vector<1x32x51xf32>,
    %c45 = arith.constant 45 : index
    %c0_193 = arith.constant 0 : index
    %c0_194 = arith.constant 0 : index
    %264 = vector.load %arg6[%c45, %c0_193, %c0_194] : memref<51x32x51xf32, #tpu.memory_space<vmem>>, vector<1x32x51xf32>
    %265 = vector.shape_cast %264 : vector<1x32x51xf32> to vector<32x51xf32>
    %266 = vector.shape_cast %28 : vector<32x51xf32> to vector<1x32x51xf32>
    tpu.vector_store %arg6[%c45, %c0_193, %c0_194], %266 {strides = array<i32>} : memref<51x32x51xf32, #tpu.memory_space<vmem>>, vector<1x32x51xf32>,
    %c46 = arith.constant 46 : index
    %c0_195 = arith.constant 0 : index
    %c0_196 = arith.constant 0 : index
    %267 = vector.load %arg6[%c46, %c0_195, %c0_196] : memref<51x32x51xf32, #tpu.memory_space<vmem>>, vector<1x32x51xf32>
    %268 = vector.shape_cast %267 : vector<1x32x51xf32> to vector<32x51xf32>
    %269 = vector.shape_cast %28 : vector<32x51xf32> to vector<1x32x51xf32>
    tpu.vector_store %arg6[%c46, %c0_195, %c0_196], %269 {strides = array<i32>} : memref<51x32x51xf32, #tpu.memory_space<vmem>>, vector<1x32x51xf32>,
    %c47 = arith.constant 47 : index
    %c0_197 = arith.constant 0 : index
    %c0_198 = arith.constant 0 : index
    %270 = vector.load %arg6[%c47, %c0_197, %c0_198] : memref<51x32x51xf32, #tpu.memory_space<vmem>>, vector<1x32x51xf32>
    %271 = vector.shape_cast %270 : vector<1x32x51xf32> to vector<32x51xf32>
    %272 = vector.shape_cast %28 : vector<32x51xf32> to vector<1x32x51xf32>
    tpu.vector_store %arg6[%c47, %c0_197, %c0_198], %272 {strides = array<i32>} : memref<51x32x51xf32, #tpu.memory_space<vmem>>, vector<1x32x51xf32>,
    %c48 = arith.constant 48 : index
    %c0_199 = arith.constant 0 : index
    %c0_200 = arith.constant 0 : index
    %273 = vector.load %arg6[%c48, %c0_199, %c0_200] : memref<51x32x51xf32, #tpu.memory_space<vmem>>, vector<1x32x51xf32>
    %274 = vector.shape_cast %273 : vector<1x32x51xf32> to vector<32x51xf32>
    %275 = vector.shape_cast %28 : vector<32x51xf32> to vector<1x32x51xf32>
    tpu.vector_store %arg6[%c48, %c0_199, %c0_200], %275 {strides = array<i32>} : memref<51x32x51xf32, #tpu.memory_space<vmem>>, vector<1x32x51xf32>,
    %c49 = arith.constant 49 : index
    %c0_201 = arith.constant 0 : index
    %c0_202 = arith.constant 0 : index
    %276 = vector.load %arg6[%c49, %c0_201, %c0_202] : memref<51x32x51xf32, #tpu.memory_space<vmem>>, vector<1x32x51xf32>
    %277 = vector.shape_cast %276 : vector<1x32x51xf32> to vector<32x51xf32>
    %278 = vector.shape_cast %28 : vector<32x51xf32> to vector<1x32x51xf32>
    tpu.vector_store %arg6[%c49, %c0_201, %c0_202], %278 {strides = array<i32>} : memref<51x32x51xf32, #tpu.memory_space<vmem>>, vector<1x32x51xf32>,
    %c0_i32_203 = arith.constant 0 : i32
    %c31_i32 = arith.constant 31 : i32
    %279 = arith.addi %c0_i32_203, %c31_i32 : i32
    %c1_i32 = arith.constant 1 : i32
    scf.for %arg7 = %c0_i32_203 to %279 step %c1_i32  : i32 {
      %c0_i32_205 = arith.constant 0 : i32
      %280 = arith.addi %arg7, %c0_i32_205 : i32
      %281 = arith.index_cast %280 : i32 to index
      %c0_206 = arith.constant 0 : index
      %c0_207 = arith.constant 0 : index
      %282 = vector.load %arg1[%281, %c0_206, %c0_207] : memref<38x16x38xf32, #tpu.memory_space<vmem>>, vector<1x16x31xf32>
      %283 = vector.shape_cast %282 : vector<1x16x31xf32> to vector<16x31xf32>
      %c0_208 = arith.constant 0 : index
      %c0_209 = arith.constant 0 : index
      %c0_210 = arith.constant 0 : index
      %284 = vector.load %arg2[%c0_208, %c0_209, %c0_210] : memref<64x16x31xf32, #tpu.memory_space<vmem>>, vector<1x16x31xf32>
      %285 = vector.shape_cast %284 : vector<1x16x31xf32> to vector<16x31xf32>
      %286 = arith.mulf %283, %285 : vector<16x31xf32>
      %c0_i32_211 = arith.constant 0 : i32
      %287 = arith.addi %arg7, %c0_i32_211 : i32
      %288 = arith.index_cast %287 : i32 to index
      %c0_212 = arith.constant 0 : index
      %c1_213 = arith.constant 1 : index
      %289 = vector.load %arg1[%288, %c0_212, %c1_213] : memref<38x16x38xf32, #tpu.memory_space<vmem>>, vector<1x16x31xf32>
      %290 = vector.shape_cast %289 : vector<1x16x31xf32> to vector<16x31xf32>
      %c1_214 = arith.constant 1 : index
      %c0_215 = arith.constant 0 : index
      %c0_216 = arith.constant 0 : index
      %291 = vector.load %arg2[%c1_214, %c0_215, %c0_216] : memref<64x16x31xf32, #tpu.memory_space<vmem>>, vector<1x16x31xf32>
      %292 = vector.shape_cast %291 : vector<1x16x31xf32> to vector<16x31xf32>
      %293 = arith.mulf %290, %292 : vector<16x31xf32>
      %294 = arith.addf %286, %293 : vector<16x31xf32>
      %c0_i32_217 = arith.constant 0 : i32
      %295 = arith.addi %arg7, %c0_i32_217 : i32
      %296 = arith.index_cast %295 : i32 to index
      %c0_218 = arith.constant 0 : index
      %c2_219 = arith.constant 2 : index
      %297 = vector.load %arg1[%296, %c0_218, %c2_219] : memref<38x16x38xf32, #tpu.memory_space<vmem>>, vector<1x16x31xf32>
      %298 = vector.shape_cast %297 : vector<1x16x31xf32> to vector<16x31xf32>
      %c2_220 = arith.constant 2 : index
      %c0_221 = arith.constant 0 : index
      %c0_222 = arith.constant 0 : index
      %299 = vector.load %arg2[%c2_220, %c0_221, %c0_222] : memref<64x16x31xf32, #tpu.memory_space<vmem>>, vector<1x16x31xf32>
      %300 = vector.shape_cast %299 : vector<1x16x31xf32> to vector<16x31xf32>
      %301 = arith.mulf %298, %300 : vector<16x31xf32>
      %302 = arith.addf %294, %301 : vector<16x31xf32>
      %c0_i32_223 = arith.constant 0 : i32
      %303 = arith.addi %arg7, %c0_i32_223 : i32
      %304 = arith.index_cast %303 : i32 to index
      %c0_224 = arith.constant 0 : index
      %c3_225 = arith.constant 3 : index
      %305 = vector.load %arg1[%304, %c0_224, %c3_225] : memref<38x16x38xf32, #tpu.memory_space<vmem>>, vector<1x16x31xf32>
      %306 = vector.shape_cast %305 : vector<1x16x31xf32> to vector<16x31xf32>
      %c3_226 = arith.constant 3 : index
      %c0_227 = arith.constant 0 : index
      %c0_228 = arith.constant 0 : index
      %307 = vector.load %arg2[%c3_226, %c0_227, %c0_228] : memref<64x16x31xf32, #tpu.memory_space<vmem>>, vector<1x16x31xf32>
      %308 = vector.shape_cast %307 : vector<1x16x31xf32> to vector<16x31xf32>
      %309 = arith.mulf %306, %308 : vector<16x31xf32>
      %310 = arith.addf %302, %309 : vector<16x31xf32>
      %c0_i32_229 = arith.constant 0 : i32
      %311 = arith.addi %arg7, %c0_i32_229 : i32
      %312 = arith.index_cast %311 : i32 to index
      %c0_230 = arith.constant 0 : index
      %c4_231 = arith.constant 4 : index
      %313 = vector.load %arg1[%312, %c0_230, %c4_231] : memref<38x16x38xf32, #tpu.memory_space<vmem>>, vector<1x16x31xf32>
      %314 = vector.shape_cast %313 : vector<1x16x31xf32> to vector<16x31xf32>
      %c4_232 = arith.constant 4 : index
      %c0_233 = arith.constant 0 : index
      %c0_234 = arith.constant 0 : index
      %315 = vector.load %arg2[%c4_232, %c0_233, %c0_234] : memref<64x16x31xf32, #tpu.memory_space<vmem>>, vector<1x16x31xf32>
      %316 = vector.shape_cast %315 : vector<1x16x31xf32> to vector<16x31xf32>
      %317 = arith.mulf %314, %316 : vector<16x31xf32>
      %318 = arith.addf %310, %317 : vector<16x31xf32>
      %c0_i32_235 = arith.constant 0 : i32
      %319 = arith.addi %arg7, %c0_i32_235 : i32
      %320 = arith.index_cast %319 : i32 to index
      %c0_236 = arith.constant 0 : index
      %c5_237 = arith.constant 5 : index
      %321 = vector.load %arg1[%320, %c0_236, %c5_237] : memref<38x16x38xf32, #tpu.memory_space<vmem>>, vector<1x16x31xf32>
      %322 = vector.shape_cast %321 : vector<1x16x31xf32> to vector<16x31xf32>
      %c5_238 = arith.constant 5 : index
      %c0_239 = arith.constant 0 : index
      %c0_240 = arith.constant 0 : index
      %323 = vector.load %arg2[%c5_238, %c0_239, %c0_240] : memref<64x16x31xf32, #tpu.memory_space<vmem>>, vector<1x16x31xf32>
      %324 = vector.shape_cast %323 : vector<1x16x31xf32> to vector<16x31xf32>
      %325 = arith.mulf %322, %324 : vector<16x31xf32>
      %326 = arith.addf %318, %325 : vector<16x31xf32>
      %c0_i32_241 = arith.constant 0 : i32
      %327 = arith.addi %arg7, %c0_i32_241 : i32
      %328 = arith.index_cast %327 : i32 to index
      %c0_242 = arith.constant 0 : index
      %c6_243 = arith.constant 6 : index
      %329 = vector.load %arg1[%328, %c0_242, %c6_243] : memref<38x16x38xf32, #tpu.memory_space<vmem>>, vector<1x16x31xf32>
      %330 = vector.shape_cast %329 : vector<1x16x31xf32> to vector<16x31xf32>
      %c6_244 = arith.constant 6 : index
      %c0_245 = arith.constant 0 : index
      %c0_246 = arith.constant 0 : index
      %331 = vector.load %arg2[%c6_244, %c0_245, %c0_246] : memref<64x16x31xf32, #tpu.memory_space<vmem>>, vector<1x16x31xf32>
      %332 = vector.shape_cast %331 : vector<1x16x31xf32> to vector<16x31xf32>
      %333 = arith.mulf %330, %332 : vector<16x31xf32>
      %334 = arith.addf %326, %333 : vector<16x31xf32>
      %c0_i32_247 = arith.constant 0 : i32
      %335 = arith.addi %arg7, %c0_i32_247 : i32
      %336 = arith.index_cast %335 : i32 to index
      %c0_248 = arith.constant 0 : index
      %c7_249 = arith.constant 7 : index
      %337 = vector.load %arg1[%336, %c0_248, %c7_249] : memref<38x16x38xf32, #tpu.memory_space<vmem>>, vector<1x16x31xf32>
      %338 = vector.shape_cast %337 : vector<1x16x31xf32> to vector<16x31xf32>
      %c7_250 = arith.constant 7 : index
      %c0_251 = arith.constant 0 : index
      %c0_252 = arith.constant 0 : index
      %339 = vector.load %arg2[%c7_250, %c0_251, %c0_252] : memref<64x16x31xf32, #tpu.memory_space<vmem>>, vector<1x16x31xf32>
      %340 = vector.shape_cast %339 : vector<1x16x31xf32> to vector<16x31xf32>
      %341 = arith.mulf %338, %340 : vector<16x31xf32>
      %342 = arith.addf %334, %341 : vector<16x31xf32>
      %c1_i32_253 = arith.constant 1 : i32
      %343 = arith.addi %arg7, %c1_i32_253 : i32
      %344 = arith.index_cast %343 : i32 to index
      %c0_254 = arith.constant 0 : index
      %c0_255 = arith.constant 0 : index
      %345 = vector.load %arg1[%344, %c0_254, %c0_255] : memref<38x16x38xf32, #tpu.memory_space<vmem>>, vector<1x16x31xf32>
      %346 = vector.shape_cast %345 : vector<1x16x31xf32> to vector<16x31xf32>
      %c8_256 = arith.constant 8 : index
      %c0_257 = arith.constant 0 : index
      %c0_258 = arith.constant 0 : index
      %347 = vector.load %arg2[%c8_256, %c0_257, %c0_258] : memref<64x16x31xf32, #tpu.memory_space<vmem>>, vector<1x16x31xf32>
      %348 = vector.shape_cast %347 : vector<1x16x31xf32> to vector<16x31xf32>
      %349 = arith.mulf %346, %348 : vector<16x31xf32>
      %c1_i32_259 = arith.constant 1 : i32
      %350 = arith.addi %arg7, %c1_i32_259 : i32
      %351 = arith.index_cast %350 : i32 to index
      %c0_260 = arith.constant 0 : index
      %c1_261 = arith.constant 1 : index
      %352 = vector.load %arg1[%351, %c0_260, %c1_261] : memref<38x16x38xf32, #tpu.memory_space<vmem>>, vector<1x16x31xf32>
      %353 = vector.shape_cast %352 : vector<1x16x31xf32> to vector<16x31xf32>
      %c9_262 = arith.constant 9 : index
      %c0_263 = arith.constant 0 : index
      %c0_264 = arith.constant 0 : index
      %354 = vector.load %arg2[%c9_262, %c0_263, %c0_264] : memref<64x16x31xf32, #tpu.memory_space<vmem>>, vector<1x16x31xf32>
      %355 = vector.shape_cast %354 : vector<1x16x31xf32> to vector<16x31xf32>
      %356 = arith.mulf %353, %355 : vector<16x31xf32>
      %357 = arith.addf %349, %356 : vector<16x31xf32>
      %c1_i32_265 = arith.constant 1 : i32
      %358 = arith.addi %arg7, %c1_i32_265 : i32
      %359 = arith.index_cast %358 : i32 to index
      %c0_266 = arith.constant 0 : index
      %c2_267 = arith.constant 2 : index
      %360 = vector.load %arg1[%359, %c0_266, %c2_267] : memref<38x16x38xf32, #tpu.memory_space<vmem>>, vector<1x16x31xf32>
      %361 = vector.shape_cast %360 : vector<1x16x31xf32> to vector<16x31xf32>
      %c10_268 = arith.constant 10 : index
      %c0_269 = arith.constant 0 : index
      %c0_270 = arith.constant 0 : index
      %362 = vector.load %arg2[%c10_268, %c0_269, %c0_270] : memref<64x16x31xf32, #tpu.memory_space<vmem>>, vector<1x16x31xf32>
      %363 = vector.shape_cast %362 : vector<1x16x31xf32> to vector<16x31xf32>
      %364 = arith.mulf %361, %363 : vector<16x31xf32>
      %365 = arith.addf %357, %364 : vector<16x31xf32>
      %c1_i32_271 = arith.constant 1 : i32
      %366 = arith.addi %arg7, %c1_i32_271 : i32
      %367 = arith.index_cast %366 : i32 to index
      %c0_272 = arith.constant 0 : index
      %c3_273 = arith.constant 3 : index
      %368 = vector.load %arg1[%367, %c0_272, %c3_273] : memref<38x16x38xf32, #tpu.memory_space<vmem>>, vector<1x16x31xf32>
      %369 = vector.shape_cast %368 : vector<1x16x31xf32> to vector<16x31xf32>
      %c11_274 = arith.constant 11 : index
      %c0_275 = arith.constant 0 : index
      %c0_276 = arith.constant 0 : index
      %370 = vector.load %arg2[%c11_274, %c0_275, %c0_276] : memref<64x16x31xf32, #tpu.memory_space<vmem>>, vector<1x16x31xf32>
      %371 = vector.shape_cast %370 : vector<1x16x31xf32> to vector<16x31xf32>
      %372 = arith.mulf %369, %371 : vector<16x31xf32>
      %373 = arith.addf %365, %372 : vector<16x31xf32>
      %c1_i32_277 = arith.constant 1 : i32
      %374 = arith.addi %arg7, %c1_i32_277 : i32
      %375 = arith.index_cast %374 : i32 to index
      %c0_278 = arith.constant 0 : index
      %c4_279 = arith.constant 4 : index
      %376 = vector.load %arg1[%375, %c0_278, %c4_279] : memref<38x16x38xf32, #tpu.memory_space<vmem>>, vector<1x16x31xf32>
      %377 = vector.shape_cast %376 : vector<1x16x31xf32> to vector<16x31xf32>
      %c12_280 = arith.constant 12 : index
      %c0_281 = arith.constant 0 : index
      %c0_282 = arith.constant 0 : index
      %378 = vector.load %arg2[%c12_280, %c0_281, %c0_282] : memref<64x16x31xf32, #tpu.memory_space<vmem>>, vector<1x16x31xf32>
      %379 = vector.shape_cast %378 : vector<1x16x31xf32> to vector<16x31xf32>
      %380 = arith.mulf %377, %379 : vector<16x31xf32>
      %381 = arith.addf %373, %380 : vector<16x31xf32>
      %c1_i32_283 = arith.constant 1 : i32
      %382 = arith.addi %arg7, %c1_i32_283 : i32
      %383 = arith.index_cast %382 : i32 to index
      %c0_284 = arith.constant 0 : index
      %c5_285 = arith.constant 5 : index
      %384 = vector.load %arg1[%383, %c0_284, %c5_285] : memref<38x16x38xf32, #tpu.memory_space<vmem>>, vector<1x16x31xf32>
      %385 = vector.shape_cast %384 : vector<1x16x31xf32> to vector<16x31xf32>
      %c13_286 = arith.constant 13 : index
      %c0_287 = arith.constant 0 : index
      %c0_288 = arith.constant 0 : index
      %386 = vector.load %arg2[%c13_286, %c0_287, %c0_288] : memref<64x16x31xf32, #tpu.memory_space<vmem>>, vector<1x16x31xf32>
      %387 = vector.shape_cast %386 : vector<1x16x31xf32> to vector<16x31xf32>
      %388 = arith.mulf %385, %387 : vector<16x31xf32>
      %389 = arith.addf %381, %388 : vector<16x31xf32>
      %c1_i32_289 = arith.constant 1 : i32
      %390 = arith.addi %arg7, %c1_i32_289 : i32
      %391 = arith.index_cast %390 : i32 to index
      %c0_290 = arith.constant 0 : index
      %c6_291 = arith.constant 6 : index
      %392 = vector.load %arg1[%391, %c0_290, %c6_291] : memref<38x16x38xf32, #tpu.memory_space<vmem>>, vector<1x16x31xf32>
      %393 = vector.shape_cast %392 : vector<1x16x31xf32> to vector<16x31xf32>
      %c14_292 = arith.constant 14 : index
      %c0_293 = arith.constant 0 : index
      %c0_294 = arith.constant 0 : index
      %394 = vector.load %arg2[%c14_292, %c0_293, %c0_294] : memref<64x16x31xf32, #tpu.memory_space<vmem>>, vector<1x16x31xf32>
      %395 = vector.shape_cast %394 : vector<1x16x31xf32> to vector<16x31xf32>
      %396 = arith.mulf %393, %395 : vector<16x31xf32>
      %397 = arith.addf %389, %396 : vector<16x31xf32>
      %c1_i32_295 = arith.constant 1 : i32
      %398 = arith.addi %arg7, %c1_i32_295 : i32
      %399 = arith.index_cast %398 : i32 to index
      %c0_296 = arith.constant 0 : index
      %c7_297 = arith.constant 7 : index
      %400 = vector.load %arg1[%399, %c0_296, %c7_297] : memref<38x16x38xf32, #tpu.memory_space<vmem>>, vector<1x16x31xf32>
      %401 = vector.shape_cast %400 : vector<1x16x31xf32> to vector<16x31xf32>
      %c15_298 = arith.constant 15 : index
      %c0_299 = arith.constant 0 : index
      %c0_300 = arith.constant 0 : index
      %402 = vector.load %arg2[%c15_298, %c0_299, %c0_300] : memref<64x16x31xf32, #tpu.memory_space<vmem>>, vector<1x16x31xf32>
      %403 = vector.shape_cast %402 : vector<1x16x31xf32> to vector<16x31xf32>
      %404 = arith.mulf %401, %403 : vector<16x31xf32>
      %405 = arith.addf %397, %404 : vector<16x31xf32>
      %406 = arith.addf %342, %405 : vector<16x31xf32>
      %c2_i32 = arith.constant 2 : i32
      %407 = arith.addi %arg7, %c2_i32 : i32
      %408 = arith.index_cast %407 : i32 to index
      %c0_301 = arith.constant 0 : index
      %c0_302 = arith.constant 0 : index
      %409 = vector.load %arg1[%408, %c0_301, %c0_302] : memref<38x16x38xf32, #tpu.memory_space<vmem>>, vector<1x16x31xf32>
      %410 = vector.shape_cast %409 : vector<1x16x31xf32> to vector<16x31xf32>
      %c16_303 = arith.constant 16 : index
      %c0_304 = arith.constant 0 : index
      %c0_305 = arith.constant 0 : index
      %411 = vector.load %arg2[%c16_303, %c0_304, %c0_305] : memref<64x16x31xf32, #tpu.memory_space<vmem>>, vector<1x16x31xf32>
      %412 = vector.shape_cast %411 : vector<1x16x31xf32> to vector<16x31xf32>
      %413 = arith.mulf %410, %412 : vector<16x31xf32>
      %c2_i32_306 = arith.constant 2 : i32
      %414 = arith.addi %arg7, %c2_i32_306 : i32
      %415 = arith.index_cast %414 : i32 to index
      %c0_307 = arith.constant 0 : index
      %c1_308 = arith.constant 1 : index
      %416 = vector.load %arg1[%415, %c0_307, %c1_308] : memref<38x16x38xf32, #tpu.memory_space<vmem>>, vector<1x16x31xf32>
      %417 = vector.shape_cast %416 : vector<1x16x31xf32> to vector<16x31xf32>
      %c17_309 = arith.constant 17 : index
      %c0_310 = arith.constant 0 : index
      %c0_311 = arith.constant 0 : index
      %418 = vector.load %arg2[%c17_309, %c0_310, %c0_311] : memref<64x16x31xf32, #tpu.memory_space<vmem>>, vector<1x16x31xf32>
      %419 = vector.shape_cast %418 : vector<1x16x31xf32> to vector<16x31xf32>
      %420 = arith.mulf %417, %419 : vector<16x31xf32>
      %421 = arith.addf %413, %420 : vector<16x31xf32>
      %c2_i32_312 = arith.constant 2 : i32
      %422 = arith.addi %arg7, %c2_i32_312 : i32
      %423 = arith.index_cast %422 : i32 to index
      %c0_313 = arith.constant 0 : index
      %c2_314 = arith.constant 2 : index
      %424 = vector.load %arg1[%423, %c0_313, %c2_314] : memref<38x16x38xf32, #tpu.memory_space<vmem>>, vector<1x16x31xf32>
      %425 = vector.shape_cast %424 : vector<1x16x31xf32> to vector<16x31xf32>
      %c18_315 = arith.constant 18 : index
      %c0_316 = arith.constant 0 : index
      %c0_317 = arith.constant 0 : index
      %426 = vector.load %arg2[%c18_315, %c0_316, %c0_317] : memref<64x16x31xf32, #tpu.memory_space<vmem>>, vector<1x16x31xf32>
      %427 = vector.shape_cast %426 : vector<1x16x31xf32> to vector<16x31xf32>
      %428 = arith.mulf %425, %427 : vector<16x31xf32>
      %429 = arith.addf %421, %428 : vector<16x31xf32>
      %c2_i32_318 = arith.constant 2 : i32
      %430 = arith.addi %arg7, %c2_i32_318 : i32
      %431 = arith.index_cast %430 : i32 to index
      %c0_319 = arith.constant 0 : index
      %c3_320 = arith.constant 3 : index
      %432 = vector.load %arg1[%431, %c0_319, %c3_320] : memref<38x16x38xf32, #tpu.memory_space<vmem>>, vector<1x16x31xf32>
      %433 = vector.shape_cast %432 : vector<1x16x31xf32> to vector<16x31xf32>
      %c19_321 = arith.constant 19 : index
      %c0_322 = arith.constant 0 : index
      %c0_323 = arith.constant 0 : index
      %434 = vector.load %arg2[%c19_321, %c0_322, %c0_323] : memref<64x16x31xf32, #tpu.memory_space<vmem>>, vector<1x16x31xf32>
      %435 = vector.shape_cast %434 : vector<1x16x31xf32> to vector<16x31xf32>
      %436 = arith.mulf %433, %435 : vector<16x31xf32>
      %437 = arith.addf %429, %436 : vector<16x31xf32>
      %c2_i32_324 = arith.constant 2 : i32
      %438 = arith.addi %arg7, %c2_i32_324 : i32
      %439 = arith.index_cast %438 : i32 to index
      %c0_325 = arith.constant 0 : index
      %c4_326 = arith.constant 4 : index
      %440 = vector.load %arg1[%439, %c0_325, %c4_326] : memref<38x16x38xf32, #tpu.memory_space<vmem>>, vector<1x16x31xf32>
      %441 = vector.shape_cast %440 : vector<1x16x31xf32> to vector<16x31xf32>
      %c20_327 = arith.constant 20 : index
      %c0_328 = arith.constant 0 : index
      %c0_329 = arith.constant 0 : index
      %442 = vector.load %arg2[%c20_327, %c0_328, %c0_329] : memref<64x16x31xf32, #tpu.memory_space<vmem>>, vector<1x16x31xf32>
      %443 = vector.shape_cast %442 : vector<1x16x31xf32> to vector<16x31xf32>
      %444 = arith.mulf %441, %443 : vector<16x31xf32>
      %445 = arith.addf %437, %444 : vector<16x31xf32>
      %c2_i32_330 = arith.constant 2 : i32
      %446 = arith.addi %arg7, %c2_i32_330 : i32
      %447 = arith.index_cast %446 : i32 to index
      %c0_331 = arith.constant 0 : index
      %c5_332 = arith.constant 5 : index
      %448 = vector.load %arg1[%447, %c0_331, %c5_332] : memref<38x16x38xf32, #tpu.memory_space<vmem>>, vector<1x16x31xf32>
      %449 = vector.shape_cast %448 : vector<1x16x31xf32> to vector<16x31xf32>
      %c21_333 = arith.constant 21 : index
      %c0_334 = arith.constant 0 : index
      %c0_335 = arith.constant 0 : index
      %450 = vector.load %arg2[%c21_333, %c0_334, %c0_335] : memref<64x16x31xf32, #tpu.memory_space<vmem>>, vector<1x16x31xf32>
      %451 = vector.shape_cast %450 : vector<1x16x31xf32> to vector<16x31xf32>
      %452 = arith.mulf %449, %451 : vector<16x31xf32>
      %453 = arith.addf %445, %452 : vector<16x31xf32>
      %c2_i32_336 = arith.constant 2 : i32
      %454 = arith.addi %arg7, %c2_i32_336 : i32
      %455 = arith.index_cast %454 : i32 to index
      %c0_337 = arith.constant 0 : index
      %c6_338 = arith.constant 6 : index
      %456 = vector.load %arg1[%455, %c0_337, %c6_338] : memref<38x16x38xf32, #tpu.memory_space<vmem>>, vector<1x16x31xf32>
      %457 = vector.shape_cast %456 : vector<1x16x31xf32> to vector<16x31xf32>
      %c22_339 = arith.constant 22 : index
      %c0_340 = arith.constant 0 : index
      %c0_341 = arith.constant 0 : index
      %458 = vector.load %arg2[%c22_339, %c0_340, %c0_341] : memref<64x16x31xf32, #tpu.memory_space<vmem>>, vector<1x16x31xf32>
      %459 = vector.shape_cast %458 : vector<1x16x31xf32> to vector<16x31xf32>
      %460 = arith.mulf %457, %459 : vector<16x31xf32>
      %461 = arith.addf %453, %460 : vector<16x31xf32>
      %c2_i32_342 = arith.constant 2 : i32
      %462 = arith.addi %arg7, %c2_i32_342 : i32
      %463 = arith.index_cast %462 : i32 to index
      %c0_343 = arith.constant 0 : index
      %c7_344 = arith.constant 7 : index
      %464 = vector.load %arg1[%463, %c0_343, %c7_344] : memref<38x16x38xf32, #tpu.memory_space<vmem>>, vector<1x16x31xf32>
      %465 = vector.shape_cast %464 : vector<1x16x31xf32> to vector<16x31xf32>
      %c23_345 = arith.constant 23 : index
      %c0_346 = arith.constant 0 : index
      %c0_347 = arith.constant 0 : index
      %466 = vector.load %arg2[%c23_345, %c0_346, %c0_347] : memref<64x16x31xf32, #tpu.memory_space<vmem>>, vector<1x16x31xf32>
      %467 = vector.shape_cast %466 : vector<1x16x31xf32> to vector<16x31xf32>
      %468 = arith.mulf %465, %467 : vector<16x31xf32>
      %469 = arith.addf %461, %468 : vector<16x31xf32>
      %470 = arith.addf %406, %469 : vector<16x31xf32>
      %c3_i32 = arith.constant 3 : i32
      %471 = arith.addi %arg7, %c3_i32 : i32
      %472 = arith.index_cast %471 : i32 to index
      %c0_348 = arith.constant 0 : index
      %c0_349 = arith.constant 0 : index
      %473 = vector.load %arg1[%472, %c0_348, %c0_349] : memref<38x16x38xf32, #tpu.memory_space<vmem>>, vector<1x16x31xf32>
      %474 = vector.shape_cast %473 : vector<1x16x31xf32> to vector<16x31xf32>
      %c24_350 = arith.constant 24 : index
      %c0_351 = arith.constant 0 : index
      %c0_352 = arith.constant 0 : index
      %475 = vector.load %arg2[%c24_350, %c0_351, %c0_352] : memref<64x16x31xf32, #tpu.memory_space<vmem>>, vector<1x16x31xf32>
      %476 = vector.shape_cast %475 : vector<1x16x31xf32> to vector<16x31xf32>
      %477 = arith.mulf %474, %476 : vector<16x31xf32>
      %c3_i32_353 = arith.constant 3 : i32
      %478 = arith.addi %arg7, %c3_i32_353 : i32
      %479 = arith.index_cast %478 : i32 to index
      %c0_354 = arith.constant 0 : index
      %c1_355 = arith.constant 1 : index
      %480 = vector.load %arg1[%479, %c0_354, %c1_355] : memref<38x16x38xf32, #tpu.memory_space<vmem>>, vector<1x16x31xf32>
      %481 = vector.shape_cast %480 : vector<1x16x31xf32> to vector<16x31xf32>
      %c25_356 = arith.constant 25 : index
      %c0_357 = arith.constant 0 : index
      %c0_358 = arith.constant 0 : index
      %482 = vector.load %arg2[%c25_356, %c0_357, %c0_358] : memref<64x16x31xf32, #tpu.memory_space<vmem>>, vector<1x16x31xf32>
      %483 = vector.shape_cast %482 : vector<1x16x31xf32> to vector<16x31xf32>
      %484 = arith.mulf %481, %483 : vector<16x31xf32>
      %485 = arith.addf %477, %484 : vector<16x31xf32>
      %c3_i32_359 = arith.constant 3 : i32
      %486 = arith.addi %arg7, %c3_i32_359 : i32
      %487 = arith.index_cast %486 : i32 to index
      %c0_360 = arith.constant 0 : index
      %c2_361 = arith.constant 2 : index
      %488 = vector.load %arg1[%487, %c0_360, %c2_361] : memref<38x16x38xf32, #tpu.memory_space<vmem>>, vector<1x16x31xf32>
      %489 = vector.shape_cast %488 : vector<1x16x31xf32> to vector<16x31xf32>
      %c26_362 = arith.constant 26 : index
      %c0_363 = arith.constant 0 : index
      %c0_364 = arith.constant 0 : index
      %490 = vector.load %arg2[%c26_362, %c0_363, %c0_364] : memref<64x16x31xf32, #tpu.memory_space<vmem>>, vector<1x16x31xf32>
      %491 = vector.shape_cast %490 : vector<1x16x31xf32> to vector<16x31xf32>
      %492 = arith.mulf %489, %491 : vector<16x31xf32>
      %493 = arith.addf %485, %492 : vector<16x31xf32>
      %c3_i32_365 = arith.constant 3 : i32
      %494 = arith.addi %arg7, %c3_i32_365 : i32
      %495 = arith.index_cast %494 : i32 to index
      %c0_366 = arith.constant 0 : index
      %c3_367 = arith.constant 3 : index
      %496 = vector.load %arg1[%495, %c0_366, %c3_367] : memref<38x16x38xf32, #tpu.memory_space<vmem>>, vector<1x16x31xf32>
      %497 = vector.shape_cast %496 : vector<1x16x31xf32> to vector<16x31xf32>
      %c27_368 = arith.constant 27 : index
      %c0_369 = arith.constant 0 : index
      %c0_370 = arith.constant 0 : index
      %498 = vector.load %arg2[%c27_368, %c0_369, %c0_370] : memref<64x16x31xf32, #tpu.memory_space<vmem>>, vector<1x16x31xf32>
      %499 = vector.shape_cast %498 : vector<1x16x31xf32> to vector<16x31xf32>
      %500 = arith.mulf %497, %499 : vector<16x31xf32>
      %501 = arith.addf %493, %500 : vector<16x31xf32>
      %c3_i32_371 = arith.constant 3 : i32
      %502 = arith.addi %arg7, %c3_i32_371 : i32
      %503 = arith.index_cast %502 : i32 to index
      %c0_372 = arith.constant 0 : index
      %c4_373 = arith.constant 4 : index
      %504 = vector.load %arg1[%503, %c0_372, %c4_373] : memref<38x16x38xf32, #tpu.memory_space<vmem>>, vector<1x16x31xf32>
      %505 = vector.shape_cast %504 : vector<1x16x31xf32> to vector<16x31xf32>
      %c28_374 = arith.constant 28 : index
      %c0_375 = arith.constant 0 : index
      %c0_376 = arith.constant 0 : index
      %506 = vector.load %arg2[%c28_374, %c0_375, %c0_376] : memref<64x16x31xf32, #tpu.memory_space<vmem>>, vector<1x16x31xf32>
      %507 = vector.shape_cast %506 : vector<1x16x31xf32> to vector<16x31xf32>
      %508 = arith.mulf %505, %507 : vector<16x31xf32>
      %509 = arith.addf %501, %508 : vector<16x31xf32>
      %c3_i32_377 = arith.constant 3 : i32
      %510 = arith.addi %arg7, %c3_i32_377 : i32
      %511 = arith.index_cast %510 : i32 to index
      %c0_378 = arith.constant 0 : index
      %c5_379 = arith.constant 5 : index
      %512 = vector.load %arg1[%511, %c0_378, %c5_379] : memref<38x16x38xf32, #tpu.memory_space<vmem>>, vector<1x16x31xf32>
      %513 = vector.shape_cast %512 : vector<1x16x31xf32> to vector<16x31xf32>
      %c29_380 = arith.constant 29 : index
      %c0_381 = arith.constant 0 : index
      %c0_382 = arith.constant 0 : index
      %514 = vector.load %arg2[%c29_380, %c0_381, %c0_382] : memref<64x16x31xf32, #tpu.memory_space<vmem>>, vector<1x16x31xf32>
      %515 = vector.shape_cast %514 : vector<1x16x31xf32> to vector<16x31xf32>
      %516 = arith.mulf %513, %515 : vector<16x31xf32>
      %517 = arith.addf %509, %516 : vector<16x31xf32>
      %c3_i32_383 = arith.constant 3 : i32
      %518 = arith.addi %arg7, %c3_i32_383 : i32
      %519 = arith.index_cast %518 : i32 to index
      %c0_384 = arith.constant 0 : index
      %c6_385 = arith.constant 6 : index
      %520 = vector.load %arg1[%519, %c0_384, %c6_385] : memref<38x16x38xf32, #tpu.memory_space<vmem>>, vector<1x16x31xf32>
      %521 = vector.shape_cast %520 : vector<1x16x31xf32> to vector<16x31xf32>
      %c30_386 = arith.constant 30 : index
      %c0_387 = arith.constant 0 : index
      %c0_388 = arith.constant 0 : index
      %522 = vector.load %arg2[%c30_386, %c0_387, %c0_388] : memref<64x16x31xf32, #tpu.memory_space<vmem>>, vector<1x16x31xf32>
      %523 = vector.shape_cast %522 : vector<1x16x31xf32> to vector<16x31xf32>
      %524 = arith.mulf %521, %523 : vector<16x31xf32>
      %525 = arith.addf %517, %524 : vector<16x31xf32>
      %c3_i32_389 = arith.constant 3 : i32
      %526 = arith.addi %arg7, %c3_i32_389 : i32
      %527 = arith.index_cast %526 : i32 to index
      %c0_390 = arith.constant 0 : index
      %c7_391 = arith.constant 7 : index
      %528 = vector.load %arg1[%527, %c0_390, %c7_391] : memref<38x16x38xf32, #tpu.memory_space<vmem>>, vector<1x16x31xf32>
      %529 = vector.shape_cast %528 : vector<1x16x31xf32> to vector<16x31xf32>
      %c31_392 = arith.constant 31 : index
      %c0_393 = arith.constant 0 : index
      %c0_394 = arith.constant 0 : index
      %530 = vector.load %arg2[%c31_392, %c0_393, %c0_394] : memref<64x16x31xf32, #tpu.memory_space<vmem>>, vector<1x16x31xf32>
      %531 = vector.shape_cast %530 : vector<1x16x31xf32> to vector<16x31xf32>
      %532 = arith.mulf %529, %531 : vector<16x31xf32>
      %533 = arith.addf %525, %532 : vector<16x31xf32>
      %534 = arith.addf %470, %533 : vector<16x31xf32>
      %c4_i32 = arith.constant 4 : i32
      %535 = arith.addi %arg7, %c4_i32 : i32
      %536 = arith.index_cast %535 : i32 to index
      %c0_395 = arith.constant 0 : index
      %c0_396 = arith.constant 0 : index
      %537 = vector.load %arg1[%536, %c0_395, %c0_396] : memref<38x16x38xf32, #tpu.memory_space<vmem>>, vector<1x16x31xf32>
      %538 = vector.shape_cast %537 : vector<1x16x31xf32> to vector<16x31xf32>
      %c32_397 = arith.constant 32 : index
      %c0_398 = arith.constant 0 : index
      %c0_399 = arith.constant 0 : index
      %539 = vector.load %arg2[%c32_397, %c0_398, %c0_399] : memref<64x16x31xf32, #tpu.memory_space<vmem>>, vector<1x16x31xf32>
      %540 = vector.shape_cast %539 : vector<1x16x31xf32> to vector<16x31xf32>
      %541 = arith.mulf %538, %540 : vector<16x31xf32>
      %c4_i32_400 = arith.constant 4 : i32
      %542 = arith.addi %arg7, %c4_i32_400 : i32
      %543 = arith.index_cast %542 : i32 to index
      %c0_401 = arith.constant 0 : index
      %c1_402 = arith.constant 1 : index
      %544 = vector.load %arg1[%543, %c0_401, %c1_402] : memref<38x16x38xf32, #tpu.memory_space<vmem>>, vector<1x16x31xf32>
      %545 = vector.shape_cast %544 : vector<1x16x31xf32> to vector<16x31xf32>
      %c33_403 = arith.constant 33 : index
      %c0_404 = arith.constant 0 : index
      %c0_405 = arith.constant 0 : index
      %546 = vector.load %arg2[%c33_403, %c0_404, %c0_405] : memref<64x16x31xf32, #tpu.memory_space<vmem>>, vector<1x16x31xf32>
      %547 = vector.shape_cast %546 : vector<1x16x31xf32> to vector<16x31xf32>
      %548 = arith.mulf %545, %547 : vector<16x31xf32>
      %549 = arith.addf %541, %548 : vector<16x31xf32>
      %c4_i32_406 = arith.constant 4 : i32
      %550 = arith.addi %arg7, %c4_i32_406 : i32
      %551 = arith.index_cast %550 : i32 to index
      %c0_407 = arith.constant 0 : index
      %c2_408 = arith.constant 2 : index
      %552 = vector.load %arg1[%551, %c0_407, %c2_408] : memref<38x16x38xf32, #tpu.memory_space<vmem>>, vector<1x16x31xf32>
      %553 = vector.shape_cast %552 : vector<1x16x31xf32> to vector<16x31xf32>
      %c34_409 = arith.constant 34 : index
      %c0_410 = arith.constant 0 : index
      %c0_411 = arith.constant 0 : index
      %554 = vector.load %arg2[%c34_409, %c0_410, %c0_411] : memref<64x16x31xf32, #tpu.memory_space<vmem>>, vector<1x16x31xf32>
      %555 = vector.shape_cast %554 : vector<1x16x31xf32> to vector<16x31xf32>
      %556 = arith.mulf %553, %555 : vector<16x31xf32>
      %557 = arith.addf %549, %556 : vector<16x31xf32>
      %c4_i32_412 = arith.constant 4 : i32
      %558 = arith.addi %arg7, %c4_i32_412 : i32
      %559 = arith.index_cast %558 : i32 to index
      %c0_413 = arith.constant 0 : index
      %c3_414 = arith.constant 3 : index
      %560 = vector.load %arg1[%559, %c0_413, %c3_414] : memref<38x16x38xf32, #tpu.memory_space<vmem>>, vector<1x16x31xf32>
      %561 = vector.shape_cast %560 : vector<1x16x31xf32> to vector<16x31xf32>
      %c35_415 = arith.constant 35 : index
      %c0_416 = arith.constant 0 : index
      %c0_417 = arith.constant 0 : index
      %562 = vector.load %arg2[%c35_415, %c0_416, %c0_417] : memref<64x16x31xf32, #tpu.memory_space<vmem>>, vector<1x16x31xf32>
      %563 = vector.shape_cast %562 : vector<1x16x31xf32> to vector<16x31xf32>
      %564 = arith.mulf %561, %563 : vector<16x31xf32>
      %565 = arith.addf %557, %564 : vector<16x31xf32>
      %c4_i32_418 = arith.constant 4 : i32
      %566 = arith.addi %arg7, %c4_i32_418 : i32
      %567 = arith.index_cast %566 : i32 to index
      %c0_419 = arith.constant 0 : index
      %c4_420 = arith.constant 4 : index
      %568 = vector.load %arg1[%567, %c0_419, %c4_420] : memref<38x16x38xf32, #tpu.memory_space<vmem>>, vector<1x16x31xf32>
      %569 = vector.shape_cast %568 : vector<1x16x31xf32> to vector<16x31xf32>
      %c36_421 = arith.constant 36 : index
      %c0_422 = arith.constant 0 : index
      %c0_423 = arith.constant 0 : index
      %570 = vector.load %arg2[%c36_421, %c0_422, %c0_423] : memref<64x16x31xf32, #tpu.memory_space<vmem>>, vector<1x16x31xf32>
      %571 = vector.shape_cast %570 : vector<1x16x31xf32> to vector<16x31xf32>
      %572 = arith.mulf %569, %571 : vector<16x31xf32>
      %573 = arith.addf %565, %572 : vector<16x31xf32>
      %c4_i32_424 = arith.constant 4 : i32
      %574 = arith.addi %arg7, %c4_i32_424 : i32
      %575 = arith.index_cast %574 : i32 to index
      %c0_425 = arith.constant 0 : index
      %c5_426 = arith.constant 5 : index
      %576 = vector.load %arg1[%575, %c0_425, %c5_426] : memref<38x16x38xf32, #tpu.memory_space<vmem>>, vector<1x16x31xf32>
      %577 = vector.shape_cast %576 : vector<1x16x31xf32> to vector<16x31xf32>
      %c37_427 = arith.constant 37 : index
      %c0_428 = arith.constant 0 : index
      %c0_429 = arith.constant 0 : index
      %578 = vector.load %arg2[%c37_427, %c0_428, %c0_429] : memref<64x16x31xf32, #tpu.memory_space<vmem>>, vector<1x16x31xf32>
      %579 = vector.shape_cast %578 : vector<1x16x31xf32> to vector<16x31xf32>
      %580 = arith.mulf %577, %579 : vector<16x31xf32>
      %581 = arith.addf %573, %580 : vector<16x31xf32>
      %c4_i32_430 = arith.constant 4 : i32
      %582 = arith.addi %arg7, %c4_i32_430 : i32
      %583 = arith.index_cast %582 : i32 to index
      %c0_431 = arith.constant 0 : index
      %c6_432 = arith.constant 6 : index
      %584 = vector.load %arg1[%583, %c0_431, %c6_432] : memref<38x16x38xf32, #tpu.memory_space<vmem>>, vector<1x16x31xf32>
      %585 = vector.shape_cast %584 : vector<1x16x31xf32> to vector<16x31xf32>
      %c38_433 = arith.constant 38 : index
      %c0_434 = arith.constant 0 : index
      %c0_435 = arith.constant 0 : index
      %586 = vector.load %arg2[%c38_433, %c0_434, %c0_435] : memref<64x16x31xf32, #tpu.memory_space<vmem>>, vector<1x16x31xf32>
      %587 = vector.shape_cast %586 : vector<1x16x31xf32> to vector<16x31xf32>
      %588 = arith.mulf %585, %587 : vector<16x31xf32>
      %589 = arith.addf %581, %588 : vector<16x31xf32>
      %c4_i32_436 = arith.constant 4 : i32
      %590 = arith.addi %arg7, %c4_i32_436 : i32
      %591 = arith.index_cast %590 : i32 to index
      %c0_437 = arith.constant 0 : index
      %c7_438 = arith.constant 7 : index
      %592 = vector.load %arg1[%591, %c0_437, %c7_438] : memref<38x16x38xf32, #tpu.memory_space<vmem>>, vector<1x16x31xf32>
      %593 = vector.shape_cast %592 : vector<1x16x31xf32> to vector<16x31xf32>
      %c39_439 = arith.constant 39 : index
      %c0_440 = arith.constant 0 : index
      %c0_441 = arith.constant 0 : index
      %594 = vector.load %arg2[%c39_439, %c0_440, %c0_441] : memref<64x16x31xf32, #tpu.memory_space<vmem>>, vector<1x16x31xf32>
      %595 = vector.shape_cast %594 : vector<1x16x31xf32> to vector<16x31xf32>
      %596 = arith.mulf %593, %595 : vector<16x31xf32>
      %597 = arith.addf %589, %596 : vector<16x31xf32>
      %598 = arith.addf %534, %597 : vector<16x31xf32>
      %c5_i32 = arith.constant 5 : i32
      %599 = arith.addi %arg7, %c5_i32 : i32
      %600 = arith.index_cast %599 : i32 to index
      %c0_442 = arith.constant 0 : index
      %c0_443 = arith.constant 0 : index
      %601 = vector.load %arg1[%600, %c0_442, %c0_443] : memref<38x16x38xf32, #tpu.memory_space<vmem>>, vector<1x16x31xf32>
      %602 = vector.shape_cast %601 : vector<1x16x31xf32> to vector<16x31xf32>
      %c40_444 = arith.constant 40 : index
      %c0_445 = arith.constant 0 : index
      %c0_446 = arith.constant 0 : index
      %603 = vector.load %arg2[%c40_444, %c0_445, %c0_446] : memref<64x16x31xf32, #tpu.memory_space<vmem>>, vector<1x16x31xf32>
      %604 = vector.shape_cast %603 : vector<1x16x31xf32> to vector<16x31xf32>
      %605 = arith.mulf %602, %604 : vector<16x31xf32>
      %c5_i32_447 = arith.constant 5 : i32
      %606 = arith.addi %arg7, %c5_i32_447 : i32
      %607 = arith.index_cast %606 : i32 to index
      %c0_448 = arith.constant 0 : index
      %c1_449 = arith.constant 1 : index
      %608 = vector.load %arg1[%607, %c0_448, %c1_449] : memref<38x16x38xf32, #tpu.memory_space<vmem>>, vector<1x16x31xf32>
      %609 = vector.shape_cast %608 : vector<1x16x31xf32> to vector<16x31xf32>
      %c41_450 = arith.constant 41 : index
      %c0_451 = arith.constant 0 : index
      %c0_452 = arith.constant 0 : index
      %610 = vector.load %arg2[%c41_450, %c0_451, %c0_452] : memref<64x16x31xf32, #tpu.memory_space<vmem>>, vector<1x16x31xf32>
      %611 = vector.shape_cast %610 : vector<1x16x31xf32> to vector<16x31xf32>
      %612 = arith.mulf %609, %611 : vector<16x31xf32>
      %613 = arith.addf %605, %612 : vector<16x31xf32>
      %c5_i32_453 = arith.constant 5 : i32
      %614 = arith.addi %arg7, %c5_i32_453 : i32
      %615 = arith.index_cast %614 : i32 to index
      %c0_454 = arith.constant 0 : index
      %c2_455 = arith.constant 2 : index
      %616 = vector.load %arg1[%615, %c0_454, %c2_455] : memref<38x16x38xf32, #tpu.memory_space<vmem>>, vector<1x16x31xf32>
      %617 = vector.shape_cast %616 : vector<1x16x31xf32> to vector<16x31xf32>
      %c42_456 = arith.constant 42 : index
      %c0_457 = arith.constant 0 : index
      %c0_458 = arith.constant 0 : index
      %618 = vector.load %arg2[%c42_456, %c0_457, %c0_458] : memref<64x16x31xf32, #tpu.memory_space<vmem>>, vector<1x16x31xf32>
      %619 = vector.shape_cast %618 : vector<1x16x31xf32> to vector<16x31xf32>
      %620 = arith.mulf %617, %619 : vector<16x31xf32>
      %621 = arith.addf %613, %620 : vector<16x31xf32>
      %c5_i32_459 = arith.constant 5 : i32
      %622 = arith.addi %arg7, %c5_i32_459 : i32
      %623 = arith.index_cast %622 : i32 to index
      %c0_460 = arith.constant 0 : index
      %c3_461 = arith.constant 3 : index
      %624 = vector.load %arg1[%623, %c0_460, %c3_461] : memref<38x16x38xf32, #tpu.memory_space<vmem>>, vector<1x16x31xf32>
      %625 = vector.shape_cast %624 : vector<1x16x31xf32> to vector<16x31xf32>
      %c43_462 = arith.constant 43 : index
      %c0_463 = arith.constant 0 : index
      %c0_464 = arith.constant 0 : index
      %626 = vector.load %arg2[%c43_462, %c0_463, %c0_464] : memref<64x16x31xf32, #tpu.memory_space<vmem>>, vector<1x16x31xf32>
      %627 = vector.shape_cast %626 : vector<1x16x31xf32> to vector<16x31xf32>
      %628 = arith.mulf %625, %627 : vector<16x31xf32>
      %629 = arith.addf %621, %628 : vector<16x31xf32>
      %c5_i32_465 = arith.constant 5 : i32
      %630 = arith.addi %arg7, %c5_i32_465 : i32
      %631 = arith.index_cast %630 : i32 to index
      %c0_466 = arith.constant 0 : index
      %c4_467 = arith.constant 4 : index
      %632 = vector.load %arg1[%631, %c0_466, %c4_467] : memref<38x16x38xf32, #tpu.memory_space<vmem>>, vector<1x16x31xf32>
      %633 = vector.shape_cast %632 : vector<1x16x31xf32> to vector<16x31xf32>
      %c44_468 = arith.constant 44 : index
      %c0_469 = arith.constant 0 : index
      %c0_470 = arith.constant 0 : index
      %634 = vector.load %arg2[%c44_468, %c0_469, %c0_470] : memref<64x16x31xf32, #tpu.memory_space<vmem>>, vector<1x16x31xf32>
      %635 = vector.shape_cast %634 : vector<1x16x31xf32> to vector<16x31xf32>
      %636 = arith.mulf %633, %635 : vector<16x31xf32>
      %637 = arith.addf %629, %636 : vector<16x31xf32>
      %c5_i32_471 = arith.constant 5 : i32
      %638 = arith.addi %arg7, %c5_i32_471 : i32
      %639 = arith.index_cast %638 : i32 to index
      %c0_472 = arith.constant 0 : index
      %c5_473 = arith.constant 5 : index
      %640 = vector.load %arg1[%639, %c0_472, %c5_473] : memref<38x16x38xf32, #tpu.memory_space<vmem>>, vector<1x16x31xf32>
      %641 = vector.shape_cast %640 : vector<1x16x31xf32> to vector<16x31xf32>
      %c45_474 = arith.constant 45 : index
      %c0_475 = arith.constant 0 : index
      %c0_476 = arith.constant 0 : index
      %642 = vector.load %arg2[%c45_474, %c0_475, %c0_476] : memref<64x16x31xf32, #tpu.memory_space<vmem>>, vector<1x16x31xf32>
      %643 = vector.shape_cast %642 : vector<1x16x31xf32> to vector<16x31xf32>
      %644 = arith.mulf %641, %643 : vector<16x31xf32>
      %645 = arith.addf %637, %644 : vector<16x31xf32>
      %c5_i32_477 = arith.constant 5 : i32
      %646 = arith.addi %arg7, %c5_i32_477 : i32
      %647 = arith.index_cast %646 : i32 to index
      %c0_478 = arith.constant 0 : index
      %c6_479 = arith.constant 6 : index
      %648 = vector.load %arg1[%647, %c0_478, %c6_479] : memref<38x16x38xf32, #tpu.memory_space<vmem>>, vector<1x16x31xf32>
      %649 = vector.shape_cast %648 : vector<1x16x31xf32> to vector<16x31xf32>
      %c46_480 = arith.constant 46 : index
      %c0_481 = arith.constant 0 : index
      %c0_482 = arith.constant 0 : index
      %650 = vector.load %arg2[%c46_480, %c0_481, %c0_482] : memref<64x16x31xf32, #tpu.memory_space<vmem>>, vector<1x16x31xf32>
      %651 = vector.shape_cast %650 : vector<1x16x31xf32> to vector<16x31xf32>
      %652 = arith.mulf %649, %651 : vector<16x31xf32>
      %653 = arith.addf %645, %652 : vector<16x31xf32>
      %c5_i32_483 = arith.constant 5 : i32
      %654 = arith.addi %arg7, %c5_i32_483 : i32
      %655 = arith.index_cast %654 : i32 to index
      %c0_484 = arith.constant 0 : index
      %c7_485 = arith.constant 7 : index
      %656 = vector.load %arg1[%655, %c0_484, %c7_485] : memref<38x16x38xf32, #tpu.memory_space<vmem>>, vector<1x16x31xf32>
      %657 = vector.shape_cast %656 : vector<1x16x31xf32> to vector<16x31xf32>
      %c47_486 = arith.constant 47 : index
      %c0_487 = arith.constant 0 : index
      %c0_488 = arith.constant 0 : index
      %658 = vector.load %arg2[%c47_486, %c0_487, %c0_488] : memref<64x16x31xf32, #tpu.memory_space<vmem>>, vector<1x16x31xf32>
      %659 = vector.shape_cast %658 : vector<1x16x31xf32> to vector<16x31xf32>
      %660 = arith.mulf %657, %659 : vector<16x31xf32>
      %661 = arith.addf %653, %660 : vector<16x31xf32>
      %662 = arith.addf %598, %661 : vector<16x31xf32>
      %c6_i32 = arith.constant 6 : i32
      %663 = arith.addi %arg7, %c6_i32 : i32
      %664 = arith.index_cast %663 : i32 to index
      %c0_489 = arith.constant 0 : index
      %c0_490 = arith.constant 0 : index
      %665 = vector.load %arg1[%664, %c0_489, %c0_490] : memref<38x16x38xf32, #tpu.memory_space<vmem>>, vector<1x16x31xf32>
      %666 = vector.shape_cast %665 : vector<1x16x31xf32> to vector<16x31xf32>
      %c48_491 = arith.constant 48 : index
      %c0_492 = arith.constant 0 : index
      %c0_493 = arith.constant 0 : index
      %667 = vector.load %arg2[%c48_491, %c0_492, %c0_493] : memref<64x16x31xf32, #tpu.memory_space<vmem>>, vector<1x16x31xf32>
      %668 = vector.shape_cast %667 : vector<1x16x31xf32> to vector<16x31xf32>
      %669 = arith.mulf %666, %668 : vector<16x31xf32>
      %c6_i32_494 = arith.constant 6 : i32
      %670 = arith.addi %arg7, %c6_i32_494 : i32
      %671 = arith.index_cast %670 : i32 to index
      %c0_495 = arith.constant 0 : index
      %c1_496 = arith.constant 1 : index
      %672 = vector.load %arg1[%671, %c0_495, %c1_496] : memref<38x16x38xf32, #tpu.memory_space<vmem>>, vector<1x16x31xf32>
      %673 = vector.shape_cast %672 : vector<1x16x31xf32> to vector<16x31xf32>
      %c49_497 = arith.constant 49 : index
      %c0_498 = arith.constant 0 : index
      %c0_499 = arith.constant 0 : index
      %674 = vector.load %arg2[%c49_497, %c0_498, %c0_499] : memref<64x16x31xf32, #tpu.memory_space<vmem>>, vector<1x16x31xf32>
      %675 = vector.shape_cast %674 : vector<1x16x31xf32> to vector<16x31xf32>
      %676 = arith.mulf %673, %675 : vector<16x31xf32>
      %677 = arith.addf %669, %676 : vector<16x31xf32>
      %c6_i32_500 = arith.constant 6 : i32
      %678 = arith.addi %arg7, %c6_i32_500 : i32
      %679 = arith.index_cast %678 : i32 to index
      %c0_501 = arith.constant 0 : index
      %c2_502 = arith.constant 2 : index
      %680 = vector.load %arg1[%679, %c0_501, %c2_502] : memref<38x16x38xf32, #tpu.memory_space<vmem>>, vector<1x16x31xf32>
      %681 = vector.shape_cast %680 : vector<1x16x31xf32> to vector<16x31xf32>
      %c50_503 = arith.constant 50 : index
      %c0_504 = arith.constant 0 : index
      %c0_505 = arith.constant 0 : index
      %682 = vector.load %arg2[%c50_503, %c0_504, %c0_505] : memref<64x16x31xf32, #tpu.memory_space<vmem>>, vector<1x16x31xf32>
      %683 = vector.shape_cast %682 : vector<1x16x31xf32> to vector<16x31xf32>
      %684 = arith.mulf %681, %683 : vector<16x31xf32>
      %685 = arith.addf %677, %684 : vector<16x31xf32>
      %c6_i32_506 = arith.constant 6 : i32
      %686 = arith.addi %arg7, %c6_i32_506 : i32
      %687 = arith.index_cast %686 : i32 to index
      %c0_507 = arith.constant 0 : index
      %c3_508 = arith.constant 3 : index
      %688 = vector.load %arg1[%687, %c0_507, %c3_508] : memref<38x16x38xf32, #tpu.memory_space<vmem>>, vector<1x16x31xf32>
      %689 = vector.shape_cast %688 : vector<1x16x31xf32> to vector<16x31xf32>
      %c51 = arith.constant 51 : index
      %c0_509 = arith.constant 0 : index
      %c0_510 = arith.constant 0 : index
      %690 = vector.load %arg2[%c51, %c0_509, %c0_510] : memref<64x16x31xf32, #tpu.memory_space<vmem>>, vector<1x16x31xf32>
      %691 = vector.shape_cast %690 : vector<1x16x31xf32> to vector<16x31xf32>
      %692 = arith.mulf %689, %691 : vector<16x31xf32>
      %693 = arith.addf %685, %692 : vector<16x31xf32>
      %c6_i32_511 = arith.constant 6 : i32
      %694 = arith.addi %arg7, %c6_i32_511 : i32
      %695 = arith.index_cast %694 : i32 to index
      %c0_512 = arith.constant 0 : index
      %c4_513 = arith.constant 4 : index
      %696 = vector.load %arg1[%695, %c0_512, %c4_513] : memref<38x16x38xf32, #tpu.memory_space<vmem>>, vector<1x16x31xf32>
      %697 = vector.shape_cast %696 : vector<1x16x31xf32> to vector<16x31xf32>
      %c52 = arith.constant 52 : index
      %c0_514 = arith.constant 0 : index
      %c0_515 = arith.constant 0 : index
      %698 = vector.load %arg2[%c52, %c0_514, %c0_515] : memref<64x16x31xf32, #tpu.memory_space<vmem>>, vector<1x16x31xf32>
      %699 = vector.shape_cast %698 : vector<1x16x31xf32> to vector<16x31xf32>
      %700 = arith.mulf %697, %699 : vector<16x31xf32>
      %701 = arith.addf %693, %700 : vector<16x31xf32>
      %c6_i32_516 = arith.constant 6 : i32
      %702 = arith.addi %arg7, %c6_i32_516 : i32
      %703 = arith.index_cast %702 : i32 to index
      %c0_517 = arith.constant 0 : index
      %c5_518 = arith.constant 5 : index
      %704 = vector.load %arg1[%703, %c0_517, %c5_518] : memref<38x16x38xf32, #tpu.memory_space<vmem>>, vector<1x16x31xf32>
      %705 = vector.shape_cast %704 : vector<1x16x31xf32> to vector<16x31xf32>
      %c53 = arith.constant 53 : index
      %c0_519 = arith.constant 0 : index
      %c0_520 = arith.constant 0 : index
      %706 = vector.load %arg2[%c53, %c0_519, %c0_520] : memref<64x16x31xf32, #tpu.memory_space<vmem>>, vector<1x16x31xf32>
      %707 = vector.shape_cast %706 : vector<1x16x31xf32> to vector<16x31xf32>
      %708 = arith.mulf %705, %707 : vector<16x31xf32>
      %709 = arith.addf %701, %708 : vector<16x31xf32>
      %c6_i32_521 = arith.constant 6 : i32
      %710 = arith.addi %arg7, %c6_i32_521 : i32
      %711 = arith.index_cast %710 : i32 to index
      %c0_522 = arith.constant 0 : index
      %c6_523 = arith.constant 6 : index
      %712 = vector.load %arg1[%711, %c0_522, %c6_523] : memref<38x16x38xf32, #tpu.memory_space<vmem>>, vector<1x16x31xf32>
      %713 = vector.shape_cast %712 : vector<1x16x31xf32> to vector<16x31xf32>
      %c54 = arith.constant 54 : index
      %c0_524 = arith.constant 0 : index
      %c0_525 = arith.constant 0 : index
      %714 = vector.load %arg2[%c54, %c0_524, %c0_525] : memref<64x16x31xf32, #tpu.memory_space<vmem>>, vector<1x16x31xf32>
      %715 = vector.shape_cast %714 : vector<1x16x31xf32> to vector<16x31xf32>
      %716 = arith.mulf %713, %715 : vector<16x31xf32>
      %717 = arith.addf %709, %716 : vector<16x31xf32>
      %c6_i32_526 = arith.constant 6 : i32
      %718 = arith.addi %arg7, %c6_i32_526 : i32
      %719 = arith.index_cast %718 : i32 to index
      %c0_527 = arith.constant 0 : index
      %c7_528 = arith.constant 7 : index
      %720 = vector.load %arg1[%719, %c0_527, %c7_528] : memref<38x16x38xf32, #tpu.memory_space<vmem>>, vector<1x16x31xf32>
      %721 = vector.shape_cast %720 : vector<1x16x31xf32> to vector<16x31xf32>
      %c55 = arith.constant 55 : index
      %c0_529 = arith.constant 0 : index
      %c0_530 = arith.constant 0 : index
      %722 = vector.load %arg2[%c55, %c0_529, %c0_530] : memref<64x16x31xf32, #tpu.memory_space<vmem>>, vector<1x16x31xf32>
      %723 = vector.shape_cast %722 : vector<1x16x31xf32> to vector<16x31xf32>
      %724 = arith.mulf %721, %723 : vector<16x31xf32>
      %725 = arith.addf %717, %724 : vector<16x31xf32>
      %726 = arith.addf %662, %725 : vector<16x31xf32>
      %c7_i32 = arith.constant 7 : i32
      %727 = arith.addi %arg7, %c7_i32 : i32
      %728 = arith.index_cast %727 : i32 to index
      %c0_531 = arith.constant 0 : index
      %c0_532 = arith.constant 0 : index
      %729 = vector.load %arg1[%728, %c0_531, %c0_532] : memref<38x16x38xf32, #tpu.memory_space<vmem>>, vector<1x16x31xf32>
      %730 = vector.shape_cast %729 : vector<1x16x31xf32> to vector<16x31xf32>
      %c56 = arith.constant 56 : index
      %c0_533 = arith.constant 0 : index
      %c0_534 = arith.constant 0 : index
      %731 = vector.load %arg2[%c56, %c0_533, %c0_534] : memref<64x16x31xf32, #tpu.memory_space<vmem>>, vector<1x16x31xf32>
      %732 = vector.shape_cast %731 : vector<1x16x31xf32> to vector<16x31xf32>
      %733 = arith.mulf %730, %732 : vector<16x31xf32>
      %c7_i32_535 = arith.constant 7 : i32
      %734 = arith.addi %arg7, %c7_i32_535 : i32
      %735 = arith.index_cast %734 : i32 to index
      %c0_536 = arith.constant 0 : index
      %c1_537 = arith.constant 1 : index
      %736 = vector.load %arg1[%735, %c0_536, %c1_537] : memref<38x16x38xf32, #tpu.memory_space<vmem>>, vector<1x16x31xf32>
      %737 = vector.shape_cast %736 : vector<1x16x31xf32> to vector<16x31xf32>
      %c57 = arith.constant 57 : index
      %c0_538 = arith.constant 0 : index
      %c0_539 = arith.constant 0 : index
      %738 = vector.load %arg2[%c57, %c0_538, %c0_539] : memref<64x16x31xf32, #tpu.memory_space<vmem>>, vector<1x16x31xf32>
      %739 = vector.shape_cast %738 : vector<1x16x31xf32> to vector<16x31xf32>
      %740 = arith.mulf %737, %739 : vector<16x31xf32>
      %741 = arith.addf %733, %740 : vector<16x31xf32>
      %c7_i32_540 = arith.constant 7 : i32
      %742 = arith.addi %arg7, %c7_i32_540 : i32
      %743 = arith.index_cast %742 : i32 to index
      %c0_541 = arith.constant 0 : index
      %c2_542 = arith.constant 2 : index
      %744 = vector.load %arg1[%743, %c0_541, %c2_542] : memref<38x16x38xf32, #tpu.memory_space<vmem>>, vector<1x16x31xf32>
      %745 = vector.shape_cast %744 : vector<1x16x31xf32> to vector<16x31xf32>
      %c58 = arith.constant 58 : index
      %c0_543 = arith.constant 0 : index
      %c0_544 = arith.constant 0 : index
      %746 = vector.load %arg2[%c58, %c0_543, %c0_544] : memref<64x16x31xf32, #tpu.memory_space<vmem>>, vector<1x16x31xf32>
      %747 = vector.shape_cast %746 : vector<1x16x31xf32> to vector<16x31xf32>
      %748 = arith.mulf %745, %747 : vector<16x31xf32>
      %749 = arith.addf %741, %748 : vector<16x31xf32>
      %c7_i32_545 = arith.constant 7 : i32
      %750 = arith.addi %arg7, %c7_i32_545 : i32
      %751 = arith.index_cast %750 : i32 to index
      %c0_546 = arith.constant 0 : index
      %c3_547 = arith.constant 3 : index
      %752 = vector.load %arg1[%751, %c0_546, %c3_547] : memref<38x16x38xf32, #tpu.memory_space<vmem>>, vector<1x16x31xf32>
      %753 = vector.shape_cast %752 : vector<1x16x31xf32> to vector<16x31xf32>
      %c59 = arith.constant 59 : index
      %c0_548 = arith.constant 0 : index
      %c0_549 = arith.constant 0 : index
      %754 = vector.load %arg2[%c59, %c0_548, %c0_549] : memref<64x16x31xf32, #tpu.memory_space<vmem>>, vector<1x16x31xf32>
      %755 = vector.shape_cast %754 : vector<1x16x31xf32> to vector<16x31xf32>
      %756 = arith.mulf %753, %755 : vector<16x31xf32>
      %757 = arith.addf %749, %756 : vector<16x31xf32>
      %c7_i32_550 = arith.constant 7 : i32
      %758 = arith.addi %arg7, %c7_i32_550 : i32
      %759 = arith.index_cast %758 : i32 to index
      %c0_551 = arith.constant 0 : index
      %c4_552 = arith.constant 4 : index
      %760 = vector.load %arg1[%759, %c0_551, %c4_552] : memref<38x16x38xf32, #tpu.memory_space<vmem>>, vector<1x16x31xf32>
      %761 = vector.shape_cast %760 : vector<1x16x31xf32> to vector<16x31xf32>
      %c60 = arith.constant 60 : index
      %c0_553 = arith.constant 0 : index
      %c0_554 = arith.constant 0 : index
      %762 = vector.load %arg2[%c60, %c0_553, %c0_554] : memref<64x16x31xf32, #tpu.memory_space<vmem>>, vector<1x16x31xf32>
      %763 = vector.shape_cast %762 : vector<1x16x31xf32> to vector<16x31xf32>
      %764 = arith.mulf %761, %763 : vector<16x31xf32>
      %765 = arith.addf %757, %764 : vector<16x31xf32>
      %c7_i32_555 = arith.constant 7 : i32
      %766 = arith.addi %arg7, %c7_i32_555 : i32
      %767 = arith.index_cast %766 : i32 to index
      %c0_556 = arith.constant 0 : index
      %c5_557 = arith.constant 5 : index
      %768 = vector.load %arg1[%767, %c0_556, %c5_557] : memref<38x16x38xf32, #tpu.memory_space<vmem>>, vector<1x16x31xf32>
      %769 = vector.shape_cast %768 : vector<1x16x31xf32> to vector<16x31xf32>
      %c61 = arith.constant 61 : index
      %c0_558 = arith.constant 0 : index
      %c0_559 = arith.constant 0 : index
      %770 = vector.load %arg2[%c61, %c0_558, %c0_559] : memref<64x16x31xf32, #tpu.memory_space<vmem>>, vector<1x16x31xf32>
      %771 = vector.shape_cast %770 : vector<1x16x31xf32> to vector<16x31xf32>
      %772 = arith.mulf %769, %771 : vector<16x31xf32>
      %773 = arith.addf %765, %772 : vector<16x31xf32>
      %c7_i32_560 = arith.constant 7 : i32
      %774 = arith.addi %arg7, %c7_i32_560 : i32
      %775 = arith.index_cast %774 : i32 to index
      %c0_561 = arith.constant 0 : index
      %c6_562 = arith.constant 6 : index
      %776 = vector.load %arg1[%775, %c0_561, %c6_562] : memref<38x16x38xf32, #tpu.memory_space<vmem>>, vector<1x16x31xf32>
      %777 = vector.shape_cast %776 : vector<1x16x31xf32> to vector<16x31xf32>
      %c62 = arith.constant 62 : index
      %c0_563 = arith.constant 0 : index
      %c0_564 = arith.constant 0 : index
      %778 = vector.load %arg2[%c62, %c0_563, %c0_564] : memref<64x16x31xf32, #tpu.memory_space<vmem>>, vector<1x16x31xf32>
      %779 = vector.shape_cast %778 : vector<1x16x31xf32> to vector<16x31xf32>
      %780 = arith.mulf %777, %779 : vector<16x31xf32>
      %781 = arith.addf %773, %780 : vector<16x31xf32>
      %c7_i32_565 = arith.constant 7 : i32
      %782 = arith.addi %arg7, %c7_i32_565 : i32
      %783 = arith.index_cast %782 : i32 to index
      %c0_566 = arith.constant 0 : index
      %c7_567 = arith.constant 7 : index
      %784 = vector.load %arg1[%783, %c0_566, %c7_567] : memref<38x16x38xf32, #tpu.memory_space<vmem>>, vector<1x16x31xf32>
      %785 = vector.shape_cast %784 : vector<1x16x31xf32> to vector<16x31xf32>
      %c63 = arith.constant 63 : index
      %c0_568 = arith.constant 0 : index
      %c0_569 = arith.constant 0 : index
      %786 = vector.load %arg2[%c63, %c0_568, %c0_569] : memref<64x16x31xf32, #tpu.memory_space<vmem>>, vector<1x16x31xf32>
      %787 = vector.shape_cast %786 : vector<1x16x31xf32> to vector<16x31xf32>
      %788 = arith.mulf %785, %787 : vector<16x31xf32>
      %789 = arith.addf %781, %788 : vector<16x31xf32>
      %790 = arith.addf %726, %789 : vector<16x31xf32>
      %cst_570 = arith.constant dense<0.000000e+00> : vector<32x31xf32>
      %791 = tpu.matmul %0, %790, %cst_570 {dimension_numbers = #tpu.dot_dimension_numbers<[1], [0], [0], [1], [0, 0, 1, 1], [], []>} : vector<32x16xf32>, vector<16x31xf32>, vector<32x31xf32> -> vector<32x31xf32>
      %792 = arith.addf %791, %32 : vector<32x31xf32>
      %793 = arith.negf %792 : vector<32x31xf32>
      %794 = math.exp %793 : vector<32x31xf32>
      %cst_571 = arith.constant 1.000000e+00 : f32
      %795 = vector.broadcast %cst_571 : f32 to vector<32x31xf32>
      %796 = arith.addf %795, %794 : vector<32x31xf32>
      %797 = arith.divf %795, %796 : vector<32x31xf32>
      %c10_i32 = arith.constant 10 : i32
      %798 = arith.addi %c10_i32, %arg7 : i32
      %799 = arith.index_cast %798 : i32 to index
      %c0_572 = arith.constant 0 : index
      %c10_573 = arith.constant 10 : index
      %800 = vector.load %arg6[%799, %c0_572, %c10_573] : memref<51x32x51xf32, #tpu.memory_space<vmem>>, vector<1x32x31xf32>
      %801 = vector.shape_cast %800 : vector<1x32x31xf32> to vector<32x31xf32>
      %802 = vector.shape_cast %797 : vector<32x31xf32> to vector<1x32x31xf32>
      tpu.vector_store %arg6[%799, %c0_572, %c10_573], %802 {strides = array<i32>} : memref<51x32x51xf32, #tpu.memory_space<vmem>>, vector<1x32x31xf32>,
    }
    %c31_i32_204 = arith.constant 31 : i32
    return
  }
  func.func @transform_0(%arg0: i32) -> (i32, i32, i32) {
    %c0_i32 = arith.constant 0 : i32
    %c0_i32_0 = arith.constant 0 : i32
    %c0_i32_1 = arith.constant 0 : i32
    %c0_i32_2 = arith.constant 0 : i32
    return %c0_i32, %c0_i32_0, %c0_i32_1 : i32, i32, i32
  }
  func.func @transform_1(%arg0: i32) -> (i32, i32, i32) {
    %c0_i32 = arith.constant 0 : i32
    %c0_i32_0 = arith.constant 0 : i32
    %c0_i32_1 = arith.constant 0 : i32
    %c0_i32_2 = arith.constant 0 : i32
    return %c0_i32, %c0_i32_0, %c0_i32_1 : i32, i32, i32
  }
  func.func @transform_2(%arg0: i32) -> (i32, i32) {
    %c0_i32 = arith.constant 0 : i32
    %c0_i32_0 = arith.constant 0 : i32
    %c0_i32_1 = arith.constant 0 : i32
    return %c0_i32, %c0_i32_0 : i32, i32
  }
  func.func @transform_3(%arg0: i32) -> (i32, i32) {
    %c0_i32 = arith.constant 0 : i32
    %c0_i32_0 = arith.constant 0 : i32
    %c0_i32_1 = arith.constant 0 : i32
    return %c0_i32, %c0_i32_0 : i32, i32
  }
  func.func @transform_4(%arg0: i32) -> (i32, i32) {
    %c0_i32 = arith.constant 0 : i32
    %c0_i32_0 = arith.constant 0 : i32
    %c0_i32_1 = arith.constant 0 : i32
    return %c0_i32, %c0_i32_0 : i32, i32
  }
  func.func @transform_5(%arg0: i32) -> (i32, i32, i32) {
    %c0_i32 = arith.constant 0 : i32
    %c0_i32_0 = arith.constant 0 : i32
    %c0_i32_1 = arith.constant 0 : i32
    %c0_i32_2 = arith.constant 0 : i32
    return %c0_i32, %c0_i32_0, %c0_i32_1 : i32, i32, i32
  }
}

</mosaic_0001>

<bundles_post_ra>
// kernel: model_forward.1
= control target key start
LH: loop header
LB: loop body
LE: loop exit
PB: predicated region body
PF: predicated region fallthrough
CT: control target
= control target key end

     0   :  { %vm37_vm0 = vcmask 130048   ;;  %v2520_v5 = vmov 0   ;;  %s4339_s0 = inlined_call_operand.vmem [shape: f32[38,16,38], index: 0, kind: input, shape index: {}]   ;;  %s4340_s1 = inlined_call_operand.vmem [shape: f32[64,16,31], index: 1, kind: input, shape index: {}]   ;;  %s4341_s2 = inlined_call_operand.vmem [shape: f32[1,16], index: 2, kind: input, shape index: {}]   ;;  %s4342_s3 = inlined_call_operand.vmem [shape: f32[32,16], index: 3, kind: input, shape index: {}]   ;;  %s4343_s4 = inlined_call_operand.vmem [shape: f32[32,1], index: 4, kind: input, shape index: {}]   ;;  %s4344_s5 = inlined_call_operand.hbm [shape: f32[51,32,51], index: 5, kind: output, shape index: {}]  }
   0x1   :  { %v2572_v0 = vld [vmem:[%s4342_s3] sm:$0xff]  ;;  %v2580_v2 = vld [vmem:[%s4342_s3 + $0x10] sm:$0xff]  ;;  %2436 = vset.pattern.permute.xlu1 %v2520_v5  ;;  %v2587_v6 = vld [vmem:[%s4343_s4 + $0x18] sm:$0xff] }
   0x2   :  { %4348 = vst [vmem:[#allocation5_spill] sm:$0xff] %v2572_v0  ;;  %v2437_v1 = vld [vmem:[%s4341_s2] ss:$0 sm:$0xff] }
   0x3   :  { %4349 = vst [vmem:[#allocation6_spill] sm:$0xff] %v2580_v2  ;;  %v33_v3 = vmul.f32 %v2437_v1, %v2572_v0  ;;  %v35_v4 = vmul.f32 %v2437_v1, %v2580_v2 }
   0x4   :  { %10 = vsyncpa [#allocation3], 0  ;;  %v2592_v7 = vld [vmem:[%s4342_s3 + $0x8] sm:$0xff]  ;;  %v2597_v8 = vld [vmem:[%s4342_s3 + $0x18] sm:$0xff]  ;;  %v2235_v9 = vmul.f32 -1.442695, %v2587_v6  ;;  %2434 = vset.pattern.permute.xlu2 %v2520_v5  ;;  %2435 = vset.pattern.permute.xlu0 %v2520_v5 }
   0x5   :  { %4350 = vst [vmem:[#allocation7_spill] sm:$0xff] %v2597_v8  ;;  %v38_v10 = vsel %vm37_vm0, %v33_v3, 0.0  ;;  %v44_v11 = vsel %vm37_vm0, %v35_v4, 0.0  ;;  %v34_v12 = vmul.f32 %v2437_v1, %v2592_v7  ;;  %v36_v13 = vmul.f32 %v2437_v1, %v2597_v8  ;;  %v2609_v28 = vld [vmem:[%s4343_s4] sm:$0xff]  ;;  %v2615_v32 = vld [vmem:[%s4343_s4 + $0x8] sm:$0xff]  ;;  %v28_v34 = vld [vmem:[%s4343_s4 + $0x10] sm:$0xff] }
   0x6   :  { %39 = vadd.xlane.f32.xlu0 %v38_v10  ;;  %45 = vadd.xlane.f32.xlu1 %v44_v11  ;;  %2438 = vpow2.f32 %v2235_v9  ;;  %v2232_v29 = vmul.f32 -1.442695, %v2609_v28  ;;  %v2233_v33 = vmul.f32 -1.442695, %v2615_v32  ;;  %v2234_v35 = vmul.f32 -1.442695, %v28_v34 }
   0x7   :  { %v41_v14 = vsel %vm37_vm0, %v34_v12, 0.0  ;;  %v47_v15 = vsel %vm37_vm0, %v36_v13, 0.0  ;;  %s3314_s4 = smov 0  }
   0xc   :  { %v2439_v16 = vpop.eup %2438 }
   0xd   :  { %v69_v17 = vadd.f32 1.0, %v2439_v16 }
   0xe   :  { %42 = vadd.xlane.f32.xlu0 %v41_v14  ;;  %48 = vadd.xlane.f32.xlu1 %v47_v15 }
   0xf   :  { %2440 = vrcp.f32 %v69_v17  ;;  %vm120_vm1 = vweird.f32 %v69_v17  ;;  %v126_v22 = vand.u32 2147483648, %v69_v17  ;;  %v124_v24 = vand.u32 2147483647, %v69_v17 }
  0x10   :  { %2442 = vpow2.f32 %v2232_v29 }
  0x11   :  { %v127_v25 = vor.u32 1.1754944e-38, %v126_v22  ;;  %vm125_vm4 = vcmp.eq.f32.partialorder %v124_v24, 8.507059e+37 }
  0x15   :  { %v2441_v18 = vpop.eup %2440 }
  0x16   :  { %v116_v19 = vmul.f32 %v2441_v18, %v69_v17  ;;  %vm121_vm2 = vweird.f32 %v2441_v18  ;;  %v2443_v30 = vpop.eup %2442 }
  0x17   :  { %vm122_vm3 = vmor %vm120_vm1, %vm121_vm2  ;;  %v66_v31 = vadd.f32 1.0, %v2443_v30 }
  0x18   :  { %v117_v20 = vsub.f32 1.0, %v116_v19 }
  0x19   :  { %2444 = vrcp.f32 %v66_v31  ;;  %v81_v44 = vand.u32 2147483648, %v66_v31  ;;  %vm75_vm5 = vweird.f32 %v66_v31  ;;  %v79_v46 = vand.u32 2147483647, %v66_v31 }
  0x1a   :  { %v118_v21 = vmul.f32 %v2441_v18, %v117_v20  ;;  %2446 = vpow2.f32 %v2233_v33 }
  0x1b   :  { %2448 = vpow2.f32 %v2234_v35  ;;  %v82_v48 = vor.u32 1.1754944e-38, %v81_v44  ;;  %vm80_vm8 = vcmp.eq.f32.partialorder %v79_v46, 8.507059e+37 }
  0x1c   :  { %v119_v23 = vadd.f32 %v2441_v18, %v118_v21 }
  0x1e   :  { %v123_v26 = vsel %vm122_vm3, %v2441_v18, %v119_v23 }
  0x1f   :  { %v128_v27 = vsel %vm125_vm4, %v127_v25, %v123_v26  ;;  %v2445_v36 = vpop.eup %2444 }
  0x20   :  { %v2447_v37 = vpop.eup %2446  ;;  %v71_v39 = vmul.f32 %v2445_v36, %v66_v31  ;;  %vm76_vm6 = vweird.f32 %v2445_v36 }
  0x21   :  { %v67_v38 = vadd.f32 1.0, %v2447_v37  ;;  %v2449_v40 = vpop.eup %2448  ;;  %vm77_vm7 = vmor %vm75_vm5, %vm76_vm6 }
  0x22   :  { %v72_v41 = vsub.f32 1.0, %v71_v39  ;;  %v68_v42 = vadd.f32 1.0, %v2449_v40 }
  0x23   :  { %2450 = vrcp.f32 %v67_v38  ;;  %v96_v56 = vand.u32 2147483648, %v67_v38  ;;  %vm90_vm9 = vweird.f32 %v67_v38  ;;  %v94_v58 = vand.u32 2147483647, %v67_v38 }
  0x24   :  { %v73_v43 = vmul.f32 %v2445_v36, %v72_v41  ;;  %2452 = vrcp.f32 %v68_v42  ;;  %v111_v1 = vand.u32 2147483648, %v68_v42  ;;  %vm105_vm13 = vweird.f32 %v68_v42 }
  0x25   :  { %v97_v59 = vor.u32 1.1754944e-38, %v96_v56  ;;  %vm95_vm12 = vcmp.eq.f32.partialorder %v94_v58, 8.507059e+37  ;;  %v109_v3 = vand.u32 2147483647, %v68_v42 }
  0x26   :  { %v74_v45 = vadd.f32 %v2445_v36, %v73_v43  ;;  %v112_v5 = vor.u32 1.1754944e-38, %v111_v1 }
  0x27   :  { %223 = vperm.xlu1 %2436, %v128_v27   ;;  %vm110_vm1 = vcmp.eq.f32.partialorder %v109_v3, 8.507059e+37 }
  0x28   :  { %v78_v49 = vsel %vm77_vm7, %v2445_v36, %v74_v45 }
  0x29   :  { %v2451_v47 = vpop.eup %2450  ;;  %v83_v51 = vsel %vm80_vm8, %v82_v48, %v78_v49 }
  0x2a   :  { %v86_v50 = vmul.f32 %v2451_v47, %v67_v38  ;;  %208 = vperm.xlu2 %2434, %v83_v51   ;;  %v2453_v53 = vpop.eup %2452  ;;  %vm91_vm10 = vweird.f32 %v2451_v47 }
  0x2b   :  { %v101_v55 = vmul.f32 %v2453_v53, %v68_v42  ;;  %vm92_vm11 = vmor %vm90_vm9, %vm91_vm10  ;;  %vm106_vm14 = vweird.f32 %v2453_v53 }
  0x2c   :  { %v87_v52 = vsub.f32 1.0, %v86_v50  ;;  %vm107_vm15 = vmor %vm105_vm13, %vm106_vm14  ;;  %vm275_vm14 = vcmask 416768  }
  0x2d   :  { %v102_v60 = vsub.f32 1.0, %v101_v55 }
  0x2e   :  { %v88_v54 = vmul.f32 %v2451_v47, %v87_v52 }
  0x2f   :  { %v103_v63 = vmul.f32 %v2453_v53, %v102_v60 }
  0x30   :  { %v89_v57 = vadd.f32 %v2451_v47, %v88_v54 }
  0x31   :  { %v104_v4 = vadd.f32 %v2453_v53, %v103_v63 }
  0x32   :  { %v93_v61 = vsel %vm92_vm11, %v2451_v47, %v89_v57 }
  0x33   :  { %v98_v62 = vsel %vm95_vm12, %v97_v59, %v93_v61  ;;  %v108_v9 = vsel %vm107_vm15, %v2453_v53, %v104_v4 }
  0x34   :  { %213 = vperm.xlu2 %2434, %v98_v62   ;;  %v113_v10 = vsel %vm110_vm1, %v112_v5, %v108_v9 }
  0x35   :  { %218 = vperm.xlu0 %2435, %v113_v10  }
  0x79   :  { %v40_v11 = vpop.xlane.xlu0 %39  ;;  %v46_v12 = vpop.xlane.xlu1 %45 }
  0x7a   :  { %v50_v13 = vadd.f32 %v40_v11, %v2609_v28  ;;  %v52_v14 = vadd.f32 %v46_v12, %v28_v34 }
  0x7c   :  { %v2236_v15 = vmul.f32 -1.442695, %v50_v13  ;;  %v2238_v16 = vmul.f32 -1.442695, %v52_v14  ;;  %257 = vperm.xlu1 %2436, %v50_v13  }
  0x7e   :  { %2454 = vpow2.f32 %v2236_v15 }
  0x7f   :  { %2456 = vpow2.f32 %v2238_v16 }
  0x81   :  { %v43_v17 = vpop.xlane.xlu0 %42  ;;  %v49_v18 = vpop.xlane.xlu1 %48 }
  0x82   :  { %v2623_v19 = vadd.f32 %v43_v17, %v2615_v32  ;;  %v53_v20 = vadd.f32 %v49_v18, %v2587_v6 }
  0x84   :  { %v2455_v21 = vpop.eup %2454  ;;  %v2237_v22 = vmul.f32 -1.442695, %v2623_v19  ;;  %267 = vperm.xlu1 %2436, %v52_v14   ;;  %272 = vperm.xlu0 %2435, %v53_v20   ;;  %v2239_v25 = vmul.f32 -1.442695, %v53_v20  ;;  %v209_v12 = vpop.permute.xlu2 %208  ;;  %v246_v14 = vlaneseq }
  0x85   :  { %v2457_v23 = vpop.eup %2456  ;;  %v142_v24 = vadd.f32 1.0, %v2455_v21  ;;  %276 = vst.msk [vmem:[#allocation2] sm:$0xff] %vm275_vm14, %v209_v12 }
  0x86   :  { %2458 = vpow2.f32 %v2237_v22  ;;  %v144_v26 = vadd.f32 1.0, %v2457_v23  ;;  %281 = vst.msk [vmem:[#allocation2 + $0x640] sm:$0xff] %vm275_vm14, %v209_v12  ;;  %v247_v15 = vand.u32 127, %v246_v14 }
  0x87   :  { %2460 = vrcp.f32 %v142_v24  ;;  %v157_v34 = vand.u32 2147483648, %v142_v24  ;;  %v155_v36 = vand.u32 2147483647, %v142_v24  ;;  %vm151_vm3 = vweird.f32 %v142_v24 }
  0x88   :  { %2462 = vpow2.f32 %v2239_v25  ;;  %vm181_vm10 = vweird.f32 %v144_v26  ;;  %v187_v56 = vand.u32 2147483648, %v144_v26  ;;  %v185_v58 = vand.u32 2147483647, %v144_v26 }
  0x89   :  { %2464 = vrcp.f32 %v144_v26  ;;  %v158_v40 = vor.u32 1.1754944e-38, %v157_v34  ;;  %vm156_vm5 = vcmp.eq.f32.partialorder %v155_v36, 8.507059e+37 }
  0x8a   :  { %v188_v60 = vor.u32 1.1754944e-38, %v187_v56  ;;  %vm186_vm13 = vcmp.eq.f32.partialorder %v185_v58, 8.507059e+37 }
  0x8c   :  { %v2459_v27 = vpop.eup %2458 }
  0x8d   :  { %v2461_v28 = vpop.eup %2460  ;;  %v143_v29 = vadd.f32 1.0, %v2459_v27 }
  0x8e   :  { %v147_v30 = vmul.f32 %v2461_v28, %v142_v24  ;;  %v2463_v31 = vpop.eup %2462  ;;  %vm152_vm2 = vweird.f32 %v2461_v28  ;;  %v2636_v13 = vpop.permute.xlu2 %213 }
  0x8f   :  { %2466 = vrcp.f32 %v143_v29  ;;  %v145_v6 = vadd.f32 1.0, %v2463_v31  ;;  %v2465_v33 = vpop.eup %2464  ;;  %vm153_vm4 = vmor %vm151_vm3, %vm152_vm2  ;;  %v172_v47 = vand.u32 2147483648, %v143_v29  ;;  %v170_v49 = vand.u32 2147483647, %v143_v29  ;;  %277 = vst.msk [vmem:[#allocation2 + $0x8] sm:$0xff] %vm275_vm14, %v2636_v13 }
  0x90   :  { %v148_v32 = vsub.f32 1.0, %v147_v30  ;;  %v177_v38 = vmul.f32 %v2465_v33, %v144_v26  ;;  %vm166_vm7 = vweird.f32 %v143_v29  ;;  %vm182_vm11 = vweird.f32 %v2465_v33  ;;  %282 = vst.msk [vmem:[#allocation2 + $0x648] sm:$0xff] %vm275_vm14, %v2636_v13 }
  0x91   :  { %2468 = vrcp.f32 %v145_v6  ;;  %v173_v53 = vor.u32 1.1754944e-38, %v172_v47  ;;  %vm171_vm9 = vcmp.eq.f32.partialorder %v170_v49, 8.507059e+37  ;;  %vm183_vm12 = vmor %vm181_vm10, %vm182_vm11  ;;  %vm196_vm15 = vweird.f32 %v145_v6 }
  0x92   :  { %v149_v35 = vmul.f32 %v2461_v28, %v148_v32  ;;  %v178_v45 = vsub.f32 1.0, %v177_v38  ;;  %v202_v3 = vand.u32 2147483648, %v145_v6  ;;  %v200_v5 = vand.u32 2147483647, %v145_v6 }
  0x94   :  { %v150_v37 = vadd.f32 %v2461_v28, %v149_v35  ;;  %v179_v51 = vmul.f32 %v2465_v33, %v178_v45  ;;  %v203_v9 = vor.u32 1.1754944e-38, %v202_v3  ;;  %vm201_vm3 = vcmp.eq.f32.partialorder %v200_v5, 8.507059e+37 }
  0x95   :  { %v2467_v39 = vpop.eup %2466 }
  0x96   :  { %v154_v41 = vsel %vm153_vm4, %v2461_v28, %v150_v37  ;;  %v162_v42 = vmul.f32 %v2467_v39, %v143_v29  ;;  %vm167_vm6 = vweird.f32 %v2467_v39  ;;  %v180_v57 = vadd.f32 %v2465_v33, %v179_v51 }
  0x97   :  { %v159_v43 = vsel %vm156_vm5, %v158_v40, %v154_v41  ;;  %v2469_v46 = vpop.eup %2468  ;;  %vm168_vm8 = vmor %vm166_vm7, %vm167_vm6  ;;  %vm248_vm4 = vcmp.eq.s32.totalorder %v247_v15, 0  ;;  %vm249_vm5 = vcmp.eq.s32.totalorder %v247_v15, 50  ;;  %vm331_vm7 = vcmask 80896  }
  0x98   :  { %228 = vperm.xlu2 %2434, %v159_v43   ;;  %v163_v44 = vsub.f32 1.0, %v162_v42  ;;  %v192_v52 = vmul.f32 %v2469_v46, %v145_v6  ;;  %v184_v61 = vsel %vm183_vm12, %v2465_v33, %v180_v57  ;;  %vm197_vm1 = vweird.f32 %v2469_v46  ;;  %vm2644_vm6 = vmor %vm248_vm4, %vm249_vm5 }
  0x99   :  { %v2627_v63 = vpop.permute.xlu1 %223  ;;  %v189_v1 = vsel %vm186_vm13, %v188_v60, %v184_v61  ;;  %vm198_vm2 = vmor %vm196_vm15, %vm197_vm1 }
  0x9a   :  { %v164_v48 = vmul.f32 %v2467_v39, %v163_v44  ;;  %v193_v59 = vsub.f32 1.0, %v192_v52  ;;  %279 = vst.msk [vmem:[#allocation2 + $0x18] sm:$0xff] %vm275_vm14, %v2627_v63 }
  0x9b   :  { %284 = vst.msk [vmem:[#allocation2 + $0x658] sm:$0xff] %vm275_vm14, %v2627_v63 }
  0x9c   :  { %v165_v50 = vadd.f32 %v2467_v39, %v164_v48  ;;  %v194_v62 = vmul.f32 %v2469_v46, %v193_v59 }
  0x9e   :  { %v169_v54 = vsel %vm168_vm8, %v2467_v39, %v165_v50  ;;  %v195_v4 = vadd.f32 %v2469_v46, %v194_v62  ;;  %vm336_vm8 = vcmask 417096  }
  0x9f   :  { %v174_v55 = vsel %vm171_vm9, %v173_v53, %v169_v54 }
  0xa0   :  { %233 = vperm.xlu2 %2434, %v174_v55   ;;  %v199_v10 = vsel %vm198_vm2, %v2469_v46, %v195_v4 }
  0xa1   :  { %v204_v11 = vsel %vm201_vm3, %v203_v9, %v199_v10 }
  0xa7   :  { %v219_v24 = vpop.permute.xlu0 %218 }
  0xa8   :  { %238 = vperm.xlu2 %2434, %v189_v1   ;;  %278 = vst.msk [vmem:[#allocation2 + $0x10] sm:$0xff] %vm275_vm14, %v219_v24 }
  0xa9   :  { %283 = vst.msk [vmem:[#allocation2 + $0x650] sm:$0xff] %vm275_vm14, %v219_v24 }
  0xb0   :  { %243 = vperm.xlu2 %2434, %v204_v11  }
  0xb8   :  { %262 = vperm.xlu2 %2434, %v2623_v19  }
  0xee   :  { %v2642_v16 = vpop.permute.xlu1 %257 }
  0xef   :  { %4351 = vst [vmem:[#allocation8_spill] sm:$0xff] %v2642_v16 }
  0xf2   :  { %v229_v18 = vpop.permute.xlu2 %228 }
  0xf3   :  { %v2650_v19 = vsel %vm2644_vm6, %v209_v12, %v229_v18 }
  0xf4   :  { %286 = vst.msk [vmem:[#allocation2 + $0x20] sm:$0xff] %vm275_vm14, %v2650_v19 }
  0xf5   :  { %291 = vst.msk [vmem:[#allocation2 + $0x40] sm:$0xff] %vm275_vm14, %v2650_v19 }
  0xf6   :  { %296 = vst.msk [vmem:[#allocation2 + $0x60] sm:$0xff] %vm275_vm14, %v2650_v19  ;;  %v2913_v22 = vpop.permute.xlu1 %267  ;;  %v3081_v26 = vpop.permute.xlu0 %272 }
  0xf7   :  { %301 = vst.msk [vmem:[#allocation2 + $0x80] sm:$0xff] %vm275_vm14, %v2650_v19 }
  0xf8   :  { %306 = vst.msk [vmem:[#allocation2 + $0xa0] sm:$0xff] %vm275_vm14, %v2650_v19 }
  0xf9   :  { %311 = vst.msk [vmem:[#allocation2 + $0xc0] sm:$0xff] %vm275_vm14, %v2650_v19 }
  0xfa   :  { %316 = vst.msk [vmem:[#allocation2 + $0xe0] sm:$0xff] %vm275_vm14, %v2650_v19  ;;  %v234_v20 = vpop.permute.xlu2 %233 }
  0xfb   :  { %321 = vst.msk [vmem:[#allocation2 + $0x100] sm:$0xff] %vm275_vm14, %v2650_v19  ;;  %v2811_v21 = vsel %vm2644_vm6, %v2636_v13, %v234_v20 }
  0xfc   :  { %326 = vst.msk [vmem:[#allocation2 + $0x120] sm:$0xff] %vm275_vm14, %v2650_v19 }
  0xfd   :  { %332 = vst.msk [vmem:[#allocation2 + $0x140] sm:$0xff] %vm331_vm7, %v2650_v19 }
  0xfe   :  { %337 = vst.msk [vmem:[#allocation2 + $0x140] sm:$0xff] %vm336_vm8, %v2650_v19 }
  0xff   :  { %342 = vst.msk [vmem:[#allocation2 + $0x160] sm:$0xff] %vm331_vm7, %v2650_v19 }
 0x100   :  { %346 = vst.msk [vmem:[#allocation2 + $0x160] sm:$0xff] %vm336_vm8, %v2650_v19 }
 0x101   :  { %351 = vst.msk [vmem:[#allocation2 + $0x180] sm:$0xff] %vm331_vm7, %v2650_v19 }
 0x102   :  { %355 = vst.msk [vmem:[#allocation2 + $0x180] sm:$0xff] %vm336_vm8, %v2650_v19  ;;  %v239_v23 = vpop.permute.xlu2 %238 }
 0x103   :  { %360 = vst.msk [vmem:[#allocation2 + $0x1a0] sm:$0xff] %vm331_vm7, %v2650_v19  ;;  %v2981_v25 = vsel %vm2644_vm6, %v219_v24, %v239_v23 }
 0x104   :  { %364 = vst.msk [vmem:[#allocation2 + $0x1a0] sm:$0xff] %vm336_vm8, %v2650_v19 }
 0x105   :  { %369 = vst.msk [vmem:[#allocation2 + $0x1c0] sm:$0xff] %vm331_vm7, %v2650_v19 }
 0x106   :  { %373 = vst.msk [vmem:[#allocation2 + $0x1c0] sm:$0xff] %vm336_vm8, %v2650_v19 }
 0x107   :  { %378 = vst.msk [vmem:[#allocation2 + $0x1e0] sm:$0xff] %vm331_vm7, %v2650_v19 }
 0x108   :  { %382 = vst.msk [vmem:[#allocation2 + $0x1e0] sm:$0xff] %vm336_vm8, %v2650_v19 }
 0x109   :  { %387 = vst.msk [vmem:[#allocation2 + $0x200] sm:$0xff] %vm331_vm7, %v2650_v19 }
 0x10a   :  { %391 = vst.msk [vmem:[#allocation2 + $0x200] sm:$0xff] %vm336_vm8, %v2650_v19  ;;  %v244_v27 = vpop.permute.xlu2 %243 }
 0x10b   :  { %396 = vst.msk [vmem:[#allocation2 + $0x220] sm:$0xff] %vm331_vm7, %v2650_v19  ;;  %v3146_v28 = vsel %vm2644_vm6, %v2627_v63, %v244_v27 }
 0x10c   :  { %400 = vst.msk [vmem:[#allocation2 + $0x220] sm:$0xff] %vm336_vm8, %v2650_v19 }
 0x10d   :  { %405 = vst.msk [vmem:[#allocation2 + $0x240] sm:$0xff] %vm331_vm7, %v2650_v19 }
 0x10e   :  { %409 = vst.msk [vmem:[#allocation2 + $0x240] sm:$0xff] %vm336_vm8, %v2650_v19 }
 0x10f   :  { %414 = vst.msk [vmem:[#allocation2 + $0x260] sm:$0xff] %vm331_vm7, %v2650_v19 }
 0x110   :  { %418 = vst.msk [vmem:[#allocation2 + $0x260] sm:$0xff] %vm336_vm8, %v2650_v19 }
 0x111   :  { %423 = vst.msk [vmem:[#allocation2 + $0x280] sm:$0xff] %vm331_vm7, %v2650_v19 }
 0x112   :  { %427 = vst.msk [vmem:[#allocation2 + $0x280] sm:$0xff] %vm336_vm8, %v2650_v19  ;;  %v3248_v29 = vpop.permute.xlu2 %262 }
 0x113   :  { %432 = vst.msk [vmem:[#allocation2 + $0x2a0] sm:$0xff] %vm331_vm7, %v2650_v19 }
 0x114   :  { %436 = vst.msk [vmem:[#allocation2 + $0x2a0] sm:$0xff] %vm336_vm8, %v2650_v19 }
 0x115   :  { %441 = vst.msk [vmem:[#allocation2 + $0x2c0] sm:$0xff] %vm331_vm7, %v2650_v19 }
 0x116   :  { %445 = vst.msk [vmem:[#allocation2 + $0x2c0] sm:$0xff] %vm336_vm8, %v2650_v19 }
 0x117   :  { %450 = vst.msk [vmem:[#allocation2 + $0x2e0] sm:$0xff] %vm331_vm7, %v2650_v19 }
 0x118   :  { %454 = vst.msk [vmem:[#allocation2 + $0x2e0] sm:$0xff] %vm336_vm8, %v2650_v19 }
 0x119   :  { %459 = vst.msk [vmem:[#allocation2 + $0x300] sm:$0xff] %vm331_vm7, %v2650_v19 }
 0x11a   :  { %463 = vst.msk [vmem:[#allocation2 + $0x300] sm:$0xff] %vm336_vm8, %v2650_v19 }
 0x11b   :  { %468 = vst.msk [vmem:[#allocation2 + $0x320] sm:$0xff] %vm331_vm7, %v2650_v19 }
 0x11c   :  { %472 = vst.msk [vmem:[#allocation2 + $0x320] sm:$0xff] %vm336_vm8, %v2650_v19 }
 0x11d   :  { %477 = vst.msk [vmem:[#allocation2 + $0x340] sm:$0xff] %vm331_vm7, %v2650_v19 }
 0x11e   :  { %481 = vst.msk [vmem:[#allocation2 + $0x340] sm:$0xff] %vm336_vm8, %v2650_v19 }
 0x11f   :  { %486 = vst.msk [vmem:[#allocation2 + $0x360] sm:$0xff] %vm331_vm7, %v2650_v19 }
 0x120   :  { %490 = vst.msk [vmem:[#allocation2 + $0x360] sm:$0xff] %vm336_vm8, %v2650_v19 }
 0x121   :  { %495 = vst.msk [vmem:[#allocation2 + $0x380] sm:$0xff] %vm331_vm7, %v2650_v19 }
 0x122   :  { %499 = vst.msk [vmem:[#allocation2 + $0x380] sm:$0xff] %vm336_vm8, %v2650_v19 }
 0x123   :  { %504 = vst.msk [vmem:[#allocation2 + $0x3a0] sm:$0xff] %vm331_vm7, %v2650_v19 }
 0x124   :  { %508 = vst.msk [vmem:[#allocation2 + $0x3a0] sm:$0xff] %vm336_vm8, %v2650_v19 }
 0x125   :  { %513 = vst.msk [vmem:[#allocation2 + $0x3c0] sm:$0xff] %vm331_vm7, %v2650_v19 }
 0x126   :  { %517 = vst.msk [vmem:[#allocation2 + $0x3c0] sm:$0xff] %vm336_vm8, %v2650_v19 }
 0x127   :  { %522 = vst.msk [vmem:[#allocation2 + $0x3e0] sm:$0xff] %vm331_vm7, %v2650_v19 }
 0x128   :  { %526 = vst.msk [vmem:[#allocation2 + $0x3e0] sm:$0xff] %vm336_vm8, %v2650_v19 }
 0x129   :  { %531 = vst.msk [vmem:[#allocation2 + $0x400] sm:$0xff] %vm331_vm7, %v2650_v19 }
 0x12a   :  { %535 = vst.msk [vmem:[#allocation2 + $0x400] sm:$0xff] %vm336_vm8, %v2650_v19 }
 0x12b   :  { %540 = vst.msk [vmem:[#allocation2 + $0x420] sm:$0xff] %vm331_vm7, %v2650_v19 }
 0x12c   :  { %544 = vst.msk [vmem:[#allocation2 + $0x420] sm:$0xff] %vm336_vm8, %v2650_v19 }
 0x12d   :  { %549 = vst.msk [vmem:[#allocation2 + $0x440] sm:$0xff] %vm331_vm7, %v2650_v19 }
 0x12e   :  { %553 = vst.msk [vmem:[#allocation2 + $0x440] sm:$0xff] %vm336_vm8, %v2650_v19 }
 0x12f   :  { %558 = vst.msk [vmem:[#allocation2 + $0x460] sm:$0xff] %vm331_vm7, %v2650_v19 }
 0x130   :  { %562 = vst.msk [vmem:[#allocation2 + $0x460] sm:$0xff] %vm336_vm8, %v2650_v19 }
 0x131   :  { %567 = vst.msk [vmem:[#allocation2 + $0x480] sm:$0xff] %vm331_vm7, %v2650_v19 }
 0x132   :  { %571 = vst.msk [vmem:[#allocation2 + $0x480] sm:$0xff] %vm336_vm8, %v2650_v19 }
 0x133   :  { %576 = vst.msk [vmem:[#allocation2 + $0x4a0] sm:$0xff] %vm331_vm7, %v2650_v19 }
 0x134   :  { %580 = vst.msk [vmem:[#allocation2 + $0x4a0] sm:$0xff] %vm336_vm8, %v2650_v19 }
 0x135   :  { %585 = vst.msk [vmem:[#allocation2 + $0x4c0] sm:$0xff] %vm331_vm7, %v2650_v19 }
 0x136   :  { %589 = vst.msk [vmem:[#allocation2 + $0x4c0] sm:$0xff] %vm336_vm8, %v2650_v19 }
 0x137   :  { %594 = vst.msk [vmem:[#allocation2 + $0x4e0] sm:$0xff] %vm331_vm7, %v2650_v19 }
 0x138   :  { %598 = vst.msk [vmem:[#allocation2 + $0x4e0] sm:$0xff] %vm336_vm8, %v2650_v19 }
 0x139   :  { %603 = vst.msk [vmem:[#allocation2 + $0x500] sm:$0xff] %vm331_vm7, %v2650_v19 }
 0x13a   :  { %607 = vst.msk [vmem:[#allocation2 + $0x500] sm:$0xff] %vm336_vm8, %v2650_v19 }
 0x13b   :  { %612 = vst.msk [vmem:[#allocation2 + $0x520] sm:$0xff] %vm275_vm14, %v2650_v19 }
 0x13c   :  { %617 = vst.msk [vmem:[#allocation2 + $0x540] sm:$0xff] %vm275_vm14, %v2650_v19 }
 0x13d   :  { %622 = vst.msk [vmem:[#allocation2 + $0x560] sm:$0xff] %vm275_vm14, %v2650_v19 }
 0x13e   :  { %627 = vst.msk [vmem:[#allocation2 + $0x580] sm:$0xff] %vm275_vm14, %v2650_v19 }
 0x13f   :  { %632 = vst.msk [vmem:[#allocation2 + $0x5a0] sm:$0xff] %vm275_vm14, %v2650_v19 }
 0x140   :  { %637 = vst.msk [vmem:[#allocation2 + $0x5c0] sm:$0xff] %vm275_vm14, %v2650_v19 }
 0x141   :  { %642 = vst.msk [vmem:[#allocation2 + $0x5e0] sm:$0xff] %vm275_vm14, %v2650_v19 }
 0x142   :  { %647 = vst.msk [vmem:[#allocation2 + $0x600] sm:$0xff] %vm275_vm14, %v2650_v19 }
 0x143   :  { %652 = vst.msk [vmem:[#allocation2 + $0x620] sm:$0xff] %vm275_vm14, %v2650_v19 }
 0x144   :  { %287 = vst.msk [vmem:[#allocation2 + $0x28] sm:$0xff] %vm275_vm14, %v2811_v21 }
 0x145   :  { %292 = vst.msk [vmem:[#allocation2 + $0x48] sm:$0xff] %vm275_vm14, %v2811_v21 }
 0x146   :  { %297 = vst.msk [vmem:[#allocation2 + $0x68] sm:$0xff] %vm275_vm14, %v2811_v21 }
 0x147   :  { %302 = vst.msk [vmem:[#allocation2 + $0x88] sm:$0xff] %vm275_vm14, %v2811_v21 }
 0x148   :  { %307 = vst.msk [vmem:[#allocation2 + $0xa8] sm:$0xff] %vm275_vm14, %v2811_v21 }
 0x149   :  { %312 = vst.msk [vmem:[#allocation2 + $0xc8] sm:$0xff] %vm275_vm14, %v2811_v21 }
 0x14a   :  { %317 = vst.msk [vmem:[#allocation2 + $0xe8] sm:$0xff] %vm275_vm14, %v2811_v21 }
 0x14b   :  { %322 = vst.msk [vmem:[#allocation2 + $0x108] sm:$0xff] %vm275_vm14, %v2811_v21 }
 0x14c   :  { %327 = vst.msk [vmem:[#allocation2 + $0x128] sm:$0xff] %vm275_vm14, %v2811_v21 }
 0x14d   :  { %333 = vst.msk [vmem:[#allocation2 + $0x148] sm:$0xff] %vm331_vm7, %v2811_v21 }
 0x14e   :  { %338 = vst.msk [vmem:[#allocation2 + $0x148] sm:$0xff] %vm336_vm8, %v2811_v21 }
 0x14f   :  { %343 = vst.msk [vmem:[#allocation2 + $0x168] sm:$0xff] %vm331_vm7, %v2811_v21 }
 0x150   :  { %347 = vst.msk [vmem:[#allocation2 + $0x168] sm:$0xff] %vm336_vm8, %v2811_v21 }
 0x151   :  { %352 = vst.msk [vmem:[#allocation2 + $0x188] sm:$0xff] %vm331_vm7, %v2811_v21 }
 0x152   :  { %356 = vst.msk [vmem:[#allocation2 + $0x188] sm:$0xff] %vm336_vm8, %v2811_v21 }
 0x153   :  { %361 = vst.msk [vmem:[#allocation2 + $0x1a8] sm:$0xff] %vm331_vm7, %v2811_v21 }
 0x154   :  { %365 = vst.msk [vmem:[#allocation2 + $0x1a8] sm:$0xff] %vm336_vm8, %v2811_v21 }
 0x155   :  { %370 = vst.msk [vmem:[#allocation2 + $0x1c8] sm:$0xff] %vm331_vm7, %v2811_v21 }
 0x156   :  { %374 = vst.msk [vmem:[#allocation2 + $0x1c8] sm:$0xff] %vm336_vm8, %v2811_v21 }
 0x157   :  { %379 = vst.msk [vmem:[#allocation2 + $0x1e8] sm:$0xff] %vm331_vm7, %v2811_v21 }
 0x158   :  { %383 = vst.msk [vmem:[#allocation2 + $0x1e8] sm:$0xff] %vm336_vm8, %v2811_v21 }
 0x159   :  { %388 = vst.msk [vmem:[#allocation2 + $0x208] sm:$0xff] %vm331_vm7, %v2811_v21 }
 0x15a   :  { %392 = vst.msk [vmem:[#allocation2 + $0x208] sm:$0xff] %vm336_vm8, %v2811_v21 }
 0x15b   :  { %397 = vst.msk [vmem:[#allocation2 + $0x228] sm:$0xff] %vm331_vm7, %v2811_v21 }
 0x15c   :  { %401 = vst.msk [vmem:[#allocation2 + $0x228] sm:$0xff] %vm336_vm8, %v2811_v21 }
 0x15d   :  { %406 = vst.msk [vmem:[#allocation2 + $0x248] sm:$0xff] %vm331_vm7, %v2811_v21 }
 0x15e   :  { %410 = vst.msk [vmem:[#allocation2 + $0x248] sm:$0xff] %vm336_vm8, %v2811_v21 }
 0x15f   :  { %415 = vst.msk [vmem:[#allocation2 + $0x268] sm:$0xff] %vm331_vm7, %v2811_v21 }
 0x160   :  { %419 = vst.msk [vmem:[#allocation2 + $0x268] sm:$0xff] %vm336_vm8, %v2811_v21 }
 0x161   :  { %424 = vst.msk [vmem:[#allocation2 + $0x288] sm:$0xff] %vm331_vm7, %v2811_v21 }
 0x162   :  { %428 = vst.msk [vmem:[#allocation2 + $0x288] sm:$0xff] %vm336_vm8, %v2811_v21 }
 0x163   :  { %433 = vst.msk [vmem:[#allocation2 + $0x2a8] sm:$0xff] %vm331_vm7, %v2811_v21 }
 0x164   :  { %437 = vst.msk [vmem:[#allocation2 + $0x2a8] sm:$0xff] %vm336_vm8, %v2811_v21 }
 0x165   :  { %442 = vst.msk [vmem:[#allocation2 + $0x2c8] sm:$0xff] %vm331_vm7, %v2811_v21 }
 0x166   :  { %446 = vst.msk [vmem:[#allocation2 + $0x2c8] sm:$0xff] %vm336_vm8, %v2811_v21 }
 0x167   :  { %451 = vst.msk [vmem:[#allocation2 + $0x2e8] sm:$0xff] %vm331_vm7, %v2811_v21 }
 0x168   :  { %455 = vst.msk [vmem:[#allocation2 + $0x2e8] sm:$0xff] %vm336_vm8, %v2811_v21 }
 0x169   :  { %460 = vst.msk [vmem:[#allocation2 + $0x308] sm:$0xff] %vm331_vm7, %v2811_v21 }
 0x16a   :  { %464 = vst.msk [vmem:[#allocation2 + $0x308] sm:$0xff] %vm336_vm8, %v2811_v21 }
 0x16b   :  { %469 = vst.msk [vmem:[#allocation2 + $0x328] sm:$0xff] %vm331_vm7, %v2811_v21 }
 0x16c   :  { %473 = vst.msk [vmem:[#allocation2 + $0x328] sm:$0xff] %vm336_vm8, %v2811_v21 }
 0x16d   :  { %478 = vst.msk [vmem:[#allocation2 + $0x348] sm:$0xff] %vm331_vm7, %v2811_v21 }
 0x16e   :  { %482 = vst.msk [vmem:[#allocation2 + $0x348] sm:$0xff] %vm336_vm8, %v2811_v21 }
 0x16f   :  { %487 = vst.msk [vmem:[#allocation2 + $0x368] sm:$0xff] %vm331_vm7, %v2811_v21 }
 0x170   :  { %491 = vst.msk [vmem:[#allocation2 + $0x368] sm:$0xff] %vm336_vm8, %v2811_v21 }
 0x171   :  { %496 = vst.msk [vmem:[#allocation2 + $0x388] sm:$0xff] %vm331_vm7, %v2811_v21 }
 0x172   :  { %500 = vst.msk [vmem:[#allocation2 + $0x388] sm:$0xff] %vm336_vm8, %v2811_v21 }
 0x173   :  { %505 = vst.msk [vmem:[#allocation2 + $0x3a8] sm:$0xff] %vm331_vm7, %v2811_v21 }
 0x174   :  { %4354 = vst [vmem:[#allocation9_spill] sm:$0xff] %v2913_v22 }
 0x175   :  { %509 = vst.msk [vmem:[#allocation2 + $0x3a8] sm:$0xff] %vm336_vm8, %v2811_v21 }
 0x176   :  { %514 = vst.msk [vmem:[#allocation2 + $0x3c8] sm:$0xff] %vm331_vm7, %v2811_v21 }
 0x177   :  { %518 = vst.msk [vmem:[#allocation2 + $0x3c8] sm:$0xff] %vm336_vm8, %v2811_v21 }
 0x178   :  { %523 = vst.msk [vmem:[#allocation2 + $0x3e8] sm:$0xff] %vm331_vm7, %v2811_v21 }
 0x179   :  { %527 = vst.msk [vmem:[#allocation2 + $0x3e8] sm:$0xff] %vm336_vm8, %v2811_v21 }
 0x17a   :  { %532 = vst.msk [vmem:[#allocation2 + $0x408] sm:$0xff] %vm331_vm7, %v2811_v21 }
 0x17b   :  { %536 = vst.msk [vmem:[#allocation2 + $0x408] sm:$0xff] %vm336_vm8, %v2811_v21 }
 0x17c   :  { %541 = vst.msk [vmem:[#allocation2 + $0x428] sm:$0xff] %vm331_vm7, %v2811_v21 }
 0x17d   :  { %545 = vst.msk [vmem:[#allocation2 + $0x428] sm:$0xff] %vm336_vm8, %v2811_v21 }
 0x17e   :  { %550 = vst.msk [vmem:[#allocation2 + $0x448] sm:$0xff] %vm331_vm7, %v2811_v21 }
 0x17f   :  { %554 = vst.msk [vmem:[#allocation2 + $0x448] sm:$0xff] %vm336_vm8, %v2811_v21 }
 0x180   :  { %559 = vst.msk [vmem:[#allocation2 + $0x468] sm:$0xff] %vm331_vm7, %v2811_v21 }
 0x181   :  { %563 = vst.msk [vmem:[#allocation2 + $0x468] sm:$0xff] %vm336_vm8, %v2811_v21 }
 0x182   :  { %568 = vst.msk [vmem:[#allocation2 + $0x488] sm:$0xff] %vm331_vm7, %v2811_v21 }
 0x183   :  { %572 = vst.msk [vmem:[#allocation2 + $0x488] sm:$0xff] %vm336_vm8, %v2811_v21 }
 0x184   :  { %577 = vst.msk [vmem:[#allocation2 + $0x4a8] sm:$0xff] %vm331_vm7, %v2811_v21 }
 0x185   :  { %581 = vst.msk [vmem:[#allocation2 + $0x4a8] sm:$0xff] %vm336_vm8, %v2811_v21 }
 0x186   :  { %586 = vst.msk [vmem:[#allocation2 + $0x4c8] sm:$0xff] %vm331_vm7, %v2811_v21 }
 0x187   :  { %590 = vst.msk [vmem:[#allocation2 + $0x4c8] sm:$0xff] %vm336_vm8, %v2811_v21 }
 0x188   :  { %595 = vst.msk [vmem:[#allocation2 + $0x4e8] sm:$0xff] %vm331_vm7, %v2811_v21 }
 0x189   :  { %599 = vst.msk [vmem:[#allocation2 + $0x4e8] sm:$0xff] %vm336_vm8, %v2811_v21 }
 0x18a   :  { %604 = vst.msk [vmem:[#allocation2 + $0x508] sm:$0xff] %vm331_vm7, %v2811_v21 }
 0x18b   :  { %608 = vst.msk [vmem:[#allocation2 + $0x508] sm:$0xff] %vm336_vm8, %v2811_v21 }
 0x18c   :  { %613 = vst.msk [vmem:[#allocation2 + $0x528] sm:$0xff] %vm275_vm14, %v2811_v21 }
 0x18d   :  { %618 = vst.msk [vmem:[#allocation2 + $0x548] sm:$0xff] %vm275_vm14, %v2811_v21 }
 0x18e   :  { %623 = vst.msk [vmem:[#allocation2 + $0x568] sm:$0xff] %vm275_vm14, %v2811_v21 }
 0x18f   :  { %628 = vst.msk [vmem:[#allocation2 + $0x588] sm:$0xff] %vm275_vm14, %v2811_v21 }
 0x190   :  { %633 = vst.msk [vmem:[#allocation2 + $0x5a8] sm:$0xff] %vm275_vm14, %v2811_v21 }
 0x191   :  { %638 = vst.msk [vmem:[#allocation2 + $0x5c8] sm:$0xff] %vm275_vm14, %v2811_v21 }
 0x192   :  { %643 = vst.msk [vmem:[#allocation2 + $0x5e8] sm:$0xff] %vm275_vm14, %v2811_v21 }
 0x193   :  { %648 = vst.msk [vmem:[#allocation2 + $0x608] sm:$0xff] %vm275_vm14, %v2811_v21 }
 0x194   :  { %653 = vst.msk [vmem:[#allocation2 + $0x628] sm:$0xff] %vm275_vm14, %v2811_v21 }
 0x195   :  { %288 = vst.msk [vmem:[#allocation2 + $0x30] sm:$0xff] %vm275_vm14, %v2981_v25 }
 0x196   :  { %293 = vst.msk [vmem:[#allocation2 + $0x50] sm:$0xff] %vm275_vm14, %v2981_v25 }
 0x197   :  { %298 = vst.msk [vmem:[#allocation2 + $0x70] sm:$0xff] %vm275_vm14, %v2981_v25 }
 0x198   :  { %303 = vst.msk [vmem:[#allocation2 + $0x90] sm:$0xff] %vm275_vm14, %v2981_v25 }
 0x199   :  { %308 = vst.msk [vmem:[#allocation2 + $0xb0] sm:$0xff] %vm275_vm14, %v2981_v25 }
 0x19a   :  { %313 = vst.msk [vmem:[#allocation2 + $0xd0] sm:$0xff] %vm275_vm14, %v2981_v25 }
 0x19b   :  { %318 = vst.msk [vmem:[#allocation2 + $0xf0] sm:$0xff] %vm275_vm14, %v2981_v25 }
 0x19c   :  { %323 = vst.msk [vmem:[#allocation2 + $0x110] sm:$0xff] %vm275_vm14, %v2981_v25 }
 0x19d   :  { %328 = vst.msk [vmem:[#allocation2 + $0x130] sm:$0xff] %vm275_vm14, %v2981_v25 }
 0x19e   :  { %334 = vst.msk [vmem:[#allocation2 + $0x150] sm:$0xff] %vm331_vm7, %v2981_v25 }
 0x19f   :  { %339 = vst.msk [vmem:[#allocation2 + $0x150] sm:$0xff] %vm336_vm8, %v2981_v25 }
 0x1a0   :  { %344 = vst.msk [vmem:[#allocation2 + $0x170] sm:$0xff] %vm331_vm7, %v2981_v25 }
 0x1a1   :  { %348 = vst.msk [vmem:[#allocation2 + $0x170] sm:$0xff] %vm336_vm8, %v2981_v25 }
 0x1a2   :  { %353 = vst.msk [vmem:[#allocation2 + $0x190] sm:$0xff] %vm331_vm7, %v2981_v25 }
 0x1a3   :  { %357 = vst.msk [vmem:[#allocation2 + $0x190] sm:$0xff] %vm336_vm8, %v2981_v25 }
 0x1a4   :  { %362 = vst.msk [vmem:[#allocation2 + $0x1b0] sm:$0xff] %vm331_vm7, %v2981_v25 }
 0x1a5   :  { %366 = vst.msk [vmem:[#allocation2 + $0x1b0] sm:$0xff] %vm336_vm8, %v2981_v25 }
 0x1a6   :  { %371 = vst.msk [vmem:[#allocation2 + $0x1d0] sm:$0xff] %vm331_vm7, %v2981_v25 }
 0x1a7   :  { %375 = vst.msk [vmem:[#allocation2 + $0x1d0] sm:$0xff] %vm336_vm8, %v2981_v25 }
 0x1a8   :  { %380 = vst.msk [vmem:[#allocation2 + $0x1f0] sm:$0xff] %vm331_vm7, %v2981_v25 }
 0x1a9   :  { %384 = vst.msk [vmem:[#allocation2 + $0x1f0] sm:$0xff] %vm336_vm8, %v2981_v25 }
 0x1aa   :  { %389 = vst.msk [vmem:[#allocation2 + $0x210] sm:$0xff] %vm331_vm7, %v2981_v25 }
 0x1ab   :  { %393 = vst.msk [vmem:[#allocation2 + $0x210] sm:$0xff] %vm336_vm8, %v2981_v25 }
 0x1ac   :  { %398 = vst.msk [vmem:[#allocation2 + $0x230] sm:$0xff] %vm331_vm7, %v2981_v25 }
 0x1ad   :  { %402 = vst.msk [vmem:[#allocation2 + $0x230] sm:$0xff] %vm336_vm8, %v2981_v25 }
 0x1ae   :  { %407 = vst.msk [vmem:[#allocation2 + $0x250] sm:$0xff] %vm331_vm7, %v2981_v25 }
 0x1af   :  { %411 = vst.msk [vmem:[#allocation2 + $0x250] sm:$0xff] %vm336_vm8, %v2981_v25 }
 0x1b0   :  { %416 = vst.msk [vmem:[#allocation2 + $0x270] sm:$0xff] %vm331_vm7, %v2981_v25 }
 0x1b1   :  { %420 = vst.msk [vmem:[#allocation2 + $0x270] sm:$0xff] %vm336_vm8, %v2981_v25 }
 0x1b2   :  { %425 = vst.msk [vmem:[#allocation2 + $0x290] sm:$0xff] %vm331_vm7, %v2981_v25 }
 0x1b3   :  { %429 = vst.msk [vmem:[#allocation2 + $0x290] sm:$0xff] %vm336_vm8, %v2981_v25 }
 0x1b4   :  { %434 = vst.msk [vmem:[#allocation2 + $0x2b0] sm:$0xff] %vm331_vm7, %v2981_v25 }
 0x1b5   :  { %438 = vst.msk [vmem:[#allocation2 + $0x2b0] sm:$0xff] %vm336_vm8, %v2981_v25 }
 0x1b6   :  { %443 = vst.msk [vmem:[#allocation2 + $0x2d0] sm:$0xff] %vm331_vm7, %v2981_v25 }
 0x1b7   :  { %447 = vst.msk [vmem:[#allocation2 + $0x2d0] sm:$0xff] %vm336_vm8, %v2981_v25 }
 0x1b8   :  { %452 = vst.msk [vmem:[#allocation2 + $0x2f0] sm:$0xff] %vm331_vm7, %v2981_v25 }
 0x1b9   :  { %456 = vst.msk [vmem:[#allocation2 + $0x2f0] sm:$0xff] %vm336_vm8, %v2981_v25 }
 0x1ba   :  { %461 = vst.msk [vmem:[#allocation2 + $0x310] sm:$0xff] %vm331_vm7, %v2981_v25 }
 0x1bb   :  { %465 = vst.msk [vmem:[#allocation2 + $0x310] sm:$0xff] %vm336_vm8, %v2981_v25 }
 0x1bc   :  { %470 = vst.msk [vmem:[#allocation2 + $0x330] sm:$0xff] %vm331_vm7, %v2981_v25 }
 0x1bd   :  { %474 = vst.msk [vmem:[#allocation2 + $0x330] sm:$0xff] %vm336_vm8, %v2981_v25 }
 0x1be   :  { %479 = vst.msk [vmem:[#allocation2 + $0x350] sm:$0xff] %vm331_vm7, %v2981_v25 }
 0x1bf   :  { %483 = vst.msk [vmem:[#allocation2 + $0x350] sm:$0xff] %vm336_vm8, %v2981_v25 }
 0x1c0   :  { %488 = vst.msk [vmem:[#allocation2 + $0x370] sm:$0xff] %vm331_vm7, %v2981_v25 }
 0x1c1   :  { %492 = vst.msk [vmem:[#allocation2 + $0x370] sm:$0xff] %vm336_vm8, %v2981_v25 }
 0x1c2   :  { %497 = vst.msk [vmem:[#allocation2 + $0x390] sm:$0xff] %vm331_vm7, %v2981_v25 }
 0x1c3   :  { %501 = vst.msk [vmem:[#allocation2 + $0x390] sm:$0xff] %vm336_vm8, %v2981_v25 }
 0x1c4   :  { %506 = vst.msk [vmem:[#allocation2 + $0x3b0] sm:$0xff] %vm331_vm7, %v2981_v25 }
 0x1c5   :  { %4355 = vst [vmem:[#allocation10_spill] sm:$0xff] %v3081_v26 }
 0x1c6   :  { %510 = vst.msk [vmem:[#allocation2 + $0x3b0] sm:$0xff] %vm336_vm8, %v2981_v25 }
 0x1c7   :  { %515 = vst.msk [vmem:[#allocation2 + $0x3d0] sm:$0xff] %vm331_vm7, %v2981_v25 }
 0x1c8   :  { %519 = vst.msk [vmem:[#allocation2 + $0x3d0] sm:$0xff] %vm336_vm8, %v2981_v25 }
 0x1c9   :  { %524 = vst.msk [vmem:[#allocation2 + $0x3f0] sm:$0xff] %vm331_vm7, %v2981_v25 }
 0x1ca   :  { %528 = vst.msk [vmem:[#allocation2 + $0x3f0] sm:$0xff] %vm336_vm8, %v2981_v25 }
 0x1cb   :  { %533 = vst.msk [vmem:[#allocation2 + $0x410] sm:$0xff] %vm331_vm7, %v2981_v25 }
 0x1cc   :  { %537 = vst.msk [vmem:[#allocation2 + $0x410] sm:$0xff] %vm336_vm8, %v2981_v25 }
 0x1cd   :  { %542 = vst.msk [vmem:[#allocation2 + $0x430] sm:$0xff] %vm331_vm7, %v2981_v25 }
 0x1ce   :  { %546 = vst.msk [vmem:[#allocation2 + $0x430] sm:$0xff] %vm336_vm8, %v2981_v25 }
 0x1cf   :  { %551 = vst.msk [vmem:[#allocation2 + $0x450] sm:$0xff] %vm331_vm7, %v2981_v25 }
 0x1d0   :  { %555 = vst.msk [vmem:[#allocation2 + $0x450] sm:$0xff] %vm336_vm8, %v2981_v25 }
 0x1d1   :  { %560 = vst.msk [vmem:[#allocation2 + $0x470] sm:$0xff] %vm331_vm7, %v2981_v25 }
 0x1d2   :  { %564 = vst.msk [vmem:[#allocation2 + $0x470] sm:$0xff] %vm336_vm8, %v2981_v25 }
 0x1d3   :  { %569 = vst.msk [vmem:[#allocation2 + $0x490] sm:$0xff] %vm331_vm7, %v2981_v25 }
 0x1d4   :  { %573 = vst.msk [vmem:[#allocation2 + $0x490] sm:$0xff] %vm336_vm8, %v2981_v25 }
 0x1d5   :  { %578 = vst.msk [vmem:[#allocation2 + $0x4b0] sm:$0xff] %vm331_vm7, %v2981_v25 }
 0x1d6   :  { %582 = vst.msk [vmem:[#allocation2 + $0x4b0] sm:$0xff] %vm336_vm8, %v2981_v25 }
 0x1d7   :  { %587 = vst.msk [vmem:[#allocation2 + $0x4d0] sm:$0xff] %vm331_vm7, %v2981_v25 }
 0x1d8   :  { %591 = vst.msk [vmem:[#allocation2 + $0x4d0] sm:$0xff] %vm336_vm8, %v2981_v25 }
 0x1d9   :  { %596 = vst.msk [vmem:[#allocation2 + $0x4f0] sm:$0xff] %vm331_vm7, %v2981_v25 }
 0x1da   :  { %600 = vst.msk [vmem:[#allocation2 + $0x4f0] sm:$0xff] %vm336_vm8, %v2981_v25 }
 0x1db   :  { %605 = vst.msk [vmem:[#allocation2 + $0x510] sm:$0xff] %vm331_vm7, %v2981_v25 }
 0x1dc   :  { %609 = vst.msk [vmem:[#allocation2 + $0x510] sm:$0xff] %vm336_vm8, %v2981_v25 }
 0x1dd   :  { %614 = vst.msk [vmem:[#allocation2 + $0x530] sm:$0xff] %vm275_vm14, %v2981_v25 }
 0x1de   :  { %619 = vst.msk [vmem:[#allocation2 + $0x550] sm:$0xff] %vm275_vm14, %v2981_v25 }
 0x1df   :  { %624 = vst.msk [vmem:[#allocation2 + $0x570] sm:$0xff] %vm275_vm14, %v2981_v25 }
 0x1e0   :  { %629 = vst.msk [vmem:[#allocation2 + $0x590] sm:$0xff] %vm275_vm14, %v2981_v25 }
 0x1e1   :  { %634 = vst.msk [vmem:[#allocation2 + $0x5b0] sm:$0xff] %vm275_vm14, %v2981_v25 }
 0x1e2   :  { %639 = vst.msk [vmem:[#allocation2 + $0x5d0] sm:$0xff] %vm275_vm14, %v2981_v25 }
 0x1e3   :  { %644 = vst.msk [vmem:[#allocation2 + $0x5f0] sm:$0xff] %vm275_vm14, %v2981_v25 }
 0x1e4   :  { %649 = vst.msk [vmem:[#allocation2 + $0x610] sm:$0xff] %vm275_vm14, %v2981_v25 }
 0x1e5   :  { %654 = vst.msk [vmem:[#allocation2 + $0x630] sm:$0xff] %vm275_vm14, %v2981_v25 }
 0x1e6   :  { %289 = vst.msk [vmem:[#allocation2 + $0x38] sm:$0xff] %vm275_vm14, %v3146_v28 }
 0x1e7   :  { %294 = vst.msk [vmem:[#allocation2 + $0x58] sm:$0xff] %vm275_vm14, %v3146_v28 }
 0x1e8   :  { %299 = vst.msk [vmem:[#allocation2 + $0x78] sm:$0xff] %vm275_vm14, %v3146_v28 }
 0x1e9   :  { %304 = vst.msk [vmem:[#allocation2 + $0x98] sm:$0xff] %vm275_vm14, %v3146_v28 }
 0x1ea   :  { %309 = vst.msk [vmem:[#allocation2 + $0xb8] sm:$0xff] %vm275_vm14, %v3146_v28 }
 0x1eb   :  { %314 = vst.msk [vmem:[#allocation2 + $0xd8] sm:$0xff] %vm275_vm14, %v3146_v28 }
 0x1ec   :  { %319 = vst.msk [vmem:[#allocation2 + $0xf8] sm:$0xff] %vm275_vm14, %v3146_v28 }
 0x1ed   :  { %324 = vst.msk [vmem:[#allocation2 + $0x118] sm:$0xff] %vm275_vm14, %v3146_v28 }
 0x1ee   :  { %329 = vst.msk [vmem:[#allocation2 + $0x138] sm:$0xff] %vm275_vm14, %v3146_v28 }
 0x1ef   :  { %335 = vst.msk [vmem:[#allocation2 + $0x158] sm:$0xff] %vm331_vm7, %v3146_v28 }
 0x1f0   :  { %340 = vst.msk [vmem:[#allocation2 + $0x158] sm:$0xff] %vm336_vm8, %v3146_v28 }
 0x1f1   :  { %345 = vst.msk [vmem:[#allocation2 + $0x178] sm:$0xff] %vm331_vm7, %v3146_v28 }
 0x1f2   :  { %349 = vst.msk [vmem:[#allocation2 + $0x178] sm:$0xff] %vm336_vm8, %v3146_v28 }
 0x1f3   :  { %354 = vst.msk [vmem:[#allocation2 + $0x198] sm:$0xff] %vm331_vm7, %v3146_v28 }
 0x1f4   :  { %358 = vst.msk [vmem:[#allocation2 + $0x198] sm:$0xff] %vm336_vm8, %v3146_v28 }
 0x1f5   :  { %363 = vst.msk [vmem:[#allocation2 + $0x1b8] sm:$0xff] %vm331_vm7, %v3146_v28 }
 0x1f6   :  { %367 = vst.msk [vmem:[#allocation2 + $0x1b8] sm:$0xff] %vm336_vm8, %v3146_v28 }
 0x1f7   :  { %372 = vst.msk [vmem:[#allocation2 + $0x1d8] sm:$0xff] %vm331_vm7, %v3146_v28 }
 0x1f8   :  { %376 = vst.msk [vmem:[#allocation2 + $0x1d8] sm:$0xff] %vm336_vm8, %v3146_v28 }
 0x1f9   :  { %381 = vst.msk [vmem:[#allocation2 + $0x1f8] sm:$0xff] %vm331_vm7, %v3146_v28 }
 0x1fa   :  { %385 = vst.msk [vmem:[#allocation2 + $0x1f8] sm:$0xff] %vm336_vm8, %v3146_v28 }
 0x1fb   :  { %390 = vst.msk [vmem:[#allocation2 + $0x218] sm:$0xff] %vm331_vm7, %v3146_v28 }
 0x1fc   :  { %394 = vst.msk [vmem:[#allocation2 + $0x218] sm:$0xff] %vm336_vm8, %v3146_v28 }
 0x1fd   :  { %399 = vst.msk [vmem:[#allocation2 + $0x238] sm:$0xff] %vm331_vm7, %v3146_v28 }
 0x1fe   :  { %403 = vst.msk [vmem:[#allocation2 + $0x238] sm:$0xff] %vm336_vm8, %v3146_v28 }
 0x1ff   :  { %408 = vst.msk [vmem:[#allocation2 + $0x258] sm:$0xff] %vm331_vm7, %v3146_v28 }
 0x200   :  { %412 = vst.msk [vmem:[#allocation2 + $0x258] sm:$0xff] %vm336_vm8, %v3146_v28 }
 0x201   :  { %417 = vst.msk [vmem:[#allocation2 + $0x278] sm:$0xff] %vm331_vm7, %v3146_v28 }
 0x202   :  { %421 = vst.msk [vmem:[#allocation2 + $0x278] sm:$0xff] %vm336_vm8, %v3146_v28 }
 0x203   :  { %426 = vst.msk [vmem:[#allocation2 + $0x298] sm:$0xff] %vm331_vm7, %v3146_v28 }
 0x204   :  { %430 = vst.msk [vmem:[#allocation2 + $0x298] sm:$0xff] %vm336_vm8, %v3146_v28 }
 0x205   :  { %435 = vst.msk [vmem:[#allocation2 + $0x2b8] sm:$0xff] %vm331_vm7, %v3146_v28 }
 0x206   :  { %439 = vst.msk [vmem:[#allocation2 + $0x2b8] sm:$0xff] %vm336_vm8, %v3146_v28 }
 0x207   :  { %444 = vst.msk [vmem:[#allocation2 + $0x2d8] sm:$0xff] %vm331_vm7, %v3146_v28 }
 0x208   :  { %448 = vst.msk [vmem:[#allocation2 + $0x2d8] sm:$0xff] %vm336_vm8, %v3146_v28 }
 0x209   :  { %453 = vst.msk [vmem:[#allocation2 + $0x2f8] sm:$0xff] %vm331_vm7, %v3146_v28 }
 0x20a   :  { %457 = vst.msk [vmem:[#allocation2 + $0x2f8] sm:$0xff] %vm336_vm8, %v3146_v28 }
 0x20b   :  { %462 = vst.msk [vmem:[#allocation2 + $0x318] sm:$0xff] %vm331_vm7, %v3146_v28 }
 0x20c   :  { %466 = vst.msk [vmem:[#allocation2 + $0x318] sm:$0xff] %vm336_vm8, %v3146_v28 }
 0x20d   :  { %471 = vst.msk [vmem:[#allocation2 + $0x338] sm:$0xff] %vm331_vm7, %v3146_v28 }
 0x20e   :  { %475 = vst.msk [vmem:[#allocation2 + $0x338] sm:$0xff] %vm336_vm8, %v3146_v28 }
 0x20f   :  { %480 = vst.msk [vmem:[#allocation2 + $0x358] sm:$0xff] %vm331_vm7, %v3146_v28 }
 0x210   :  { %484 = vst.msk [vmem:[#allocation2 + $0x358] sm:$0xff] %vm336_vm8, %v3146_v28 }
 0x211   :  { %489 = vst.msk [vmem:[#allocation2 + $0x378] sm:$0xff] %vm331_vm7, %v3146_v28 }
 0x212   :  { %493 = vst.msk [vmem:[#allocation2 + $0x378] sm:$0xff] %vm336_vm8, %v3146_v28 }
 0x213   :  { %498 = vst.msk [vmem:[#allocation2 + $0x398] sm:$0xff] %vm331_vm7, %v3146_v28 }
 0x214   :  { %502 = vst.msk [vmem:[#allocation2 + $0x398] sm:$0xff] %vm336_vm8, %v3146_v28 }
 0x215   :  { %507 = vst.msk [vmem:[#allocation2 + $0x3b8] sm:$0xff] %vm331_vm7, %v3146_v28 }
 0x216   :  { %4356 = vst [vmem:[#allocation11_spill] sm:$0xff] %v3248_v29 }
 0x217   :  { %511 = vst.msk [vmem:[#allocation2 + $0x3b8] sm:$0xff] %vm336_vm8, %v3146_v28 }
 0x218   :  { %516 = vst.msk [vmem:[#allocation2 + $0x3d8] sm:$0xff] %vm331_vm7, %v3146_v28 }
 0x219   :  { %520 = vst.msk [vmem:[#allocation2 + $0x3d8] sm:$0xff] %vm336_vm8, %v3146_v28 }
 0x21a   :  { %525 = vst.msk [vmem:[#allocation2 + $0x3f8] sm:$0xff] %vm331_vm7, %v3146_v28 }
 0x21b   :  { %529 = vst.msk [vmem:[#allocation2 + $0x3f8] sm:$0xff] %vm336_vm8, %v3146_v28 }
 0x21c   :  { %534 = vst.msk [vmem:[#allocation2 + $0x418] sm:$0xff] %vm331_vm7, %v3146_v28 }
 0x21d   :  { %538 = vst.msk [vmem:[#allocation2 + $0x418] sm:$0xff] %vm336_vm8, %v3146_v28 }
 0x21e   :  { %543 = vst.msk [vmem:[#allocation2 + $0x438] sm:$0xff] %vm331_vm7, %v3146_v28 }
 0x21f   :  { %547 = vst.msk [vmem:[#allocation2 + $0x438] sm:$0xff] %vm336_vm8, %v3146_v28 }
 0x220   :  { %552 = vst.msk [vmem:[#allocation2 + $0x458] sm:$0xff] %vm331_vm7, %v3146_v28 }
 0x221   :  { %556 = vst.msk [vmem:[#allocation2 + $0x458] sm:$0xff] %vm336_vm8, %v3146_v28 }
 0x222   :  { %561 = vst.msk [vmem:[#allocation2 + $0x478] sm:$0xff] %vm331_vm7, %v3146_v28 }
 0x223   :  { %565 = vst.msk [vmem:[#allocation2 + $0x478] sm:$0xff] %vm336_vm8, %v3146_v28 }
 0x224   :  { %570 = vst.msk [vmem:[#allocation2 + $0x498] sm:$0xff] %vm331_vm7, %v3146_v28 }
 0x225   :  { %574 = vst.msk [vmem:[#allocation2 + $0x498] sm:$0xff] %vm336_vm8, %v3146_v28 }
 0x226   :  { %579 = vst.msk [vmem:[#allocation2 + $0x4b8] sm:$0xff] %vm331_vm7, %v3146_v28 }
 0x227   :  { %583 = vst.msk [vmem:[#allocation2 + $0x4b8] sm:$0xff] %vm336_vm8, %v3146_v28 }
 0x228   :  { %588 = vst.msk [vmem:[#allocation2 + $0x4d8] sm:$0xff] %vm331_vm7, %v3146_v28 }
 0x229   :  { %592 = vst.msk [vmem:[#allocation2 + $0x4d8] sm:$0xff] %vm336_vm8, %v3146_v28 }
 0x22a   :  { %597 = vst.msk [vmem:[#allocation2 + $0x4f8] sm:$0xff] %vm331_vm7, %v3146_v28 }
 0x22b   :  { %601 = vst.msk [vmem:[#allocation2 + $0x4f8] sm:$0xff] %vm336_vm8, %v3146_v28 }
 0x22c   :  { %606 = vst.msk [vmem:[#allocation2 + $0x518] sm:$0xff] %vm331_vm7, %v3146_v28 }
 0x22d   :  { %610 = vst.msk [vmem:[#allocation2 + $0x518] sm:$0xff] %vm336_vm8, %v3146_v28 }
 0x22e   :  { %615 = vst.msk [vmem:[#allocation2 + $0x538] sm:$0xff] %vm275_vm14, %v3146_v28 }
 0x22f   :  { %620 = vst.msk [vmem:[#allocation2 + $0x558] sm:$0xff] %vm275_vm14, %v3146_v28 }
 0x230   :  { %625 = vst.msk [vmem:[#allocation2 + $0x578] sm:$0xff] %vm275_vm14, %v3146_v28 }
 0x231   :  { %630 = vst.msk [vmem:[#allocation2 + $0x598] sm:$0xff] %vm275_vm14, %v3146_v28 }
 0x232   :  { %635 = vst.msk [vmem:[#allocation2 + $0x5b8] sm:$0xff] %vm275_vm14, %v3146_v28 }
 0x233   :  { %640 = vst.msk [vmem:[#allocation2 + $0x5d8] sm:$0xff] %vm275_vm14, %v3146_v28 }
 0x234   :  { %645 = vst.msk [vmem:[#allocation2 + $0x5f8] sm:$0xff] %vm275_vm14, %v3146_v28 }
 0x235   :  { %650 = vst.msk [vmem:[#allocation2 + $0x618] sm:$0xff] %vm275_vm14, %v3146_v28 }
 0x236   :  { %655 = vst.msk [vmem:[#allocation2 + $0x638] sm:$0xff] %vm275_vm14, %v3146_v28 }
 0x237 LB: > { %v2248_v30 = vld [vmem:[%s4340_s1 + $0x48] sm:$0xff]  ;;  %v2241_v31 = vld [vmem:[%s4340_s1 + $0x10] sm:$0xff]  ;;  %s2521_s13 = smov 4   ;;  %s2522_s14 = smov 1   ;;  %v2243_v6 = vld [vmem:[%s4340_s1 + $0x20] sm:$0xff]  ;;  %s2518_s4 = sphi %s3314_s4, %s661_s4  }
 0x238   : > { %746 = vrot.lane.b32.xlu1 %v2248_v30, %s2521_s13  ;;  %675 = vrot.lane.b32.xlu0 %v2241_v31, %s2522_s14  ;;  %s2523_s17 = smov 2   ;;  %v2249_v32 = vld [vmem:[%s4340_s1 + $0x50] sm:$0xff]  ;;  %v2242_v33 = vld [vmem:[%s4340_s1 + $0x18] sm:$0xff]  ;;  %s2524_s24 = smov 5  }
 0x239   : > { %698 = vrot.lane.b32.xlu2 %v2243_v6, %s2523_s17  ;;  %v2244_v34 = vld [vmem:[%s4340_s1 + $0x28] sm:$0xff]  ;;  %v2254_v35 = vld [vmem:[%s4340_s1 + $0x78] sm:$0xff]  ;;  %v2245_v37 = vld [vmem:[%s4340_s1 + $0x30] sm:$0xff]  ;;  %s2525_s29 = smov 7   ;;  %s2526_s30 = smov 3  }
 0x23a   : > { %v2246_v36 = vld [vmem:[%s4340_s1 + $0x38] sm:$0xff]  ;;  %v2260_v38 = vld [vmem:[%s4340_s1 + $0x90] sm:$0xff]  ;;  %v2247_v39 = vld [vmem:[%s4340_s1 + $0x40] sm:$0xff]  ;;  %s2527_s21 = smov 6   ;;  %s2240_s16 = sshll.u32 %s2518_s4, 4 }
 0x23b   : > { %v2250_v40 = vld [vmem:[%s4340_s1 + $0x58] sm:$0xff]  ;;  %v2252_v42 = vld [vmem:[%s4340_s1 + $0x68] sm:$0xff]  ;;  %v2251_v43 = vld [vmem:[%s4340_s1 + $0x60] sm:$0xff]  ;;  %s3415_s20 = scalar_lea.vmem %s4339_s0, %s2240_s16  ;;  %s2528_s22 = smov 126  }
 0x23c   : > { %v2265_v41 = vld [vmem:[%s4340_s1 + $0xb8] sm:$0xff]  ;;  %v2266_v44 = vld [vmem:[%s4340_s1 + $0xc0] sm:$0xff]  ;;  %v2253_v45 = vld [vmem:[%s4340_s1 + $0x70] sm:$0xff]  ;;  %s2529_s23 = smov 124   ;;  %s2530_s25 = smov 127  }
 0x23d   : > { %v2261_v46 = vld [vmem:[%s4340_s1 + $0x98] sm:$0xff]  ;;  %v2263_v47 = vld [vmem:[%s4340_s1 + $0xa8] sm:$0xff]  ;;  %v2262_v48 = vld [vmem:[%s4340_s1 + $0xa0] sm:$0xff]  ;;  %s2531_s26 = smov 123   ;;  %s2532_s2 = smov 121  }
 0x23e   : > { %v2264_v49 = vld [vmem:[%s4340_s1 + $0xb0] sm:$0xff]  ;;  %v2267_v50 = vld [vmem:[%s4340_s1 + $0xc8] sm:$0xff]  ;;  %v3418_v52 = vld [vmem:[%s3415_s20] sm:$0xff]  ;;  %s2533_s27 = smov 125   ;;  %s2534_s28 = smov 122  }
 0x23f   : > { %v2268_v51 = vld [vmem:[%s4340_s1 + $0xd0] sm:$0xff]  ;;  %v3423_v56 = vld [vmem:[%s3415_s20 + $0x8] sm:$0xff]  ;;  %v3449_v21 = vld [vmem:[%s3415_s20 + $0x18] sm:$0xff]  ;;  %s2535_s18 = smov 10  }
 0x240   : > { %767 = vrot.lane.b32.xlu1 %v2249_v32, %s2524_s24  ;;  %677 = vrot.lane.b32.xlu0 %v2242_v33, %s2522_s14  ;;  %v3440_v13 = vld [vmem:[%s3415_s20 + $0x10] sm:$0xff] }
 0x241   : > { %700 = vrot.lane.b32.xlu2 %v2244_v34, %s2523_s17 }
 0x248   : > { %815 = vrot.lane.b32.xlu1 %v2254_v35, %s2525_s29  ;;  %723 = vrot.lane.b32.xlu0 %v2246_v36, %s2526_s30  ;;  %v2269_v36 = vld [vmem:[%s4340_s1 + $0xd8] sm:$0xff] }
 0x249   : > { %721 = vrot.lane.b32.xlu2 %v2245_v37, %s2526_s30 }
 0x250   : > { %846 = vrot.lane.b32.xlu1 %v2260_v38, %s2522_s14  ;;  %744 = vrot.lane.b32.xlu0 %v2247_v39, %s2521_s13 }
 0x251   : > { %769 = vrot.lane.b32.xlu2 %v2250_v40, %s2524_s24 }
 0x258   : > { %894 = vrot.lane.b32.xlu1 %v2265_v41, %s2526_s30  ;;  %792 = vrot.lane.b32.xlu0 %v2252_v42, %s2527_s21  ;;  %v2270_v41 = vld [vmem:[%s4340_s1 + $0xe0] sm:$0xff] }
 0x259   : > { %790 = vrot.lane.b32.xlu2 %v2251_v43, %s2527_s21 }
 0x260   : > { %915 = vrot.lane.b32.xlu1 %v2266_v44, %s2521_s13  ;;  %813 = vrot.lane.b32.xlu0 %v2253_v45, %s2525_s29 }
 0x261   : > { %848 = vrot.lane.b32.xlu2 %v2261_v46, %s2522_s14 }
 0x268   : > { %871 = vrot.lane.b32.xlu0 %v2263_v47, %s2523_s17 }
 0x269   : > { %869 = vrot.lane.b32.xlu2 %v2262_v48, %s2523_s17  ;;  %v2271_v48 = vld [vmem:[%s4340_s1 + $0xe8] sm:$0xff] }
 0x270   : > { %892 = vrot.lane.b32.xlu0 %v2264_v49, %s2526_s30  ;;  %v2272_v49 = vld [vmem:[%s4340_s1 + $0xf0] sm:$0xff] }
 0x271   : > { %917 = vrot.lane.b32.xlu2 %v2267_v50, %s2521_s13 }
 0x279   : > { %938 = vrot.lane.b32.xlu2 %v2268_v51, %s2524_s24 }
 0x293   : > { %v699_v53 = vpop.permute.xlu2 %698 }
 0x294   : > { %v704_v54 = vmul.f32 %v699_v53, %v3418_v52 }
 0x296   : > { %708 = vrot.lane.b32.xlu0 %v704_v54, %s2528_s22 }
 0x29b   : > { %v701_v55 = vpop.permute.xlu2 %700 }
 0x29c   : > { %v705_v4 = vmul.f32 %v701_v55, %v3423_v56 }
 0x2a3   : > { %v722_v61 = vpop.permute.xlu2 %721 }
 0x2a4   : > { %v727_v14 = vmul.f32 %v722_v61, %v3418_v52 }
 0x2aa   : > { %v747_v57 = vpop.permute.xlu1 %746  ;;  %v676_v58 = vpop.permute.xlu0 %675 }
 0x2ab   : > { %v751_v59 = vmul.f32 %v747_v57, %v3423_v56  ;;  %v681_v60 = vmul.f32 %v676_v58, %v3418_v52  ;;  %v770_v12 = vpop.permute.xlu2 %769 }
 0x2ac   : > { %v774_v23 = vmul.f32 %v770_v12, %v3423_v56 }
 0x2ad   : > { %756 = vrot.lane.b32.xlu0 %v751_v59, %s2529_s23  ;;  %685 = vrot.lane.b32.xlu1 %v681_v60, %s2530_s25 }
 0x2b2   : > { %v768_v62 = vpop.permute.xlu1 %767  ;;  %v678_v63 = vpop.permute.xlu0 %677 }
 0x2b3   : > { %v773_v1 = vmul.f32 %v768_v62, %v3418_v52  ;;  %v682_v3 = vmul.f32 %v678_v63, %v3423_v56  ;;  %v791_v20 = vpop.permute.xlu2 %790 }
 0x2b4   : > { %v796_v31 = vmul.f32 %v791_v20, %v3418_v52 }
 0x2b5   : > { %777 = vrot.lane.b32.xlu0 %v773_v1, %s2531_s26  ;;  %687 = vrot.lane.b32.xlu1 %v682_v3, %s2530_s25 }
 0x2ba   : > { %v816_v5 = vpop.permute.xlu1 %815  ;;  %v724_v9 = vpop.permute.xlu0 %723 }
 0x2bb   : > { %v820_v10 = vmul.f32 %v816_v5, %v3423_v56  ;;  %v728_v11 = vmul.f32 %v724_v9, %v3423_v56  ;;  %v849_v30 = vpop.permute.xlu2 %848 }
 0x2bc   : > { %v853_v35 = vmul.f32 %v3449_v21, %v849_v30  ;;  %v2281_v30 = vld [vmem:[%s4340_s1 + $0x120] sm:$0xff] }
 0x2bd   : > { %825 = vrot.lane.b32.xlu0 %v820_v10, %s2532_s2  ;;  %710 = vrot.lane.b32.xlu1 %v705_v4, %s2528_s22 }
 0x2be   : > { %733 = vrot.lane.b32.xlu2 %v728_v11, %s2533_s27 }
 0x2c2   : > { %v847_v15 = vpop.permute.xlu1 %846  ;;  %v745_v17 = vpop.permute.xlu0 %744 }
 0x2c3   : > { %v852_v18 = vmul.f32 %v3440_v13, %v847_v15  ;;  %v750_v19 = vmul.f32 %v745_v17, %v3418_v52  ;;  %v870_v37 = vpop.permute.xlu2 %869  ;;  %v2279_v17 = vld [vmem:[%s4340_s1 + $0x110] sm:$0xff] }
 0x2c4   : > { %v875_v40 = vmul.f32 %v3440_v13, %v870_v37  ;;  %v3568_v37 = vld [vmem:[%s3415_s20 + $0x20] sm:$0xff] }
 0x2c5   : > { %856 = vrot.lane.b32.xlu0 %v852_v18, %s2530_s25  ;;  %731 = vrot.lane.b32.xlu1 %v727_v14, %s2533_s27  ;;  %v2273_v14 = vld [vmem:[%s4340_s1 + $0xf8] sm:$0xff] }
 0x2c6   : > { %754 = vrot.lane.b32.xlu2 %v750_v19, %s2529_s23 }
 0x2ca   : > { %v895_v24 = vpop.permute.xlu1 %894  ;;  %v793_v25 = vpop.permute.xlu0 %792 }
 0x2cb   : > { %v899_v27 = vmul.f32 %v3449_v21, %v895_v24  ;;  %v797_v28 = vmul.f32 %v793_v25, %v3423_v56  ;;  %v918_v44 = vpop.permute.xlu2 %917 }
 0x2cc   : > { %v922_v45 = vmul.f32 %v3449_v21, %v918_v44  ;;  %v3585_v44 = vld [vmem:[%s3415_s20 + $0x28] sm:$0xff] }
 0x2cd   : > { %904 = vrot.lane.b32.xlu0 %v899_v27, %s2533_s27  ;;  %779 = vrot.lane.b32.xlu1 %v774_v23, %s2531_s26  ;;  %v2280_v27 = vld [vmem:[%s4340_s1 + $0x118] sm:$0xff] }
 0x2ce   : > { %802 = vrot.lane.b32.xlu2 %v797_v28, %s2534_s28 }
 0x2d2   : > { %v916_v6 = vpop.permute.xlu1 %915  ;;  %v814_v32 = vpop.permute.xlu0 %813 }
 0x2d3   : > { %v921_v33 = vmul.f32 %v3440_v13, %v916_v6  ;;  %v819_v34 = vmul.f32 %v814_v32, %v3418_v52  ;;  %v939_v46 = vpop.permute.xlu2 %938 }
 0x2d4   : > { %v944_v47 = vmul.f32 %v3440_v13, %v939_v46 }
 0x2d5   : > { %925 = vrot.lane.b32.xlu0 %v921_v33, %s2529_s23  ;;  %800 = vrot.lane.b32.xlu1 %v796_v31, %s2534_s28 }
 0x2d6   : > { %823 = vrot.lane.b32.xlu2 %v819_v34, %s2532_s2 }
 0x2da   : > { %v872_v38 = vpop.permute.xlu0 %871 }
 0x2db   : > { %v876_v39 = vmul.f32 %v3449_v21, %v872_v38 }
 0x2dd   : > { %940 = vrot.lane.b32.xlu0 %v2269_v36, %s2524_s24  ;;  %858 = vrot.lane.b32.xlu1 %v853_v35, %s2530_s25 }
 0x2de   : > { %881 = vrot.lane.b32.xlu2 %v876_v39, %s2528_s22 }
 0x2e2   : > { %v893_v42 = vpop.permute.xlu0 %892 }
 0x2e3   : > { %v898_v43 = vmul.f32 %v3440_v13, %v893_v42 }
 0x2e5   : > { %961 = vrot.lane.b32.xlu0 %v2270_v41, %s2527_s21  ;;  %879 = vrot.lane.b32.xlu1 %v875_v40, %s2528_s22  ;;  %v2282_v40 = vld [vmem:[%s4340_s1 + $0x128] sm:$0xff]  ;;  %v2283_v41 = vld [vmem:[%s4340_s1 + $0x130] sm:$0xff] }
 0x2e6   : > { %902 = vrot.lane.b32.xlu2 %v898_v43, %s2533_s27 }
 0x2ed   : > { %927 = vrot.lane.b32.xlu1 %v922_v45, %s2529_s23 }
 0x2f5   : > { %948 = vrot.lane.b32.xlu1 %v944_v47, %s2531_s26 }
 0x2fd   : > { %963 = vrot.lane.b32.xlu1 %v2271_v48, %s2527_s21 }
 0x305   : > { %984 = vrot.lane.b32.xlu1 %v2272_v49, %s2525_s29  ;;  %v2284_v49 = vld [vmem:[%s4340_s1 + $0x138] sm:$0xff] }
 0x308   : > { %v3491_v50 = vpop.permute.xlu0 %708 }
 0x318   : > { %v3538_v20 = vpop.permute.xlu2 %733 }
 0x31f   : > { %v3493_v51 = vpop.permute.xlu0 %756  ;;  %v3495_v53 = vpop.permute.xlu1 %685 }
 0x320   : > { %v3543_v25 = vpop.permute.xlu2 %754 }
 0x327   : > { %v3497_v54 = vpop.permute.xlu0 %777  ;;  %v3499_v55 = vpop.permute.xlu1 %687 }
 0x328   : > { %v3549_v28 = vpop.permute.xlu2 %802 }
 0x32f   : > { %v3501_v57 = vpop.permute.xlu0 %825  ;;  %v3503_v58 = vpop.permute.xlu1 %710 }
 0x330   : > { %v3555_v31 = vpop.permute.xlu2 %823 }
 0x337   : > { %v3505_v59 = vpop.permute.xlu0 %856  ;;  %v3507_v60 = vpop.permute.xlu1 %731 }
 0x338   : > { %v3557_v6 = vpop.permute.xlu2 %881 }
 0x33f   : > { %v3509_v61 = vpop.permute.xlu0 %904  ;;  %v3511_v62 = vpop.permute.xlu1 %779 }
 0x340   : > { %v3559_v32 = vpop.permute.xlu2 %902 }
 0x347   : > { %v3513_v63 = vpop.permute.xlu0 %925  ;;  %v3515_v1 = vpop.permute.xlu1 %800 }
 0x34f   : > { %v941_v3 = vpop.permute.xlu0 %940  ;;  %v3517_v4 = vpop.permute.xlu1 %858 }
 0x350   : > { %v945_v5 = vmul.f32 %v3449_v21, %v941_v3  ;;  %v2285_v3 = vld [vmem:[%s4340_s1 + $0x140] sm:$0xff] }
 0x352   : > { %950 = vrot.lane.b32.xlu2 %v945_v5, %s2531_s26 }
 0x357   : > { %v962_v9 = vpop.permute.xlu0 %961  ;;  %v3521_v10 = vpop.permute.xlu1 %879 }
 0x358   : > { %v967_v11 = vmul.f32 %v3440_v13, %v962_v9 }
 0x35a   : > { %971 = vrot.lane.b32.xlu2 %v967_v11, %s2534_s28 }
 0x35f   : > { %v3525_v12 = vpop.permute.xlu1 %927 }
 0x362   : > { %986 = vrot.lane.b32.xlu2 %v2273_v14, %s2525_s29 }
 0x367   : > { %v3531_v15 = vpop.permute.xlu1 %948 }
 0x36a   : > { %1019 = vrot.lane.b32.xlu2 %v2279_v17, %s2522_s14 }
 0x36f   : > { %v964_v18 = vpop.permute.xlu1 %963 }
 0x370   : > { %v968_v19 = vmul.f32 %v3449_v21, %v964_v18 }
 0x372   : > { %973 = vrot.lane.b32.xlu0 %v968_v19, %s2534_s28 }
 0x377   : > { %v985_v23 = vpop.permute.xlu1 %984 }
 0x378   : > { %v990_v24 = vmul.f32 %v3440_v13, %v985_v23  ;;  %v2286_v23 = vld [vmem:[%s4340_s1 + $0x148] sm:$0xff] }
 0x37a   : > { %994 = vrot.lane.b32.xlu0 %v990_v24, %s2532_s2 }
 0x382   : > { %1021 = vrot.lane.b32.xlu0 %v2280_v27, %s2522_s14  ;;  %v2287_v27 = vld [vmem:[%s4340_s1 + $0x150] sm:$0xff] }
 0x38a   : > { %1042 = vrot.lane.b32.xlu0 %v2281_v30, %s2523_s17 }
 0x3ac   : > { %v3561_v33 = vpop.permute.xlu2 %950 }
 0x3b4   : > { %v3563_v34 = vpop.permute.xlu2 %971 }
 0x3bc   : > { %v987_v35 = vpop.permute.xlu2 %986 }
 0x3bd   : > { %v991_v36 = vmul.f32 %v3449_v21, %v987_v35 }
 0x3bf   : > { %996 = vrot.lane.b32.xlu1 %v991_v36, %s2532_s2 }
 0x3c4   : > { %v1020_v38 = vpop.permute.xlu2 %1019 }
 0x3c5   : > { %v1025_v39 = vmul.f32 %v3568_v37, %v1020_v38 }
 0x3c7   : > { %1029 = vrot.lane.b32.xlu1 %v1025_v39, %s2530_s25  ;;  %v2288_v39 = vld [vmem:[%s4340_s1 + $0x158] sm:$0xff] }
 0x3cf   : > { %1044 = vrot.lane.b32.xlu1 %v2282_v40, %s2523_s17  ;;  %v2289_v40 = vld [vmem:[%s4340_s1 + $0x160] sm:$0xff] }
 0x3d7   : > { %1065 = vrot.lane.b32.xlu1 %v2283_v41, %s2526_s30 }
 0x3e4   : > { %v3580_v42 = vpop.permute.xlu0 %973 }
 0x3ec   : > { %v3582_v43 = vpop.permute.xlu0 %994 }
 0x3f4   : > { %v1022_v45 = vpop.permute.xlu0 %1021 }
 0x3f5   : > { %v1026_v46 = vmul.f32 %v3585_v44, %v1022_v45 }
 0x3f7   : > { %1031 = vrot.lane.b32.xlu2 %v1026_v46, %s2530_s25 }
 0x3fc   : > { %v1043_v47 = vpop.permute.xlu0 %1042 }
 0x3fd   : > { %v1048_v48 = vmul.f32 %v3568_v37, %v1043_v47 }
 0x3ff   : > { %1052 = vrot.lane.b32.xlu2 %v1048_v48, %s2528_s22 }
 0x407   : > { %1067 = vrot.lane.b32.xlu2 %v2284_v49, %s2526_s30 }
 0x40f   : > { %1088 = vrot.lane.b32.xlu2 %v2285_v3, %s2521_s13 }
 0x431   : > { %v3599_v5 = vpop.permute.xlu1 %996 }
 0x439   : > { %v3601_v9 = vpop.permute.xlu1 %1029 }
 0x441   : > { %v1045_v11 = vpop.permute.xlu1 %1044 }
 0x442   : > { %v1049_v14 = vmul.f32 %v3585_v44, %v1045_v11  ;;  %v2290_v11 = vld [vmem:[%s4340_s1 + $0x168] sm:$0xff] }
 0x444   : > { %1054 = vrot.lane.b32.xlu0 %v1049_v14, %s2528_s22 }
 0x449   : > { %v1066_v17 = vpop.permute.xlu1 %1065 }
 0x44a   : > { %v1071_v18 = vmul.f32 %v3568_v37, %v1066_v17  ;;  %v2291_v17 = vld [vmem:[%s4340_s1 + $0x170] sm:$0xff] }
 0x44c   : > { %1075 = vrot.lane.b32.xlu0 %v1071_v18, %s2533_s27 }
 0x451   : > { %v3607_v19 = vpop.permute.xlu2 %1031 }
 0x454   : > { %1090 = vrot.lane.b32.xlu0 %v2286_v23, %s2521_s13 }
 0x459   : > { %v3613_v24 = vpop.permute.xlu2 %1052 }
 0x45c   : > { %1111 = vrot.lane.b32.xlu0 %v2287_v27, %s2524_s24 }
 0x461   : > { %v1068_v30 = vpop.permute.xlu2 %1067 }
 0x462   : > { %v1072_v35 = vmul.f32 %v3585_v44, %v1068_v30 }
 0x464   : > { %1077 = vrot.lane.b32.xlu1 %v1072_v35, %s2533_s27  ;;  %v2292_v35 = vld [vmem:[%s4340_s1 + $0x178] sm:$0xff] }
 0x469   : > { %v1089_v36 = vpop.permute.xlu2 %1088 }
 0x46a   : > { %v1094_v38 = vmul.f32 %v3568_v37, %v1089_v36  ;;  %v2298_v36 = vld [vmem:[%s4340_s1 + $0x190] sm:$0xff] }
 0x46c   : > { %1098 = vrot.lane.b32.xlu1 %v1094_v38, %s2529_s23 }
 0x474   : > { %1113 = vrot.lane.b32.xlu1 %v2288_v39, %s2524_s24 }
 0x47c   : > { %1134 = vrot.lane.b32.xlu1 %v2289_v40, %s2527_s21 }
 0x4b6   : > { %v3631_v41 = vpop.permute.xlu0 %1054 }
 0x4be   : > { %v3633_v45 = vpop.permute.xlu0 %1075 }
 0x4c6   : > { %v1091_v46 = vpop.permute.xlu0 %1090 }
 0x4c7   : > { %v1095_v47 = vmul.f32 %v3585_v44, %v1091_v46 }
 0x4c9   : > { %1100 = vrot.lane.b32.xlu2 %v1095_v47, %s2529_s23 }
 0x4ce   : > { %v1112_v48 = vpop.permute.xlu0 %1111 }
 0x4cf   : > { %v1117_v49 = vmul.f32 %v3568_v37, %v1112_v48 }
 0x4d1   : > { %1121 = vrot.lane.b32.xlu2 %v1117_v49, %s2531_s26  ;;  %v2299_v49 = vld [vmem:[%s4340_s1 + $0x198] sm:$0xff] }
 0x4d6   : > { %v3639_v3 = vpop.permute.xlu1 %1077 }
 0x4d9   : > { %1136 = vrot.lane.b32.xlu2 %v2290_v11, %s2527_s21  ;;  %v2300_v11 = vld [vmem:[%s4340_s1 + $0x1a0] sm:$0xff] }
 0x4de   : > { %v3645_v14 = vpop.permute.xlu1 %1098 }
 0x4e1   : > { %1157 = vrot.lane.b32.xlu2 %v2291_v17, %s2525_s29 }
 0x4e6   : > { %v1114_v18 = vpop.permute.xlu1 %1113 }
 0x4e7   : > { %v1118_v23 = vmul.f32 %v3585_v44, %v1114_v18 }
 0x4e9   : > { %1123 = vrot.lane.b32.xlu0 %v1118_v23, %s2531_s26 }
 0x4ee   : > { %v1135_v27 = vpop.permute.xlu1 %1134 }
 0x4ef   : > { %v1140_v30 = vmul.f32 %v3568_v37, %v1135_v27 }
 0x4f1   : > { %1144 = vrot.lane.b32.xlu0 %v1140_v30, %s2534_s28  ;;  %v3686_v30 = vld [vmem:[%s3415_s20 + $0x30] sm:$0xff] }
 0x4f9   : > { %1159 = vrot.lane.b32.xlu0 %v2292_v35, %s2525_s29 }
 0x501   : > { %1192 = vrot.lane.b32.xlu0 %v2298_v36, %s2522_s14 }
 0x523   : > { %v3663_v38 = vpop.permute.xlu2 %1100 }
 0x52b   : > { %v3665_v39 = vpop.permute.xlu2 %1121 }
 0x533   : > { %v1137_v40 = vpop.permute.xlu2 %1136 }
 0x534   : > { %v1141_v46 = vmul.f32 %v3585_v44, %v1137_v40  ;;  %v2301_v40 = vld [vmem:[%s4340_s1 + $0x1a8] sm:$0xff] }
 0x536   : > { %1146 = vrot.lane.b32.xlu1 %v1141_v46, %s2534_s28  ;;  %v2302_v46 = vld [vmem:[%s4340_s1 + $0x1b0] sm:$0xff] }
 0x53b   : > { %v1158_v47 = vpop.permute.xlu2 %1157 }
 0x53c   : > { %v1163_v48 = vmul.f32 %v3568_v37, %v1158_v47 }
 0x53e   : > { %1167 = vrot.lane.b32.xlu1 %v1163_v48, %s2532_s2 }
 0x546   : > { %1194 = vrot.lane.b32.xlu1 %v2299_v49, %s2522_s14  ;;  %v3703_v49 = vld [vmem:[%s3415_s20 + $0x38] sm:$0xff] }
 0x54e   : > { %1215 = vrot.lane.b32.xlu1 %v2300_v11, %s2523_s17 }
 0x55b   : > { %v3679_v17 = vpop.permute.xlu0 %1123 }
 0x563   : > { %v3681_v18 = vpop.permute.xlu0 %1144 }
 0x56b   : > { %v1160_v23 = vpop.permute.xlu0 %1159 }
 0x56c   : > { %v1164_v27 = vmul.f32 %v3585_v44, %v1160_v23 }
 0x56e   : > { %1169 = vrot.lane.b32.xlu2 %v1164_v27, %s2532_s2 }
 0x573   : > { %v1193_v35 = vpop.permute.xlu0 %1192 }
 0x574   : > { %v1198_v36 = vmul.f32 %v3686_v30, %v1193_v35 }
 0x576   : > { %1202 = vrot.lane.b32.xlu2 %v1198_v36, %s2530_s25 }
 0x57e   : > { %1217 = vrot.lane.b32.xlu2 %v2301_v40, %s2523_s17  ;;  %v2303_v40 = vld [vmem:[%s4340_s1 + $0x1b8] sm:$0xff] }
 0x586   : > { %1238 = vrot.lane.b32.xlu2 %v2302_v46, %s2526_s30 }
 0x5a8   : > { %v3698_v47 = vpop.permute.xlu1 %1146 }
 0x5b0   : > { %v3700_v48 = vpop.permute.xlu1 %1167 }
 0x5b8   : > { %v1195_v11 = vpop.permute.xlu1 %1194 }
 0x5b9   : > { %v1199_v23 = vmul.f32 %v3703_v49, %v1195_v11  ;;  %v2304_v11 = vld [vmem:[%s4340_s1 + $0x1c0] sm:$0xff] }
 0x5bb   : > { %1204 = vrot.lane.b32.xlu0 %v1199_v23, %s2530_s25 }
 0x5c0   : > { %v1216_v27 = vpop.permute.xlu1 %1215 }
 0x5c1   : > { %v1221_v35 = vmul.f32 %v3686_v30, %v1216_v27 }
 0x5c3   : > { %1225 = vrot.lane.b32.xlu0 %v1221_v35, %s2528_s22 }
 0x5c8   : > { %v3709_v36 = vpop.permute.xlu2 %1169 }
 0x5cb   : > { %1240 = vrot.lane.b32.xlu0 %v2303_v40, %s2526_s30  ;;  %v2305_v40 = vld [vmem:[%s4340_s1 + $0x1c8] sm:$0xff] }
 0x5d0   : > { %v1203_v46 = vpop.permute.xlu2 %1202 }
 0x5d3   : > { %1261 = vrot.lane.b32.xlu0 %v2304_v11, %s2521_s13  ;;  %v2306_v11 = vld [vmem:[%s4340_s1 + $0x1d0] sm:$0xff] }
 0x5d8   : > { %v1218_v23 = vpop.permute.xlu2 %1217 }
 0x5d9   : > { %v1222_v27 = vmul.f32 %v3703_v49, %v1218_v23  ;;  %v2296_v23 = vld [vmem:[%s4340_s1 + $0x180] sm:$0xff] }
 0x5db   : > { %1227 = vrot.lane.b32.xlu1 %v1222_v27, %s2528_s22 }
 0x5e0   : > { %v1239_v35 = vpop.permute.xlu2 %1238 }
 0x5e1   : > { %v1244_v26 = vmul.f32 %v3686_v30, %v1239_v35  ;;  %v1185_v35 = vmul.f32 %v2296_v23, %v3686_v30 }
 0x5e3   : > { %1248 = vrot.lane.b32.xlu1 %v1244_v26, %s2533_s27  ;;  %v1208_v26 = vadd.f32 %v1203_v46, %v1185_v35  ;;  %v2308_v35 = vld [vmem:[%s4340_s1 + $0x1e0] sm:$0xff] }
 0x5eb   : > { %1263 = vrot.lane.b32.xlu1 %v2305_v40, %s2521_s13  ;;  %v2297_v40 = vld [vmem:[%s4340_s1 + $0x188] sm:$0xff] }
 0x5ec   : > { %v1186_v0 = vmul.f32 %v2297_v40, %v3703_v49 }
 0x5f3   : > { %1284 = vrot.lane.b32.xlu1 %v2306_v11, %s2524_s24 }
 0x62d   : > { %v1205_v27 = vpop.permute.xlu0 %1204 }
 0x62e   : > { %v1209_v23 = vadd.f32 %v1205_v27, %v1186_v0 }
 0x635   : > { %v1226_v22 = vpop.permute.xlu0 %1225 }
 0x636   : > { %v1231_v16 = vadd.f32 %v1226_v22, %v1208_v26  ;;  %v2307_v22 = vld [vmem:[%s4340_s1 + $0x1d8] sm:$0xff] }
 0x63d   : > { %v1241_v29 = vpop.permute.xlu0 %1240 }
 0x63e   : > { %v1245_v8 = vmul.f32 %v3703_v49, %v1241_v29 }
 0x640   : > { %1250 = vrot.lane.b32.xlu2 %v1245_v8, %s2533_s27 }
 0x645   : > { %v1262_v11 = vpop.permute.xlu0 %1261 }
 0x646   : > { %v1267_v2 = vmul.f32 %v3686_v30, %v1262_v11  ;;  %v2309_v11 = vld [vmem:[%s4340_s1 + $0x1e8] sm:$0xff] }
 0x648   : > { %1271 = vrot.lane.b32.xlu2 %v1267_v2, %s2529_s23 }
 0x64d   : > { %v1228_v46 = vpop.permute.xlu1 %1227 }
 0x64e   : > { %v1232_v29 = vadd.f32 %v1228_v46, %v1209_v23 }
 0x650   : > { %1286 = vrot.lane.b32.xlu2 %v2307_v22, %s2524_s24 }
 0x655   : > { %v1249_v8 = vpop.permute.xlu1 %1248 }
 0x656   : > { %v1254_v26 = vadd.f32 %v1249_v8, %v1231_v16  ;;  %v2310_v16 = vld [vmem:[%s4340_s1 + $0x1f0] sm:$0xff] }
 0x658   : > { %1307 = vrot.lane.b32.xlu2 %v2308_v35, %s2527_s21 }
 0x65d   : > { %v1264_v40 = vpop.permute.xlu1 %1263 }
 0x65e   : > { %v1268_v2 = vmul.f32 %v3703_v49, %v1264_v40 }
 0x660   : > { %1273 = vrot.lane.b32.xlu0 %v1268_v2, %s2529_s23 }
 0x665   : > { %v1285_v0 = vpop.permute.xlu1 %1284 }
 0x666   : > { %v1290_v27 = vmul.f32 %v3686_v30, %v1285_v0 }
 0x668   : > { %1294 = vrot.lane.b32.xlu0 %v1290_v27, %s2531_s26  ;;  %v2311_v27 = vld [vmem:[%s4340_s1 + $0x1f8] sm:$0xff] }
 0x670   : > { %1309 = vrot.lane.b32.xlu0 %v2309_v11, %s2527_s21 }
 0x678   : > { %1330 = vrot.lane.b32.xlu0 %v2310_v16, %s2525_s29 }
 0x69a   : > { %v1251_v23 = vpop.permute.xlu2 %1250 }
 0x69b   : > { %v1255_v46 = vadd.f32 %v1251_v23, %v1232_v29  ;;  %v2317_v29 = vld [vmem:[%s4340_s1 + $0x210] sm:$0xff] }
 0x6a2   : > { %v1272_v22 = vpop.permute.xlu2 %1271 }
 0x6a3   : > { %v1277_v8 = vadd.f32 %v1272_v22, %v1254_v26 }
 0x6aa   : > { %v1287_v35 = vpop.permute.xlu2 %1286 }
 0x6ab   : > { %v1291_v40 = vmul.f32 %v3703_v49, %v1287_v35 }
 0x6ad   : > { %1296 = vrot.lane.b32.xlu1 %v1291_v40, %s2531_s26 }
 0x6b2   : > { %v1308_v2 = vpop.permute.xlu2 %1307 }
 0x6b3   : > { %v1313_v0 = vmul.f32 %v3686_v30, %v1308_v2 }
 0x6b5   : > { %1317 = vrot.lane.b32.xlu1 %v1313_v0, %s2534_s28  ;;  %v2318_v0 = vld [vmem:[%s4340_s1 + $0x218] sm:$0xff] }
 0x6bd   : > { %1332 = vrot.lane.b32.xlu1 %v2311_v27, %s2525_s29 }
 0x6c5   : > { %1365 = vrot.lane.b32.xlu1 %v2317_v29, %s2522_s14 }
 0x6d2   : > { %v1274_v26 = vpop.permute.xlu0 %1273 }
 0x6d3   : > { %v1278_v11 = vadd.f32 %v1274_v26, %v1255_v46  ;;  %v2319_v46 = vld [vmem:[%s4340_s1 + $0x220] sm:$0xff] }
 0x6da   : > { %v1295_v16 = vpop.permute.xlu0 %1294 }
 0x6db   : > { %v1300_v23 = vadd.f32 %v1295_v16, %v1277_v8  ;;  %v2258_v16 = vld [vmem:[%s4340_s1 + $0x80] sm:$0xff] }
 0x6e2   : > { %v1310_v22 = vpop.permute.xlu0 %1309 }
 0x6e3   : > { %v1314_v35 = vmul.f32 %v3703_v49, %v1310_v22 }
 0x6e5   : > { %1319 = vrot.lane.b32.xlu2 %v1314_v35, %s2534_s28  ;;  %v839_v35 = vmul.f32 %v2258_v16, %v3440_v13  ;;  %v3806_v13 = vld [vmem:[%s3415_s20 + $0x40] sm:$0xff] }
 0x6ea   : > { %v1331_v40 = vpop.permute.xlu0 %1330 }
 0x6eb   : > { %v1336_v2 = vmul.f32 %v3686_v30, %v1331_v40  ;;  %v666_v30 = vld [vmem:[%s4340_s1] sm:$0xff] }
 0x6ec   : > { %v668_v22 = vmul.f32 %v666_v30, %v3418_v52  ;;  %v2277_v40 = vld [vmem:[%s4340_s1 + $0x100] sm:$0xff] }
 0x6ed   : > { %1340 = vrot.lane.b32.xlu2 %v1336_v2, %s2532_s2 }
 0x6ee   : > { %v691_v2 = vadd.f32 %v3495_v53, %v668_v22 }
 0x6f5   : > { %1367 = vrot.lane.b32.xlu2 %v2318_v0, %s2522_s14 }
 0x6fd   : > { %1388 = vrot.lane.b32.xlu2 %v2319_v46, %s2523_s17  ;;  %v1012_v46 = vmul.f32 %v2277_v40, %v3568_v37 }
 0x6ff   : > { %v1035_v30 = vadd.f32 %v3601_v9, %v1012_v46  ;;  %v667_v46 = vld [vmem:[%s4340_s1 + $0x8] sm:$0xff] }
 0x701   : > { %v1058_v37 = vadd.f32 %v3613_v24, %v1035_v30 }
 0x71f   : > { %v1297_v8 = vpop.permute.xlu1 %1296 }
 0x720   : > { %v1301_v27 = vadd.f32 %v1297_v8, %v1278_v11  ;;  %v714_v8 = vadd.f32 %v3491_v50, %v691_v2 }
 0x727   : > { %v1318_v29 = vpop.permute.xlu1 %1317 }
 0x728   : > { %v1323_v26 = vadd.f32 %v1318_v29, %v1300_v23  ;;  %v862_v23 = vadd.f32 %v3505_v59, %v839_v35  ;;  %v737_v29 = vadd.f32 %v3507_v60, %v714_v8  ;;  %v2259_v8 = vld [vmem:[%s4340_s1 + $0x88] sm:$0xff] }
 0x72a   : > { %v885_v52 = vadd.f32 %v3521_v10, %v862_v23  ;;  %v1081_v10 = vadd.f32 %v3633_v45, %v1058_v37 }
 0x72c   : > { %v908_v53 = vadd.f32 %v3559_v32, %v885_v52  ;;  %v1104_v9 = vadd.f32 %v3645_v14, %v1081_v10  ;;  %v2320_v32 = vld [vmem:[%s4340_s1 + $0x228] sm:$0xff]  ;;  %v669_v52 = vmul.f32 %v667_v46, %v3423_v56 }
 0x72d   : > { %v2362_v46 = vld [vmem:[%s4340_s1 + $0x348] sm:$0xff] }
 0x72e   : > { %v931_v50 = vadd.f32 %v3513_v63, %v908_v53  ;;  %v1127_v63 = vadd.f32 %v3665_v39, %v1104_v9  ;;  %v692_v30 = vadd.f32 %v3499_v55, %v669_v52  ;;  %v2341_v52 = vld [vmem:[%s4340_s1 + $0x2b8] sm:$0xff] }
 0x72f   : > { %v1333_v11 = vpop.permute.xlu1 %1332 }
 0x730   : > { %v1337_v0 = vmul.f32 %v3703_v49, %v1333_v11  ;;  %v760_v49 = vadd.f32 %v3543_v25, %v737_v29  ;;  %v954_v60 = vadd.f32 %v3531_v15, %v931_v50  ;;  %v840_v29 = vmul.f32 %v2259_v8, %v3449_v21  ;;  %v2360_v8 = vld [vmem:[%s4340_s1 + $0x338] sm:$0xff] }
 0x731   : > { %v715_v53 = vadd.f32 %v3503_v58, %v692_v30  ;;  %v2325_v30 = vld [vmem:[%s4340_s1 + $0x250] sm:$0xff] }
 0x732   : > { %1342 = vrot.lane.b32.xlu0 %v1337_v0, %s2532_s2  ;;  %v783_v22 = vadd.f32 %v3497_v54, %v760_v49  ;;  %v977_v24 = vadd.f32 %v3563_v34, %v954_v60  ;;  %v1150_v54 = vadd.f32 %v3681_v18, %v1127_v63  ;;  %v2323_v0 = vld [vmem:[%s4340_s1 + $0x240] sm:$0xff] }
 0x733   : > { %v738_v37 = vadd.f32 %v3538_v20, %v715_v53  ;;  %v2347_v53 = vld [vmem:[%s4340_s1 + $0x2e8] sm:$0xff] }
 0x734   : > { %v806_v25 = vadd.f32 %v3515_v1, %v783_v22  ;;  %v1000_v45 = vadd.f32 %v3582_v43, %v977_v24  ;;  %v1173_v14 = vadd.f32 %v3700_v48, %v1150_v54  ;;  %v2321_v1 = vld [vmem:[%s4340_s1 + $0x230] sm:$0xff]  ;;  %v3838_v43 = vld [vmem:[%s3415_s20 + $0x48] sm:$0xff] }
 0x735   : > { %v761_v21 = vadd.f32 %v3493_v51, %v738_v37  ;;  %v2324_v24 = vld [vmem:[%s4340_s1 + $0x248] sm:$0xff]  ;;  %v2378_v37 = vld [vmem:[%s4340_s1 + $0x3b0] sm:$0xff] }
 0x736   : > { %v829_v15 = vadd.f32 %v3555_v31, %v806_v25 }
 0x737   : > { %v1366_v16 = vpop.permute.xlu1 %1365  ;;  %v784_v22 = vadd.f32 %v3511_v62, %v761_v21  ;;  %v2316_v21 = vld [vmem:[%s4340_s1 + $0x208] sm:$0xff] }
 0x738   : > { %v1371_v59 = vmul.f32 %v3806_v13, %v1366_v16  ;;  %v1002_v11 = vadd.f32 %v1000_v45, %v829_v15  ;;  %v2278_v16 = vld [vmem:[%s4340_s1 + $0x108] sm:$0xff]  ;;  %v2336_v15 = vld [vmem:[%s4340_s1 + $0x290] sm:$0xff] }
 0x739   : > { %v1013_v49 = vmul.f32 %v2278_v16, %v3585_v44  ;;  %v2375_v16 = vld [vmem:[%s4340_s1 + $0x398] sm:$0xff] }
 0x73a   : > { %1375 = vrot.lane.b32.xlu0 %v1371_v59, %s2530_s25  ;;  %v1175_v34 = vadd.f32 %v1173_v14, %v1002_v11  ;;  %v863_v59 = vadd.f32 %v3517_v4, %v840_v29  ;;  %v2357_v11 = vld [vmem:[%s4340_s1 + $0x320] sm:$0xff] }
 0x73b   : > { %v1036_v56 = vadd.f32 %v3607_v19, %v1013_v49  ;;  %v2327_v29 = vld [vmem:[%s4340_s1 + $0x260] sm:$0xff]  ;;  %v2343_v49 = vld [vmem:[%s4340_s1 + $0x2c8] sm:$0xff] }
 0x73c   : > { %v886_v50 = vadd.f32 %v3557_v6, %v863_v59  ;;  %v807_v6 = vadd.f32 %v3549_v28, %v784_v22  ;;  %v2337_v28 = vld [vmem:[%s4340_s1 + $0x298] sm:$0xff] }
 0x73d   : > { %v1059_v10 = vadd.f32 %v3631_v41, %v1036_v56  ;;  %v2345_v59 = vld [vmem:[%s4340_s1 + $0x2d8] sm:$0xff]  ;;  %v2374_v56 = vld [vmem:[%s4340_s1 + $0x390] sm:$0xff] }
 0x73e   : > { %v909_v55 = vadd.f32 %v3509_v61, %v886_v50  ;;  %v830_v62 = vadd.f32 %v3501_v57, %v807_v6  ;;  %v2356_v57 = vld [vmem:[%s4340_s1 + $0x318] sm:$0xff]  ;;  %v2376_v50 = vld [vmem:[%s4340_s1 + $0x3a0] sm:$0xff]  ;;  %v2366_v6 = vld [vmem:[%s4340_s1 + $0x368] sm:$0xff] }
 0x73f   : > { %v1320_v35 = vpop.permute.xlu2 %1319  ;;  %v1082_v4 = vadd.f32 %v3639_v3, %v1059_v10  ;;  %v1359_v10 = vmul.f32 %v2316_v21, %v3838_v43  ;;  %v2330_v22 = vld [vmem:[%s4340_s1 + $0x278] sm:$0xff] }
 0x740   : > { %v1324_v40 = vadd.f32 %v1320_v35, %v1301_v27  ;;  %v932_v58 = vadd.f32 %v3525_v12, %v909_v55  ;;  %v2346_v55 = vld [vmem:[%s4340_s1 + $0x2e0] sm:$0xff] }
 0x741   : > { %v1105_v20 = vadd.f32 %v3663_v38, %v1082_v4 }
 0x742   : > { %1390 = vrot.lane.b32.xlu0 %v2320_v32, %s2523_s17  ;;  %v955_v44 = vadd.f32 %v3561_v33, %v932_v58  ;;  %v2315_v32 = vld [vmem:[%s4340_s1 + $0x200] sm:$0xff]  ;;  %v2328_v58 = vld [vmem:[%s4340_s1 + $0x268] sm:$0xff] }
 0x743   : > { %v1128_v51 = vadd.f32 %v3679_v17, %v1105_v20  ;;  %v1358_v63 = vmul.f32 %v2315_v32, %v3806_v13 }
 0x744   : > { %v978_v19 = vadd.f32 %v3580_v42, %v955_v44 }
 0x745   : > { %v1151_v41 = vadd.f32 %v3698_v47, %v1128_v51  ;;  %v2359_v51 = vld [vmem:[%s4340_s1 + $0x330] sm:$0xff] }
 0x746   : > { %v1001_v61 = vadd.f32 %v3599_v5, %v978_v19  ;;  %v2361_v19 = vld [vmem:[%s4340_s1 + $0x340] sm:$0xff] }
 0x747   : > { %v1341_v2 = vpop.permute.xlu2 %1340  ;;  %v1174_v12 = vadd.f32 %v3709_v36, %v1151_v41  ;;  %v2355_v36 = vld [vmem:[%s4340_s1 + $0x310] sm:$0xff] }
 0x748   : > { %v1346_v23 = vadd.f32 %v1341_v2, %v1323_v26  ;;  %v2322_v26 = vld [vmem:[%s4340_s1 + $0x238] sm:$0xff]  ;;  %v1003_v60 = vadd.f32 %v1001_v61, %v830_v62  ;;  %v2348_v62 = vld [vmem:[%s4340_s1 + $0x2f0] sm:$0xff] }
 0x74a   : > { %v3834_v39 = vadd.f32 %v1346_v23, %v1175_v34  ;;  %1411 = vrot.lane.b32.xlu0 %v2321_v1, %s2526_s30  ;;  %v1176_v9 = vadd.f32 %v1174_v12, %v1003_v60  ;;  %v2338_v1 = vld [vmem:[%s4340_s1 + $0x2a0] sm:$0xff]  ;;  %v2377_v23 = vld [vmem:[%s4340_s1 + $0x3a8] sm:$0xff]  ;;  %v2379_v60 = vld [vmem:[%s4340_s1 + $0x3b8] sm:$0xff] }
 0x74b   : > { %v2381_v12 = vld [vmem:[%s4340_s1 + $0x3c8] sm:$0xff] }
 0x74f   : > { %v1368_v18 = vpop.permute.xlu2 %1367 }
 0x750   : > { %v1372_v27 = vmul.f32 %v3838_v43, %v1368_v18 }
 0x752   : > { %1377 = vrot.lane.b32.xlu1 %v1372_v27, %s2530_s25  ;;  %v2358_v27 = vld [vmem:[%s4340_s1 + $0x328] sm:$0xff] }
 0x757   : > { %v1389_v31 = vpop.permute.xlu2 %1388 }
 0x758   : > { %v1394_v48 = vmul.f32 %v3806_v13, %v1389_v31 }
 0x75a   : > { %1398 = vrot.lane.b32.xlu1 %v1394_v48, %s2528_s22  ;;  %v2342_v48 = vld [vmem:[%s4340_s1 + $0x2c0] sm:$0xff] }
 0x762   : > { %1413 = vrot.lane.b32.xlu1 %v2322_v26, %s2526_s30  ;;  %v2340_v26 = vld [vmem:[%s4340_s1 + $0x2b0] sm:$0xff] }
 0x76a   : > { %1434 = vrot.lane.b32.xlu1 %v2323_v0, %s2521_s13  ;;  %v2339_v0 = vld [vmem:[%s4340_s1 + $0x2a8] sm:$0xff] }
 0x772   : > { %1540 = vrot.lane.b32.xlu1 %v2337_v28, %s2522_s14  ;;  %v2344_v28 = vld [vmem:[%s4340_s1 + $0x2d0] sm:$0xff] }
 0x77a   : > { %1713 = vrot.lane.b32.xlu1 %v2356_v57, %s2522_s14  ;;  %v2380_v57 = vld [vmem:[%s4340_s1 + $0x3c0] sm:$0xff] }
 0x782   : > { %1711 = vrot.lane.b32.xlu1 %v2355_v36, %s2522_s14 }
 0x7a4   : > { %v1343_v3 = vpop.permute.xlu0 %1342 }
 0x7a5   : > { %v1347_v33 = vadd.f32 %v1343_v3, %v1324_v40  ;;  %v2326_v40 = vld [vmem:[%s4340_s1 + $0x258] sm:$0xff] }
 0x7a6   : > { %1459 = vrot.lane.b32.xlu1 %v2326_v40, %s2524_s24  ;;  %v4081_v40 = vld [vmem:[%s3415_s20 + $0x68] sm:$0xff] }
 0x7a7   : > { %v3885_v35 = vadd.f32 %v1347_v33, %v1176_v9  ;;  %v2382_v9 = vld [vmem:[%s4340_s1 + $0x3d0] sm:$0xff] }
 0x7ac   : > { %v1376_v38 = vpop.permute.xlu0 %1375 }
 0x7ad   : > { %v1381_v45 = vadd.f32 %v1376_v38, %v1358_v63  ;;  %v2349_v38 = vld [vmem:[%s4340_s1 + $0x2f8] sm:$0xff]  ;;  %v2329_v63 = vld [vmem:[%s4340_s1 + $0x270] sm:$0xff] }
 0x7ae   : > { %1734 = vrot.lane.b32.xlu1 %v2357_v11, %s2523_s17  ;;  %v2363_v11 = vld [vmem:[%s4340_s1 + $0x350] sm:$0xff] }
 0x7b4   : > { %v1391_v42 = vpop.permute.xlu0 %1390 }
 0x7b5   : > { %v1395_v5 = vmul.f32 %v3838_v43, %v1391_v42 }
 0x7b6   : > { %1909 = vrot.lane.b32.xlu1 %v2377_v23, %s2523_s17  ;;  %v2383_v23 = vld [vmem:[%s4340_s1 + $0x3d8] sm:$0xff] }
 0x7b7   : > { %1400 = vrot.lane.b32.xlu2 %v1395_v5, %s2528_s22  ;;  %v2384_v5 = vld [vmem:[%s4340_s1 + $0x3e0] sm:$0xff] }
 0x7bc   : > { %v1412_v17 = vpop.permute.xlu0 %1411 }
 0x7bd   : > { %v1417_v47 = vmul.f32 %v3806_v13, %v1412_v17  ;;  %v2364_v17 = vld [vmem:[%s4340_s1 + $0x358] sm:$0xff] }
 0x7be   : > { %1607 = vrot.lane.b32.xlu1 %v2342_v48, %s2521_s13 }
 0x7bf   : > { %1421 = vrot.lane.b32.xlu2 %v1417_v47, %s2533_s27  ;;  %v4068_v47 = vld [vmem:[%s3415_s20 + $0x58] sm:$0xff] }
 0x7c4   : > { %v3906_v25 = vpop.permute.xlu1 %1377 }
 0x7c5   : > { %v1382_v4 = vadd.f32 %v3906_v25, %v1359_v10 }
 0x7c6   : > { %1782 = vrot.lane.b32.xlu1 %v2362_v46, %s2521_s13  ;;  %v2368_v46 = vld [vmem:[%s4340_s1 + $0x378] sm:$0xff] }
 0x7c7   : > { %1436 = vrot.lane.b32.xlu2 %v2324_v24, %s2521_s13  ;;  %v2365_v24 = vld [vmem:[%s4340_s1 + $0x360] sm:$0xff] }
 0x7cc   : > { %v1399_v54 = vpop.permute.xlu1 %1398 }
 0x7cd   : > { %v3920_v14 = vadd.f32 %v1399_v54, %v1381_v45 }
 0x7ce   : > { %1480 = vrot.lane.b32.xlu1 %v2327_v29, %s2527_s21 }
 0x7cf   : > { %1538 = vrot.lane.b32.xlu2 %v2336_v15, %s2522_s14 }
 0x7d4   : > { %v1414_v2 = vpop.permute.xlu1 %1413 }
 0x7d5   : > { %v1418_v34 = vmul.f32 %v3838_v43, %v1414_v2 }
 0x7d6   : > { %1655 = vrot.lane.b32.xlu1 %v2347_v53, %s2527_s21 }
 0x7d7   : > { %1561 = vrot.lane.b32.xlu2 %v2338_v1, %s2523_s17  ;;  %1423 = vrot.lane.b32.xlu0 %v1418_v34, %s2533_s27  ;;  %v2387_v34 = vld [vmem:[%s4340_s1 + $0x3f8] sm:$0xff] }
 0x7dc   : > { %v1435_v18 = vpop.permute.xlu1 %1434 }
 0x7dd   : > { %v1440_v31 = vmul.f32 %v3806_v13, %v1435_v18  ;;  %v4106_v18 = vld [vmem:[%s3415_s20 + $0x50] sm:$0xff] }
 0x7de   : > { %1930 = vrot.lane.b32.xlu1 %v2378_v37, %s2526_s30 }
 0x7df   : > { %1736 = vrot.lane.b32.xlu2 %v2358_v27, %s2523_s17  ;;  %1444 = vrot.lane.b32.xlu0 %v1440_v31, %s2529_s23 }
 0x7e4   : > { %v1541_v33 = vpop.permute.xlu1 %1540 }
 0x7e5   : > { %v1545_v32 = vmul.f32 %v4068_v47, %v1541_v33 }
 0x7e6   : > { %1653 = vrot.lane.b32.xlu1 %v2346_v55, %s2527_s21 }
 0x7e7   : > { %1584 = vrot.lane.b32.xlu2 %v2340_v26, %s2526_s30  ;;  %1563 = vrot.lane.b32.xlu0 %v2339_v0, %s2523_s17 }
 0x7ec   : > { %v1714_v36 = vpop.permute.xlu1 %1713 }
 0x7ed   : > { %v1718_v54 = vmul.f32 %v4081_v40, %v1714_v36 }
 0x7ee   : > { %1828 = vrot.lane.b32.xlu1 %v2366_v6, %s2527_s21 }
 0x7ef   : > { %1759 = vrot.lane.b32.xlu2 %v2360_v8, %s2526_s30  ;;  %1586 = vrot.lane.b32.xlu0 %v2341_v52, %s2526_s30 }
 0x7f4   : > { %v1712_v45 = vpop.permute.xlu1 %1711 }
 0x7f6   : > { %1676 = vrot.lane.b32.xlu1 %v2348_v62, %s2525_s29 }
 0x7f7   : > { %1457 = vrot.lane.b32.xlu2 %v2325_v30, %s2524_s24  ;;  %1886 = vrot.lane.b32.xlu0 %v2375_v16, %s2522_s14  ;;  %v2367_v30 = vld [vmem:[%s4340_s1 + $0x370] sm:$0xff] }
 0x7fe   : > { %1976 = vrot.lane.b32.xlu1 %v2382_v9, %s2524_s24 }
 0x7ff   : > { %1632 = vrot.lane.b32.xlu2 %v2345_v59, %s2524_s24  ;;  %1609 = vrot.lane.b32.xlu0 %v2343_v49, %s2521_s13  ;;  %v4129_v59 = vld [vmem:[%s3415_s20 + $0x60] sm:$0xff] }
 0x806   : > { %1999 = vrot.lane.b32.xlu1 %v2384_v5, %s2527_s21 }
 0x807   : > { %1907 = vrot.lane.b32.xlu2 %v2376_v50, %s2523_s17  ;;  %1884 = vrot.lane.b32.xlu0 %v2374_v56, %s2522_s14  ;;  %v1717_v50 = vmul.f32 %v4129_v59, %v1712_v45  ;;  %v2386_v56 = vld [vmem:[%s4340_s1 + $0x3f0] sm:$0xff] }
 0x80e   : > { %1550 = vrot.lane.b32.xlu1 %v1545_v32, %s2530_s25 }
 0x80f   : > { %1505 = vrot.lane.b32.xlu2 %v2330_v22, %s2525_s29  ;;  %1482 = vrot.lane.b32.xlu0 %v2328_v58, %s2527_s21 }
 0x811   : > { %v1401_v44 = vpop.permute.xlu2 %1400 }
 0x812   : > { %v1405_v20 = vadd.f32 %v1401_v44, %v1382_v4  ;;  %v4148_v44 = vld [vmem:[%s3415_s20 + $0x78] sm:$0xff] }
 0x816   : > { %1723 = vrot.lane.b32.xlu1 %v1718_v54, %s2530_s25 }
 0x817   : > { %1780 = vrot.lane.b32.xlu2 %v2361_v19, %s2521_s13  ;;  %1757 = vrot.lane.b32.xlu0 %v2359_v51, %s2526_s30 }
 0x818   : > { %v1460_v2 = vpop.permute.xlu1 %1459 }
 0x819   : > { %v1422_v61 = vpop.permute.xlu2 %1421  ;;  %v1464_v58 = vmul.f32 %v3838_v43, %v1460_v2 }
 0x81a   : > { %v1427_v41 = vadd.f32 %v1422_v61, %v3920_v14  ;;  %v2385_v14 = vld [vmem:[%s4340_s1 + $0x3e8] sm:$0xff] }
 0x81f   : > { %1955 = vrot.lane.b32.xlu2 %v2381_v12, %s2521_s13  ;;  %1932 = vrot.lane.b32.xlu0 %v2379_v60, %s2526_s30 }
 0x820   : > { %v1735_v26 = vpop.permute.xlu1 %1734 }
 0x821   : > { %v1437_v3 = vpop.permute.xlu2 %1436  ;;  %v1740_v61 = vmul.f32 %v4129_v59, %v1735_v26 }
 0x822   : > { %v1441_v53 = vmul.f32 %v3838_v43, %v1437_v3 }
 0x827   : > { %1678 = vrot.lane.b32.xlu2 %v2349_v38, %s2525_s29  ;;  %1630 = vrot.lane.b32.xlu0 %v2344_v28, %s2524_s24  ;;  %v4165_v38 = vld [vmem:[%s3415_s20 + $0x70] sm:$0xff] }
 0x828   : > { %v1910_v16 = vpop.permute.xlu1 %1909 }
 0x829   : > { %v1539_v42 = vpop.permute.xlu2 %1538  ;;  %v1914_v9 = vmul.f32 %v4148_v44, %v1910_v16 }
 0x82a   : > { %v1544_v0 = vmul.f32 %v4106_v18, %v1539_v42 }
 0x82f   : > { %1953 = vrot.lane.b32.xlu2 %v2380_v57, %s2521_s13  ;;  %1805 = vrot.lane.b32.xlu0 %v2364_v17, %s2524_s24  ;;  %s2396_s13 = sshll.u32 %s2518_s4, 5  ;;  %s661_s4 = sadd.s32 1, %s2518_s4  }
 0x830   : > { %v1608_v21 = vpop.permute.xlu1 %1607  ;;  %s2225_s17 = scalar_lea.vmem [#allocation2], %s2396_s13  ;;  %p658_p0 = scmp.ge.s32.totalorder %s661_s4, 31  }
 0x831   : > { %v1562_v25 = vpop.permute.xlu2 %1561  ;;  %v1613_v57 = vmul.f32 %v4106_v18, %v1608_v21  ;;  %s2189_s3 = sshll.u32 (%p658_p0), %s4344_s5, 4  ;;  %s2536_s6 = smov (%p658_p0), [#allocation2]   ;;  %s2190_s3 = int_to_ptr.hbm [resolvable:$true] %s2189_s3 }
 0x832   :  { %s2187_s30 = sshll.u32 (%p658_p0), %s2536_s6, 4  ;;  %s2537_s7 = smov (%p658_p0), 128   ;;  %s2188_s30 = int_to_ptr.vmem [resolvable:$true] %s2187_s30 }
 0x837   : > { %1826 = vrot.lane.b32.xlu2 %v2365_v24, %s2527_s21  ;;  %1503 = vrot.lane.b32.xlu0 %v2329_v63, %s2525_s29 }
 0x839   : > { %v1737_v15 = vpop.permute.xlu2 %1736 }
 0x83a   : > { %v1741_v33 = vmul.f32 %v4081_v40, %v1737_v15 }
 0x83f   : > { %2001 = vrot.lane.b32.xlu2 %v2385_v14, %s2527_s21  ;;  %1803 = vrot.lane.b32.xlu0 %v2363_v11, %s2524_s24  ;;  %s2538_s21 = smov (%p658_p0), 8  }
 0x841   : > { %v4095_v1 = vpop.permute.xlu2 %1584 }
 0x842   : > { %v1590_v36 = vmul.f32 %v4106_v18, %v4095_v1 }
 0x847   : > { %2024 = vrot.lane.b32.xlu2 %v2387_v34, %s2525_s29  ;;  %1978 = vrot.lane.b32.xlu0 %v2383_v23, %s2524_s24 }
 0x849   : > { %v4108_v27 = vpop.permute.xlu2 %1759  ;;  %v1424_v31 = vpop.permute.xlu0 %1423 }
 0x84a   : > { %v4110_v48 = vadd.f32 %v1424_v31, %v1405_v20  ;;  %v1783_v20 = vpop.permute.xlu1 %1782  ;;  %v1764_v45 = vmul.f32 %v4081_v40, %v4108_v27 }
 0x84b   : > { %v1787_v63 = vmul.f32 %v4081_v40, %v1783_v20 }
 0x84f   : > { %1548 = vrot.lane.b32.xlu2 %v1544_v0, %s2530_s25  ;;  %1851 = vrot.lane.b32.xlu0 %v2368_v46, %s2525_s29 }
 0x851   : > { %v4118_v8 = vpop.permute.xlu2 %1457  ;;  %v1445_v52 = vpop.permute.xlu0 %1444 }
 0x852   : > { %v4120_v29 = vadd.f32 %v1445_v52, %v1427_v41  ;;  %v1567_v41 = vmul.f32 %v4106_v18, %v1562_v25  ;;  %v1481_v3 = vpop.permute.xlu1 %1480  ;;  %v1463_v1 = vmul.f32 %v3806_v13, %v4118_v8 }
 0x853   : > { %v1486_v2 = vmul.f32 %v3806_v13, %v1481_v3 }
 0x857   : > { %1446 = vrot.lane.b32.xlu2 %v1441_v53, %s2529_s23  ;;  %1849 = vrot.lane.b32.xlu0 %v2367_v30, %s2525_s29 }
 0x859   : > { %v4131_v49 = vpop.permute.xlu2 %1632  ;;  %v1564_v37 = vpop.permute.xlu0 %1563 }
 0x85a   : > { %v1568_v4 = vmul.f32 %v4068_v47, %v1564_v37  ;;  %v1656_v17 = vpop.permute.xlu1 %1655  ;;  %v1637_v0 = vmul.f32 %v4068_v47, %v4131_v49 }
 0x85b   : > { %v1660_v26 = vmul.f32 %v4068_v47, %v1656_v17 }
 0x85f   : > { %2022 = vrot.lane.b32.xlu0 %v2386_v56, %s2525_s29  ;;  %1721 = vrot.lane.b32.xlu2 %v1717_v50, %s2530_s25 }
 0x861   : > { %v4139_v55 = vpop.permute.xlu2 %1907  ;;  %v1587_v10 = vpop.permute.xlu0 %1586 }
 0x862   : > { %v1591_v22 = vmul.f32 %v4068_v47, %v1587_v10  ;;  %v1931_v54 = vpop.permute.xlu1 %1930  ;;  %v1913_v53 = vmul.f32 %v4165_v38, %v4139_v55 }
 0x863   : > { %v1936_v16 = vmul.f32 %v4165_v38, %v1931_v54 }
 0x864   : > { %1596 = vrot.lane.b32.xlu1 %v1591_v22, %s2533_s27 }
 0x867   : > { %1573 = vrot.lane.b32.xlu0 %v1568_v4, %s2528_s22  ;;  %1469 = vrot.lane.b32.xlu2 %v1464_v58, %s2531_s26 }
 0x869   : > { %v4150_v6 = vpop.permute.xlu2 %1505  ;;  %v1887_v19 = vpop.permute.xlu0 %1886 }
 0x86a   : > { %v1891_v51 = vmul.f32 %v4148_v44, %v1887_v19  ;;  %v1654_v34 = vpop.permute.xlu1 %1653  ;;  %v1510_v10 = vmul.f32 %v3838_v43, %v4150_v6 }
 0x86b   : > { %v1659_v56 = vmul.f32 %v4106_v18, %v1654_v34 }
 0x86c   : > { %1896 = vrot.lane.b32.xlu1 %v1891_v51, %s2530_s25 }
 0x86f   : > { %1571 = vrot.lane.b32.xlu0 %v1567_v41, %s2528_s22  ;;  %1744 = vrot.lane.b32.xlu2 %v1740_v61, %s2528_s22 }
 0x871   : > { %v4158_v62 = vpop.permute.xlu2 %1780  ;;  %v1610_v12 = vpop.permute.xlu0 %1609 }
 0x872   : > { %v1614_v60 = vmul.f32 %v4068_v47, %v1610_v12  ;;  %v1829_v30 = vpop.permute.xlu1 %1828  ;;  %v1786_v20 = vmul.f32 %v4129_v59, %v4158_v62 }
 0x873   : > { %v1833_v4 = vmul.f32 %v4081_v40, %v1829_v30 }
 0x874   : > { %1619 = vrot.lane.b32.xlu1 %v1614_v60, %s2529_s23 }
 0x877   : > { %1746 = vrot.lane.b32.xlu0 %v1741_v33, %s2528_s22  ;;  %1919 = vrot.lane.b32.xlu2 %v1914_v9, %s2528_s22  ;;  %v2353_v33 = vld [vmem:[%s4340_s1 + $0x300] sm:$0xff] }
 0x879   : > { %v4169_v28 = vpop.permute.xlu2 %1955  ;;  %v1885_v42 = vpop.permute.xlu0 %1884 }
 0x87a   : > { %v1890_v5 = vmul.f32 %v4165_v38, %v1885_v42  ;;  %v1677_v21 = vpop.permute.xlu1 %1676  ;;  %v1960_v41 = vmul.f32 %v4148_v44, %v4169_v28 }
 0x87c   : > { %1894 = vrot.lane.b32.xlu1 %v1890_v5, %s2530_s25 }
 0x87f   : > { %1594 = vrot.lane.b32.xlu0 %v1590_v36, %s2533_s27  ;;  %1617 = vrot.lane.b32.xlu2 %v1613_v57, %s2529_s23 }
 0x881   : > { %v4178_v32 = vpop.permute.xlu2 %1678  ;;  %v1483_v25 = vpop.permute.xlu0 %1482 }
 0x882   : > { %v1487_v24 = vmul.f32 %v3838_v43, %v1483_v25  ;;  %v1977_v19 = vpop.permute.xlu1 %1976  ;;  %v1683_v9 = vmul.f32 %v4068_v47, %v4178_v32  ;;  %v1704_v25 = vmul.f32 %v2353_v33, %v4129_v59 }
 0x884   : > { %1492 = vrot.lane.b32.xlu1 %v1487_v24, %s2534_s28 }
 0x887   : > { %1769 = vrot.lane.b32.xlu0 %v1764_v45, %s2533_s27  ;;  %1792 = vrot.lane.b32.xlu2 %v1787_v63, %s2529_s23 }
 0x889   : > { %v4187_v15 = vpop.permute.xlu2 %1953  ;;  %v1758_v14 = vpop.permute.xlu0 %1757 }
 0x88a   : > { %v1763_v11 = vmul.f32 %v4129_v59, %v1758_v14  ;;  %v2000_v62 = vpop.permute.xlu1 %1999  ;;  %v1959_v32 = vmul.f32 %v4165_v38, %v4187_v15  ;;  %v2335_v15 = vld [vmem:[%s4340_s1 + $0x288] sm:$0xff] }
 0x88b   : > { %v2005_v36 = vmul.f32 %v4165_v38, %v2000_v62 }
 0x88c   : > { %1767 = vrot.lane.b32.xlu1 %v1763_v11, %s2533_s27 }
 0x88f   : > { %1467 = vrot.lane.b32.xlu0 %v1463_v1, %s2531_s26  ;;  %1490 = vrot.lane.b32.xlu2 %v1486_v2, %s2534_s28 }
 0x891   : > { %v4196_v23 = vpop.permute.xlu2 %1826  ;;  %v1933_v27 = vpop.permute.xlu0 %1932 }
 0x892   : > { %v1937_v31 = vmul.f32 %v4148_v44, %v1933_v27  ;;  %v1551_v17 = vpop.permute.xlu1 %1550  ;;  %v1832_v2 = vmul.f32 %v4129_v59, %v4196_v23  ;;  %v2373_v23 = vld [vmem:[%s4340_s1 + $0x388] sm:$0xff] }
 0x894   : > { %1942 = vrot.lane.b32.xlu1 %v1937_v31, %s2533_s27  ;;  %v1532_v31 = vmul.f32 %v2335_v15, %v4068_v47 }
 0x897   : > { %1642 = vrot.lane.b32.xlu0 %v1637_v0, %s2531_s26  ;;  %1665 = vrot.lane.b32.xlu2 %v1660_v26, %s2534_s28 }
 0x899   : > { %v4205_v46 = vpop.permute.xlu2 %2001  ;;  %v1631_v8 = vpop.permute.xlu0 %1630 }
 0x89a   : > { %v1636_v52 = vmul.f32 %v4106_v18, %v1631_v8  ;;  %v1724_v11 = vpop.permute.xlu1 %1723  ;;  %v2006_v26 = vmul.f32 %v4148_v44, %v4205_v46  ;;  %v2334_v8 = vld [vmem:[%s4340_s1 + $0x280] sm:$0xff] }
 0x89c   : > { %1640 = vrot.lane.b32.xlu1 %v1636_v52, %s2531_s26 }
 0x89f   : > { %1917 = vrot.lane.b32.xlu0 %v1913_v53, %s2528_s22  ;;  %1940 = vrot.lane.b32.xlu2 %v1936_v16, %s2533_s27  ;;  %v1878_v16 = vmul.f32 %v2373_v23, %v4148_v44  ;;  %v1531_v53 = vmul.f32 %v2334_v8, %v4106_v18  ;;  %v2372_v8 = vld [vmem:[%s4340_s1 + $0x380] sm:$0xff] }
 0x8a1   : > { %v4214_v49 = vpop.permute.xlu2 %2024  ;;  %v1806_v37 = vpop.permute.xlu0 %1805 }
 0x8a2   : > { %v1810_v50 = vmul.f32 %v4081_v40, %v1806_v37  ;;  %v2029_v37 = vmul.f32 %v4148_v44, %v4214_v49 }
 0x8a4   : > { %1815 = vrot.lane.b32.xlu1 %v1810_v50, %s2531_s26 }
 0x8a7   : > { %1515 = vrot.lane.b32.xlu0 %v1510_v10, %s2532_s2  ;;  %1663 = vrot.lane.b32.xlu2 %v1659_v56, %s2534_s28  ;;  %v2354_v10 = vld [vmem:[%s4340_s1 + $0x308] sm:$0xff] }
 0x8a9   : > { %v4223_v55 = vpop.permute.xlu2 %1548  ;;  %v1504_v22 = vpop.permute.xlu0 %1503 }
 0x8aa   : > { %v1509_v58 = vmul.f32 %v3806_v13, %v1504_v22  ;;  %v1682_v13 = vmul.f32 %v4106_v18, %v1677_v21  ;;  %v1554_v21 = vadd.f32 %v4223_v55, %v1531_v53  ;;  %v1705_v18 = vmul.f32 %v2354_v10, %v4081_v40 }
 0x8ac   : > { %1513 = vrot.lane.b32.xlu1 %v1509_v58, %s2532_s2 }
 0x8af   : > { %1790 = vrot.lane.b32.xlu0 %v1786_v20, %s2529_s23  ;;  %1838 = vrot.lane.b32.xlu2 %v1833_v4, %s2534_s28 }
 0x8b1   : > { %v1447_v43 = vpop.permute.xlu2 %1446  ;;  %v1804_v6 = vpop.permute.xlu0 %1803 }
 0x8b2   : > { %v1451_v51 = vadd.f32 %v1447_v43, %v4110_v48  ;;  %v1809_v61 = vmul.f32 %v4129_v59, %v1804_v6  ;;  %v1982_v48 = vmul.f32 %v4165_v38, %v1977_v19 }
 0x8b4   : > { %1813 = vrot.lane.b32.xlu1 %v1809_v61, %s2531_s26 }
 0x8b7   : > { %1965 = vrot.lane.b32.xlu0 %v1960_v41, %s2529_s23  ;;  %1686 = vrot.lane.b32.xlu2 %v1682_v13, %s2532_s2 }
 0x8b9   : > { %v1979_v12 = vpop.permute.xlu0 %1978  ;;  %v1722_v60 = vpop.permute.xlu2 %1721 }
 0x8ba   : > { %v1983_v3 = vmul.f32 %v4148_v44, %v1979_v12  ;;  %v1727_v24 = vadd.f32 %v1722_v60, %v1704_v25  ;;  %v1728_v44 = vadd.f32 %v1724_v11, %v1705_v18 }
 0x8bc   : > { %1988 = vrot.lane.b32.xlu1 %v1983_v3, %s2531_s26 }
 0x8bf   : > { %1688 = vrot.lane.b32.xlu0 %v1683_v9, %s2532_s2  ;;  %1986 = vrot.lane.b32.xlu2 %v1982_v48, %s2531_s26 }
 0x8c1   : > { %v1852_v28 = vpop.permute.xlu0 %1851  ;;  %v1470_v42 = vpop.permute.xlu2 %1469 }
 0x8c2   : > { %v1856_v5 = vmul.f32 %v4081_v40, %v1852_v28  ;;  %v1474_v57 = vadd.f32 %v1470_v42, %v1451_v51 }
 0x8c4   : > { %1861 = vrot.lane.b32.xlu1 %v1856_v5, %s2532_s2 }
 0x8c7   : > { %1963 = vrot.lane.b32.xlu0 %v1959_v32, %s2529_s23  ;;  %2009 = vrot.lane.b32.xlu2 %v2005_v36, %s2534_s28 }
 0x8c9   : > { %v1850_v63 = vpop.permute.xlu0 %1849  ;;  %v1745_v45 = vpop.permute.xlu2 %1744 }
 0x8ca   : > { %v1855_v54 = vmul.f32 %v4129_v59, %v1850_v63  ;;  %v4259_v14 = vadd.f32 %v1745_v45, %v1727_v24  ;;  %v1555_v59 = vadd.f32 %v1551_v17, %v1532_v31 }
 0x8cc   : > { %1859 = vrot.lane.b32.xlu1 %v1855_v54, %s2532_s2 }
 0x8cf   : > { %1836 = vrot.lane.b32.xlu0 %v1832_v2, %s2534_s28 }
 0x8d1   : > { %v2023_v1 = vpop.permute.xlu0 %2022  ;;  %v1920_v34 = vpop.permute.xlu2 %1919 }
 0x8d2   : > { %v2028_v27 = vmul.f32 %v4165_v38, %v2023_v1 }
 0x8d4   : > { %2032 = vrot.lane.b32.xlu1 %v2028_v27, %s2532_s2 }
 0x8d6   : > { %v1597_v0 = vpop.permute.xlu1 %1596 }
 0x8d7   : > { %2011 = vrot.lane.b32.xlu0 %v2006_v26, %s2534_s28 }
 0x8d9   : > { %v1574_v52 = vpop.permute.xlu0 %1573  ;;  %v1618_v30 = vpop.permute.xlu2 %1617 }
 0x8da   : > { %v1578_v47 = vadd.f32 %v1574_v52, %v1555_v59 }
 0x8dc   : > { %v1601_v46 = vadd.f32 %v1597_v0, %v1578_v47 }
 0x8de   : > { %v1897_v50 = vpop.permute.xlu1 %1896 }
 0x8df   : > { %v1901_v56 = vadd.f32 %v1897_v50, %v1878_v16  ;;  %2034 = vrot.lane.b32.xlu0 %v2029_v37, %s2532_s2 }
 0x8e1   : > { %v1572_v22 = vpop.permute.xlu0 %1571  ;;  %v4289_v58 = vadd.f32 %v1920_v34, %v1901_v56  ;;  %v1793_v20 = vpop.permute.xlu2 %1792 }
 0x8e2   : > { %v1577_v4 = vadd.f32 %v1572_v22, %v1554_v21 }
 0x8e6   : > { %v1620_v19 = vpop.permute.xlu1 %1619 }
 0x8e7   : > { %v1624_v43 = vadd.f32 %v1620_v19, %v1601_v46 }
 0x8e9   : > { %v1747_v49 = vpop.permute.xlu0 %1746  ;;  %v1491_v51 = vpop.permute.xlu2 %1490 }
 0x8ea   : > { %v1751_v6 = vadd.f32 %v1747_v49, %v1728_v44 }
 0x8ee   : > { %v1895_v61 = vpop.permute.xlu1 %1894 }
 0x8f1   : > { %v1595_v13 = vpop.permute.xlu0 %1594  ;;  %v1666_v62 = vpop.permute.xlu2 %1665 }
 0x8f2   : > { %v1600_v55 = vadd.f32 %v1595_v13, %v1577_v4 }
 0x8f4   : > { %v1623_v41 = vadd.f32 %v1618_v30, %v1600_v55 }
 0x8f6   : > { %v1493_v12 = vpop.permute.xlu1 %1492 }
 0x8f7   : > { %v1497_v60 = vadd.f32 %v1493_v12, %v1474_v57 }
 0x8f9   : > { %v1770_v3 = vpop.permute.xlu0 %1769  ;;  %v1941_v33 = vpop.permute.xlu2 %1940 }
 0x8fa   : > { %v1774_v48 = vadd.f32 %v1770_v3, %v1751_v6 }
 0x8fc   : > { %v1797_v30 = vadd.f32 %v1793_v20, %v1774_v48 }
 0x8fe   : > { %v1768_v9 = vpop.permute.xlu1 %1767 }
 0x901   : > { %v1468_v28 = vpop.permute.xlu0 %1467  ;;  %v1664_v17 = vpop.permute.xlu2 %1663 }
 0x902   : > { %v1473_v40 = vadd.f32 %v1468_v28, %v4120_v29 }
 0x904   : > { %v1496_v15 = vadd.f32 %v1491_v51, %v1473_v40 }
 0x906   : > { %v1943_v42 = vpop.permute.xlu1 %1942 }
 0x907   : > { %v1947_v28 = vadd.f32 %v1943_v42, %v4289_v58  ;;  %v4358_v58 = vld [vmem:[#allocation5_spill] sm:$0xff]  ;;  %v4359_v42 = vld [vmem:[#allocation7_spill] sm:$0xff] }
 0x909   : > { %v1643_v5 = vpop.permute.xlu0 %1642  ;;  %v1839_v24 = vpop.permute.xlu2 %1838 }
 0x90a   : > { %v1647_v36 = vadd.f32 %v1643_v5, %v1624_v43  ;;  %v1773_v43 = vadd.f32 %v1768_v9, %v4259_v14 }
 0x90c   : > { %v1670_v47 = vadd.f32 %v1666_v62, %v1647_v36  ;;  %v4357_v36 = vld [vmem:[#allocation6_spill] sm:$0xff] }
 0x90e   : > { %v1641_v25 = vpop.permute.xlu1 %1640 }
 0x90f   : > { %v1646_v45 = vadd.f32 %v1641_v25, %v1623_v41 }
 0x911   : > { %v1918_v32 = vpop.permute.xlu0 %1917  ;;  %v1669_v2 = vadd.f32 %v1664_v17, %v1646_v45  ;;  %v1687_v1 = vpop.permute.xlu2 %1686  ;;  %v4361_v45 = vld [vmem:[#allocation8_spill] sm:$0xff] }
 0x913   : > { %v1692_v31 = vadd.f32 %v1687_v1, %v1669_v2 }
 0x916   : > { %v1816_v63 = vpop.permute.xlu1 %1815 }
 0x917   : > { %v1820_v16 = vadd.f32 %v1816_v63, %v1797_v30 }
 0x919   : > { %v1516_v54 = vpop.permute.xlu0 %1515  ;;  %v1843_v56 = vadd.f32 %v1839_v24, %v1820_v16  ;;  %v1987_v18 = vpop.permute.xlu2 %1986 }
 0x91a   : > { %v1520_v11 = vadd.f32 %v1516_v54, %v1497_v60 }
 0x91c   : > { %v1522_v57 = vadd.f32 %v1520_v11, %v3885_v35  ;;  %v1877_v35 = vmul.f32 %v2372_v8, %v4165_v38 }
 0x91e   : > { %v1514_v34 = vpop.permute.xlu1 %1513  ;;  %v1900_v50 = vadd.f32 %v1895_v61, %v1877_v35 }
 0x91f   : > { %v1519_v27 = vadd.f32 %v1514_v34, %v1496_v15  ;;  %v4362_v15 = vld [vmem:[#allocation9_spill] sm:$0xff] }
 0x920   : > { %v1923_v21 = vadd.f32 %v1918_v32, %v1900_v50  ;;  %v4360_v32 = vld [vmem:[#allocation11_spill] sm:$0xff] }
 0x921   : > { %v1521_v29 = vadd.f32 %v1519_v27, %v3834_v39  ;;  %v1791_v26 = vpop.permute.xlu0 %1790  ;;  %v2010_v55 = vpop.permute.xlu2 %2009  ;;  %v4363_v27 = vld [vmem:[#allocation10_spill] sm:$0xff] }
 0x922   : > { %v1946_v19 = vadd.f32 %v1941_v33, %v1923_v21  ;;  %v1796_v20 = vadd.f32 %v1791_v26, %v1773_v43 }
 0x923   : > { %v1694_v0 = vadd.f32 %v1692_v31, %v1521_v29 }
 0x926   : > { %v1814_v59 = vpop.permute.xlu1 %1813 }
 0x927   : > { %v1819_v6 = vadd.f32 %v1814_v59, %v1796_v20 }
 0x929   : > { %v1966_v23 = vpop.permute.xlu0 %1965 }
 0x92a   : > { %v1970_v33 = vadd.f32 %v1966_v23, %v1947_v28 }
 0x92e   : > { %v1989_v52 = vpop.permute.xlu1 %1988 }
 0x92f   : > { %v1993_v40 = vadd.f32 %v1989_v52, %v1970_v33 }
 0x931   : > { %v1689_v53 = vpop.permute.xlu0 %1688 }
 0x932   : > { %v1693_v46 = vadd.f32 %v1689_v53, %v1670_v47 }
 0x934   : > { %v1695_v37 = vadd.f32 %v1693_v46, %v1522_v57 }
 0x936   : > { %v1862_v39 = vpop.permute.xlu1 %1861 }
 0x937   : > { %v1866_v10 = vadd.f32 %v1862_v39, %v1843_v56 }
 0x939   : > { %v1868_v22 = vadd.f32 %v1866_v10, %v1695_v37  ;;  %v1964_v4 = vpop.permute.xlu0 %1963 }
 0x93a   : > { %v1969_v44 = vadd.f32 %v1964_v4, %v1946_v19 }
 0x93c   : > { %v1992_v38 = vadd.f32 %v1987_v18, %v1969_v44 }
 0x93e   : > { %v1860_v49 = vpop.permute.xlu1 %1859  ;;  %v2015_v61 = vadd.f32 %v2010_v55, %v1992_v38 }
 0x941   : > { %v1837_v51 = vpop.permute.xlu0 %1836 }
 0x942   : > { %v1842_v13 = vadd.f32 %v1837_v51, %v1819_v6 }
 0x944   : > { %v1865_v41 = vadd.f32 %v1860_v49, %v1842_v13 }
 0x946   : > { %v2033_v62 = vpop.permute.xlu1 %2032  ;;  %v1867_v12 = vadd.f32 %v1865_v41, %v1694_v0 }
 0x947   : > { %v2038_v60 = vadd.f32 %v2033_v62, %v2015_v61 }
 0x949   : > { %v2040_v3 = vadd.f32 %v2038_v60, %v1867_v12  ;;  %v2012_v48 = vpop.permute.xlu0 %2011 }
 0x94a   : > { %v2016_v14 = vadd.f32 %v2012_v48, %v1993_v40 }
 0x951   : > { %v2035_v9 = vpop.permute.xlu0 %2034 }
 0x952   : > { %v2039_v5 = vadd.f32 %v2035_v9, %v2016_v14 }
 0x954   : > { %v2041_v17 = vadd.f32 %v2039_v5, %v1868_v22 }
 0x956   : > { %2068 = vmatpush.msra.mxu0 %v2041_v17  ;;  %2401 = vmatpush.msra.mxu1 %v2041_v17 }
 0x957   : > { %2402 = vmatpush.msra.mxu2 %v2041_v17  ;;  %2403 = vmatpush.msra.mxu3 %v2041_v17 }
 0x958   : > { %2069 = vmatpush.msra.mxu0 %v2040_v3  ;;  %2404 = vmatpush.msra.mxu1 %v2040_v3 }
 0x959   : > { %2405 = vmatpush.msra.mxu2 %v2040_v3  ;;  %2406 = vmatpush.msra.mxu3 %v2040_v3 }
 0x95a   : > { %2389 = vmatmul.msk.f32.vlgmr.msra.gmra.mxu1 %vm37_vm0, %v2592_v7  ;;  %2390 = vmatmul.msk.f32.vlgmr.msra.gmra.mxu2 %vm37_vm0, %v4357_v36 }
 0x95b   : > { %2388 = vmatmul.msk.f32.vlgmr.msra.gmra.mxu0 %vm37_vm0, %v4358_v58  ;;  %2391 = vmatmul.msk.f32.vlgmr.msra.gmra.mxu3 %vm37_vm0, %v4359_v42 }
 0x9d7   : > { %v2074_v25 = vpop.f32.mrf.mxu1 }
 0x9d8   : > { %v2075_v24 = vadd.f32 %v2074_v25, %v4360_v32  ;;  %v2071_v63 = vpop.f32.mrf.mxu0 }
 0x9d9   : > { %v2072_v54 = vadd.f32 %v2071_v63, %v4361_v45 }
 0x9da   : > { %v2393_v11 = vmul.f32 -1.442695, %v2075_v24 }
 0x9db   : > { %v2392_v57 = vmul.f32 -1.442695, %v2072_v54 }
 0x9dc   : > { %2470 = vpow2.f32 %v2393_v11 }
 0x9dd   : > { %v2077_v2 = vpop.f32.mrf.mxu2  ;;  %2472 = vpow2.f32 %v2392_v57 }
 0x9de   : > { %v2078_v1 = vadd.f32 %v2077_v2, %v4362_v15  ;;  %v2080_v34 = vpop.f32.mrf.mxu3 }
 0x9df   : > { %v2081_v31 = vadd.f32 %v2080_v34, %v4363_v27 }
 0x9e0   : > { %v2394_v29 = vmul.f32 -1.442695, %v2078_v1 }
 0x9e1   : > { %v2395_v26 = vmul.f32 -1.442695, %v2081_v31 }
 0x9e2   : > { %v2471_v0 = vpop.eup %2470  ;;  %2474 = vpow2.f32 %v2394_v29 }
 0x9e3   : > { %v2473_v59 = vpop.eup %2472  ;;  %v2096_v23 = vadd.f32 1.0, %v2471_v0  ;;  %2476 = vpow2.f32 %v2395_v26 }
 0x9e4   : > { %v2095_v8 = vadd.f32 1.0, %v2473_v59 }
 0x9e5   : > { %2478 = vrcp.f32 %v2096_v23  ;;  %v2123_v37 = vand.u32 2147483647, %v2096_v23  ;;  %v2125_v50 = vand.u32 2147483648, %v2096_v23  ;;  %vm2119_vm11 = vweird.f32 %v2096_v23 }
 0x9e6   : > { %2480 = vrcp.f32 %v2095_v8  ;;  %v2108_v21 = vand.u32 2147483647, %v2095_v8  ;;  %v2110_v10 = vand.u32 2147483648, %v2095_v8  ;;  %vm2104_vm9 = vweird.f32 %v2095_v8 }
 0x9e7   : > { %vm4313_vm13 = vcmp.eq.f32.partialorder %v2123_v37, 8.507059e+37  ;;  %v2126_v43 = vor.u32 1.1754944e-38, %v2125_v50 }
 0x9e8   : > { %v2475_v52 = vpop.eup %2474  ;;  %vm4321_vm15 = vcmp.eq.f32.partialorder %v2108_v21, 8.507059e+37  ;;  %v2111_v13 = vor.u32 1.1754944e-38, %v2110_v10 }
 0x9e9   : > { %v2477_v30 = vpop.eup %2476  ;;  %v2097_v47 = vadd.f32 1.0, %v2475_v52 }
 0x9ea   : > { %v2098_v35 = vadd.f32 1.0, %v2477_v30 }
 0x9eb   : > { %v2479_v16 = vpop.eup %2478  ;;  %2482 = vrcp.f32 %v2097_v47  ;;  %v2140_v55 = vand.u32 2147483648, %v2097_v47  ;;  %v2138_v14 = vand.u32 2147483647, %v2097_v47  ;;  %vm2134_vm5 = vweird.f32 %v2097_v47 }
 0x9ec   : > { %v2481_v53 = vpop.eup %2480  ;;  %2484 = vrcp.f32 %v2098_v35  ;;  %v2115_v46 = vmul.f32 %v2479_v16, %v2096_v23  ;;  %vm2120_vm12 = vweird.f32 %v2479_v16  ;;  %vm2149_vm2 = vweird.f32 %v2098_v35 }
 0x9ed   : > { %v2100_v56 = vmul.f32 %v2481_v53, %v2095_v8  ;;  %vm2105_vm10 = vweird.f32 %v2481_v53  ;;  %vm2121_vm1 = vmor %vm2119_vm11, %vm2120_vm12  ;;  %v2153_v60 = vand.u32 2147483647, %v2098_v35  ;;  %v2155_v3 = vand.u32 2147483648, %v2098_v35 }
 0x9ee   : > { %v2116_v39 = vsub.f32 1.0, %v2115_v46  ;;  %vm4317_vm14 = vmor %vm2104_vm9, %vm2105_vm10  ;;  %v2141_v58 = vor.u32 1.1754944e-38, %v2140_v55  ;;  %vm2139_vm9 = vcmp.eq.f32.partialorder %v2138_v14, 8.507059e+37  ;;  %vm2178_vm10 = vcmask 334928  }
 0x9ef   : > { %v2101_v22 = vsub.f32 1.0, %v2100_v56  ;;  %v2156_v36 = vor.u32 1.1754944e-38, %v2155_v3  ;;  %vm2154_vm8 = vcmp.eq.f32.partialorder %v2153_v60, 8.507059e+37 }
 0x9f0   : > { %v2117_v4 = vmul.f32 %v2479_v16, %v2116_v39 }
 0x9f1   : > { %v2483_v18 = vpop.eup %2482  ;;  %v2102_v44 = vmul.f32 %v2481_v53, %v2101_v22 }
 0x9f2   : > { %v2485_v20 = vpop.eup %2484  ;;  %v2118_v49 = vadd.f32 %v2479_v16, %v2117_v4  ;;  %v2130_v6 = vmul.f32 %v2483_v18, %v2097_v47  ;;  %vm2135_vm4 = vweird.f32 %v2483_v18 }
 0x9f3   : > { %v2103_v41 = vadd.f32 %v2481_v53, %v2102_v44  ;;  %v2145_v61 = vmul.f32 %v2485_v20, %v2098_v35  ;;  %vm2150_vm3 = vweird.f32 %v2485_v20  ;;  %vm2136_vm7 = vmor %vm2134_vm5, %vm2135_vm4 }
 0x9f4   : > { %v2122_v62 = vsel %vm2121_vm1, %v2479_v16, %v2118_v49  ;;  %v2131_v12 = vsub.f32 1.0, %v2130_v6  ;;  %vm2151_vm6 = vmor %vm2149_vm2, %vm2150_vm3 }
 0x9f5   : > { %v2127_v48 = vsel %vm4313_vm13, %v2126_v43, %v2122_v62  ;;  %v2107_v28 = vsel %vm4317_vm14, %v2481_v53, %v2103_v41  ;;  %v2146_v33 = vsub.f32 1.0, %v2145_v61 }
 0x9f6   : > { %2166 = vrot.lane.b32.xlu0 %v2127_v48, %s2535_s18  ;;  %v2132_v40 = vmul.f32 %v2483_v18, %v2131_v12  ;;  %v2112_v9 = vsel %vm4321_vm15, %v2111_v13, %v2107_v28 }
 0x9f7   : > { %2164 = vrot.lane.b32.xlu2 %v2112_v9, %s2535_s18  ;;  %v2147_v5 = vmul.f32 %v2485_v20, %v2146_v33 }
 0x9f8   : > { %v2133_v17 = vadd.f32 %v2483_v18, %v2132_v40 }
 0x9f9   : > { %v2148_v42 = vadd.f32 %v2485_v20, %v2147_v5 }
 0x9fa   : > { %v2137_v25 = vsel %vm2136_vm7, %v2483_v18, %v2133_v17 }
 0x9fb   : > { %v2142_v32 = vsel %vm2139_vm9, %v2141_v58, %v2137_v25  ;;  %v2152_v24 = vsel %vm2151_vm6, %v2485_v20, %v2148_v42 }
 0x9fc   : > { %2168 = vrot.lane.b32.xlu1 %v2142_v32, %s2535_s18  ;;  %v2157_v63 = vsel %vm2154_vm8, %v2156_v36, %v2152_v24 }
 0x9ff   : > { %2170 = vrot.lane.b32.xlu2 %v2157_v63, %s2535_s18 }
 0xa51   : > { %v2165_v45 = vpop.permute.xlu2 %2164 }
 0xa52   : > { %2397 = vst.msk [vmem:[%s2225_s17 + $0x140] sm:$0xff] %vm2178_vm10, %v2165_v45 }
 0xa59   : > { %v2171_v54 = vpop.permute.xlu2 %2170 }
 0xa5a   : > { %2400 = vst.msk [vmem:[%s2225_s17 + $0x158] sm:$0xff] %vm2178_vm10, %v2171_v54 }
 0xa68   : > { %v2167_v11 = vpop.permute.xlu0 %2166 }
 0xa69   : > { %2398 = vst.msk [vmem:[%s2225_s17 + $0x148] sm:$0xff] %vm2178_vm10, %v2167_v11 }
 0xa6b   :  { %660 = sbr.rel (!%p658_p0) target bundleno = 567 (0x237), region = 169 }
 0xa6e   : > { %v2169_v57 = vpop.permute.xlu1 %2168 }
 0xa6f   : > { %2399 = vst.msk [vmem:[%s2225_s17 + $0x150] sm:$0xff] %vm2178_vm10, %v2169_v57 }
 0xa70   :  { %2195 = dma.vmem_to_hbm [thread:$0]  %s2188_s30, 26112, %s2190_s3, [#allocation3], %s2537_s7, %s2537_s7, %s2538_s21  }
 0xa71   :  { %2514 = dma.done.wait [#allocation3], 26112  }
 0xa72   :  { %2515 = vsyncadd [#allocation3], 4294941184 }
 0xa73   :  { %2200 = vsyncpa [#allocation3], 1 }

</bundles_post_ra>
